<compile_context>
chip_gen: v7x
topology: tpu7x:2x2x1
jax: 0.10.0
libtpu: 0.0.40
codegen_flags: <defaults>
</compile_context>

<pallas_src>
import functools
import math

import jax
import jax.numpy as jnp
from jax.experimental import pallas as pl
from jax.experimental.pallas import tpu as pltpu


def _round_up(x, m):
    return ((x + m - 1) // m) * m


def _cdiv(a, b):
    return (a + b - 1) // b


# ---------------------------------------------------------------------------
# Kernel: grouped MXU dots (bf16 operands, f32 accumulate), whole-vreg pooling,
# VMEM-staged hidden activations, lane-dense output.
# ---------------------------------------------------------------------------
def lenet_client_kernel(x_ref, a1_ref, b1_ref, a2_ref, b2_ref, o_ref, hid_ref):
    # x_ref  : (BT, 784)  bf16, lane = h*28 + w
    # a1_ref : (140, 256) bf16, row = kh*28 + w_in, col = parity*128 + wp*10 + co
    # b1_ref : (1, 128)   f32,  lane = wp*10 + co (lanes 120..127 zero)
    # a2_ref : (640, 256) bf16, row = kh*128 + w_in*10 + ci, col = parity*128 + wp*20 + co
    # b2_ref : (1, 128)   f32,  lane = wp*20 + co (lanes 80..127 zero)
    # o_ref  : (BT, 512)  f32,  lane = h*128 + wp*20 + co (lanes h*128+80.. zero)
    # hid_ref: (BT, 1536) bf16 scratch, lane = h*128 + w*10 + c (lanes h*128+120.. zero)
    bt = x_ref.shape[0]
    a1 = a1_ref[...]
    b1 = b1_ref[...]
    a2 = a2_ref[...]
    b2 = b2_ref[...]

    # ---- conv1 (1 -> 10, k=5) + max_pool(2) + bias + ReLU ------------------
    # Groups of 4 output rows -> one (4*BT, 140) @ (140, 256) MXU dot each.
    for g in range(6):
        lhs = jnp.concatenate(
            [x_ref[:, (4 * g + r) * 28:(4 * g + r) * 28 + 140] for r in range(4)],
            axis=0)                                                 # (4*BT, 140) bf16
        y = jnp.dot(lhs, a1, preferred_element_type=jnp.float32)    # (4*BT, 256) f32
        for p in range(2):                                          # 2 pooled rows / group
            top = y[(2 * p) * bt:(2 * p + 1) * bt]
            bot = y[(2 * p + 1) * bt:(2 * p + 2) * bt]
            m = jnp.maximum(top, bot)                               # pool H
            m = jnp.maximum(m[:, :128], m[:, 128:])                 # pool W (parity halves)
            m = jnp.maximum(m + b1, 0.0)                            # bias (post-pool) + ReLU
            hid_ref[:, (2 * g + p) * 128:(2 * g + p + 1) * 128] = m.astype(jnp.bfloat16)

    # ---- conv2 (10 -> 20, k=5) + max_pool(2) + bias + ReLU -----------------
    # Groups of 4 output rows -> one (4*BT, 640) @ (640, 256) MXU dot each.
    # Each LHS window is a contiguous, lane-aligned 640-lane slice of hid_ref.
    for g in range(2):
        lhs = jnp.concatenate(
            [hid_ref[:, (4 * g + r) * 128:(4 * g + r) * 128 + 640] for r in range(4)],
            axis=0)                                                 # (4*BT, 640) bf16
        y = jnp.dot(lhs, a2, preferred_element_type=jnp.float32)    # (4*BT, 256) f32
        for p in range(2):
            top = y[(2 * p) * bt:(2 * p + 1) * bt]
            bot = y[(2 * p + 1) * bt:(2 * p + 2) * bt]
            m = jnp.maximum(top, bot)
            m = jnp.maximum(m[:, :128], m[:, 128:])
            m = jnp.maximum(m + b2, 0.0)
            o_ref[:, (2 * g + p) * 128:(2 * g + p + 1) * 128] = m


# ---------------------------------------------------------------------------
# Wrapper-side constant builders (pure XLA, run once per call on tiny arrays)
# ---------------------------------------------------------------------------
def _conv1_band_matrix(w1):
    """(10,1,5,5) -> (140,256). row = kh*28 + w_in,
    col = parity*128 + wp*10 + co with w_out = 2*wp + parity; 8 zero cols/half."""
    w = w1[:, 0].astype(jnp.float32)                      # (10, 5, 5) [co, kh, kw]
    kh = jnp.arange(5)[:, None, None, None, None]
    wi = jnp.arange(28)[None, :, None, None, None]
    par = jnp.arange(2)[None, None, :, None, None]
    wp = jnp.arange(12)[None, None, None, :, None]
    co = jnp.arange(10)[None, None, None, None, :]
    diff = wi - (2 * wp + par)                            # kw = w_in - w_out
    valid = (diff >= 0) & (diff <= 4)
    vals = w[co, kh, jnp.clip(diff, 0, 4)]                # (5,28,2,12,10)
    band = jnp.where(valid, vals, 0.0).reshape(140, 2, 120)
    band = jnp.pad(band, ((0, 0), (0, 0), (0, 8)))        # 120 -> 128 lanes per half
    return band.reshape(140, 256)


def _conv2_band_matrix(w2):
    """(20,10,5,5) -> (640,256). row = kh*128 + w_in*10 + ci (rows 120..127 of
    each kh block zero), col = parity*128 + wp*20 + co with w_out = 2*wp+parity."""
    w = w2.astype(jnp.float32)                            # [co, ci, kh, kw]
    kh = jnp.arange(5)[:, None, None, None, None, None]
    wi = jnp.arange(12)[None, :, None, None, None, None]
    ci = jnp.arange(10)[None, None, :, None, None, None]
    par = jnp.arange(2)[None, None, None, :, None, None]
    wp = jnp.arange(4)[None, None, None, None, :, None]
    co = jnp.arange(20)[None, None, None, None, None, :]
    diff = wi - (2 * wp + par)
    valid = (diff >= 0) & (diff <= 4)
    vals = w[co, ci, kh, jnp.clip(diff, 0, 4)]            # (5,12,10,2,4,20)
    band = jnp.where(valid, vals, 0.0).reshape(5, 120, 2, 80)
    band = jnp.pad(band, ((0, 0), (0, 8), (0, 0), (0, 48)))   # rows 120->128, cols 80->128
    return band.reshape(640, 256)


# ---------------------------------------------------------------------------
# Forward wrapper: batch tiling + pallas_call + final compress/CHW reorder
# ---------------------------------------------------------------------------
def lenet_client_forward(x_nchw, w1, b1, w2, b2, *, block_b=256):
    """x_nchw: (B, 1, 28, 28) float32 -> (B, 320) float32 (torch flatten order)."""
    B = x_nchw.shape[0]
    assert x_nchw.shape[1:] == (1, 28, 28)

    # Flatten each image row-major (lane = h*28 + w) and cast the slab to bf16.
    x2d = x_nchw.reshape(B, 28 * 28).astype(jnp.bfloat16)

    # Batch tile: multiple of 16 (bf16 sublane packing); default 256 fills the
    # 256-row MXU on v6e/v7x, but clamp so the grid has >= 2 steps whenever the
    # batch allows (v7x shards the parallel grid axis over both TensorCores).
    bt = _round_up(max(min(block_b, B), 1), 16)
    if B >= 32:
        bt = min(bt, _round_up(_cdiv(B, 2), 16))
    bp = _round_up(B, bt)
    if bp != B:
        x2d = jnp.pad(x2d, ((0, bp - B), (0, 0)))

    a1 = _conv1_band_matrix(w1).astype(jnp.bfloat16)               # (140, 256)
    a2 = _conv2_band_matrix(w2).astype(jnp.bfloat16)               # (640, 256)
    b1c = jnp.pad(jnp.tile(b1.astype(jnp.float32), 12), (0, 8))[None, :]    # (1, 128)
    b2c = jnp.pad(jnp.tile(b2.astype(jnp.float32), 4), (0, 48))[None, :]    # (1, 128)

    out_pad = pl.pallas_call(
        lenet_client_kernel,
        out_shape=jax.ShapeDtypeStruct((bp, 512), jnp.float32),
        grid_spec=pltpu.PrefetchScalarGridSpec(
            num_scalar_prefetch=0,
            grid=(bp // bt,),
            in_specs=[
                pl.BlockSpec((bt, 784), lambda b: (b, 0)),
                pl.BlockSpec((140, 256), lambda b: (0, 0)),
                pl.BlockSpec((1, 128), lambda b: (0, 0)),
                pl.BlockSpec((640, 256), lambda b: (0, 0)),
                pl.BlockSpec((1, 128), lambda b: (0, 0)),
            ],
            out_specs=pl.BlockSpec((bt, 512), lambda b: (b, 0)),
            scratch_shapes=[pltpu.VMEM((bt, 12 * 128), jnp.bfloat16)],
        ),
        compiler_params=pltpu.CompilerParams(
            dimension_semantics=("parallel",),
            vmem_limit_bytes=32 * 1024 * 1024,
        ),
    )(x2d, a1, b1c, a2, b2c)

    # Kernel output lane layout is h*128 + w*20 + c (lanes 80..127 per row are
    # padding); torch's x.view(-1, 320) flattens NCHW, so compress + reorder
    # once on the small (B, 512) slab in XLA.
    out = out_pad[:B].reshape(B, 4, 128)[:, :, :80].reshape(B, 4, 4, 20)
    return jnp.transpose(out, (0, 3, 1, 2)).reshape(B, 320)


# ---------------------------------------------------------------------------
# Pure-JAX reference (correctness check)
# ---------------------------------------------------------------------------
def ref_forward(x, w1, b1, w2, b2):
    dn = ("NCHW", "OIHW", "NCHW")
    y = jax.lax.conv_general_dilated(x, w1, (1, 1), "VALID", dimension_numbers=dn)
    y = y + b1[None, :, None, None]
    y = jax.lax.reduce_window(y, -jnp.inf, jax.lax.max,
                              (1, 1, 2, 2), (1, 1, 2, 2), "VALID")
    y = jnp.maximum(y, 0.0)
    y = jax.lax.conv_general_dilated(y, w2, (1, 1), "VALID", dimension_numbers=dn)
    y = y + b2[None, :, None, None]
    y = jax.lax.reduce_window(y, -jnp.inf, jax.lax.max,
                              (1, 1, 2, 2), (1, 1, 2, 2), "VALID")
    y = jnp.maximum(y, 0.0)
    return y.reshape(y.shape[0], -1)


if __name__ == "__main__":
    key = jax.random.PRNGKey(0)
    kx, k1, k2, k3, k4 = jax.random.split(key, 5)

    # Deterministic init mirroring the module's __init__:
    #   conv weights ~ N(0, sqrt(2/n)), n = kH*kW*out_channels
    #   conv biases  ~ U(-1/sqrt(fan_in), 1/sqrt(fan_in))  (torch default)
    n1 = 5 * 5 * 10
    n2 = 5 * 5 * 20
    w1 = jax.random.normal(k1, (10, 1, 5, 5), jnp.float32) * math.sqrt(2.0 / n1)
    w2 = jax.random.normal(k2, (20, 10, 5, 5), jnp.float32) * math.sqrt(2.0 / n2)
    b1 = jax.random.uniform(k3, (10,), jnp.float32,
                            -1.0 / math.sqrt(25.0), 1.0 / math.sqrt(25.0))
    b2 = jax.random.uniform(k4, (20,), jnp.float32,
                            -1.0 / math.sqrt(250.0), 1.0 / math.sqrt(250.0))

    # Small MNIST-shaped batch; block_b=32 -> 2 grid steps to exercise tiling.
    x = jax.random.normal(kx, (64, 1, 28, 28), jnp.float32)

    fwd = jax.jit(functools.partial(lenet_client_forward, block_b=32))
    out = jax.block_until_ready(fwd(x, w1, b1, w2, b2))

    expected = ref_forward(x, w1, b1, w2, b2)
    assert out.shape == (64, 320), out.shape
    max_err = float(jnp.max(jnp.abs(out - expected)))
    # bf16 MXU operands with f32 accumulation vs an all-f32 reference.
    assert max_err < 6e-2, f"mismatch vs reference: {max_err}"

    print("KERNEL_OK")
</pallas_src>

<mosaic_0001>
module attributes {stable_mosaic.version = 11 : i64} {
  func.func @lenet_client_kernel(%arg0: i32, %arg1: memref<32x784xbf16, #tpu.memory_space<vmem>>, %arg2: memref<140x256xbf16, #tpu.memory_space<vmem>>, %arg3: memref<1x128xf32, #tpu.memory_space<vmem>>, %arg4: memref<640x256xbf16, #tpu.memory_space<vmem>>, %arg5: memref<1x128xf32, #tpu.memory_space<vmem>>, %arg6: memref<32x512xf32, #tpu.memory_space<vmem>>, %arg7: memref<32x1536xbf16, #tpu.memory_space<vmem>>) attributes {dimension_semantics = [#tpu.dimension_semantics<parallel>], iteration_bounds = array<i64: 2>, scalar_prefetch = 0 : i64, scratch_operands = 1 : i64, tpu.core_type = #tpu.core_type<tc>, window_params = [{transform_indices = @transform_0, window_bounds = array<i64: 32, 784>}, {pipeline_mode = #tpu.pipeline_mode<synchronous>, transform_indices = @transform_1, window_bounds = array<i64: 140, 256>}, {pipeline_mode = #tpu.pipeline_mode<synchronous>, transform_indices = @transform_2, window_bounds = array<i64: 1, 128>}, {pipeline_mode = #tpu.pipeline_mode<synchronous>, transform_indices = @transform_3, window_bounds = array<i64: 640, 256>}, {pipeline_mode = #tpu.pipeline_mode<synchronous>, transform_indices = @transform_4, window_bounds = array<i64: 1, 128>}, {transform_indices = @transform_5, window_bounds = array<i64: 32, 512>}]} {
    %c0 = arith.constant 0 : index
    %c0_0 = arith.constant 0 : index
    %0 = vector.load %arg2[%c0, %c0_0] : memref<140x256xbf16, #tpu.memory_space<vmem>>, vector<140x256xbf16>
    %c0_1 = arith.constant 0 : index
    %c0_2 = arith.constant 0 : index
    %1 = vector.load %arg3[%c0_1, %c0_2] : memref<1x128xf32, #tpu.memory_space<vmem>>, vector<1x128xf32>
    %c0_3 = arith.constant 0 : index
    %c0_4 = arith.constant 0 : index
    %2 = vector.load %arg4[%c0_3, %c0_4] : memref<640x256xbf16, #tpu.memory_space<vmem>>, vector<640x256xbf16>
    %c0_5 = arith.constant 0 : index
    %c0_6 = arith.constant 0 : index
    %3 = vector.load %arg5[%c0_5, %c0_6] : memref<1x128xf32, #tpu.memory_space<vmem>>, vector<1x128xf32>
    %c0_7 = arith.constant 0 : index
    %c0_8 = arith.constant 0 : index
    %4 = vector.load %arg1[%c0_7, %c0_8] : memref<32x784xbf16, #tpu.memory_space<vmem>>, vector<32x140xbf16>
    %c0_9 = arith.constant 0 : index
    %c28 = arith.constant 28 : index
    %5 = vector.load %arg1[%c0_9, %c28] : memref<32x784xbf16, #tpu.memory_space<vmem>>, vector<32x140xbf16>
    %c0_10 = arith.constant 0 : index
    %c56 = arith.constant 56 : index
    %6 = vector.load %arg1[%c0_10, %c56] : memref<32x784xbf16, #tpu.memory_space<vmem>>, vector<32x140xbf16>
    %c0_11 = arith.constant 0 : index
    %c84 = arith.constant 84 : index
    %7 = vector.load %arg1[%c0_11, %c84] : memref<32x784xbf16, #tpu.memory_space<vmem>>, vector<32x140xbf16>
    %8 = tpu.concatenate %4, %5, %6, %7 in 0 : vector<32x140xbf16>, vector<32x140xbf16>, vector<32x140xbf16>, vector<32x140xbf16> -> vector<128x140xbf16>
    %cst = arith.constant dense<0.000000e+00> : vector<128x256xf32>
    %9 = tpu.matmul %8, %0, %cst {dimension_numbers = #tpu.dot_dimension_numbers<[1], [0], [0], [1], [0, 0, 1, 1], [], []>} : vector<128x140xbf16>, vector<140x256xbf16>, vector<128x256xf32> -> vector<128x256xf32>
    %10 = vector.extract_strided_slice %9 {offsets = [0, 0], sizes = [32, 256], strides = [1, 1]} : vector<128x256xf32> to vector<32x256xf32>
    %11 = vector.extract_strided_slice %9 {offsets = [32, 0], sizes = [32, 256], strides = [1, 1]} : vector<128x256xf32> to vector<32x256xf32>
    %12 = arith.maximumf %10, %11 : vector<32x256xf32>
    %13 = vector.extract_strided_slice %12 {offsets = [0, 0], sizes = [32, 128], strides = [1, 1]} : vector<32x256xf32> to vector<32x128xf32>
    %14 = vector.extract_strided_slice %12 {offsets = [0, 128], sizes = [32, 128], strides = [1, 1]} : vector<32x256xf32> to vector<32x128xf32>
    %15 = arith.maximumf %13, %14 : vector<32x128xf32>
    %16 = vector.broadcast %1 : vector<1x128xf32> to vector<32x128xf32>
    %17 = arith.addf %15, %16 : vector<32x128xf32>
    %cst_12 = arith.constant 0.000000e+00 : f32
    %18 = vector.broadcast %cst_12 : f32 to vector<32x128xf32>
    %19 = arith.maximumf %17, %18 : vector<32x128xf32>
    %20 = arith.truncf %19 : vector<32x128xf32> to vector<32x128xbf16>
    %c0_13 = arith.constant 0 : index
    %c0_14 = arith.constant 0 : index
    %21 = vector.load %arg7[%c0_13, %c0_14] : memref<32x1536xbf16, #tpu.memory_space<vmem>>, vector<32x128xbf16>
    tpu.vector_store %arg7[%c0_13, %c0_14], %20 {strides = array<i32>} : memref<32x1536xbf16, #tpu.memory_space<vmem>>, vector<32x128xbf16>,
    %22 = vector.extract_strided_slice %9 {offsets = [64, 0], sizes = [32, 256], strides = [1, 1]} : vector<128x256xf32> to vector<32x256xf32>
    %23 = vector.extract_strided_slice %9 {offsets = [96, 0], sizes = [32, 256], strides = [1, 1]} : vector<128x256xf32> to vector<32x256xf32>
    %24 = arith.maximumf %22, %23 : vector<32x256xf32>
    %25 = vector.extract_strided_slice %24 {offsets = [0, 0], sizes = [32, 128], strides = [1, 1]} : vector<32x256xf32> to vector<32x128xf32>
    %26 = vector.extract_strided_slice %24 {offsets = [0, 128], sizes = [32, 128], strides = [1, 1]} : vector<32x256xf32> to vector<32x128xf32>
    %27 = arith.maximumf %25, %26 : vector<32x128xf32>
    %28 = vector.broadcast %1 : vector<1x128xf32> to vector<32x128xf32>
    %29 = arith.addf %27, %28 : vector<32x128xf32>
    %cst_15 = arith.constant 0.000000e+00 : f32
    %30 = vector.broadcast %cst_15 : f32 to vector<32x128xf32>
    %31 = arith.maximumf %29, %30 : vector<32x128xf32>
    %32 = arith.truncf %31 : vector<32x128xf32> to vector<32x128xbf16>
    %c0_16 = arith.constant 0 : index
    %c128 = arith.constant 128 : index
    %33 = vector.load %arg7[%c0_16, %c128] : memref<32x1536xbf16, #tpu.memory_space<vmem>>, vector<32x128xbf16>
    tpu.vector_store %arg7[%c0_16, %c128], %32 {strides = array<i32>} : memref<32x1536xbf16, #tpu.memory_space<vmem>>, vector<32x128xbf16>,
    %c0_17 = arith.constant 0 : index
    %c112 = arith.constant 112 : index
    %34 = vector.load %arg1[%c0_17, %c112] : memref<32x784xbf16, #tpu.memory_space<vmem>>, vector<32x140xbf16>
    %c0_18 = arith.constant 0 : index
    %c140 = arith.constant 140 : index
    %35 = vector.load %arg1[%c0_18, %c140] : memref<32x784xbf16, #tpu.memory_space<vmem>>, vector<32x140xbf16>
    %c0_19 = arith.constant 0 : index
    %c168 = arith.constant 168 : index
    %36 = vector.load %arg1[%c0_19, %c168] : memref<32x784xbf16, #tpu.memory_space<vmem>>, vector<32x140xbf16>
    %c0_20 = arith.constant 0 : index
    %c196 = arith.constant 196 : index
    %37 = vector.load %arg1[%c0_20, %c196] : memref<32x784xbf16, #tpu.memory_space<vmem>>, vector<32x140xbf16>
    %38 = tpu.concatenate %34, %35, %36, %37 in 0 : vector<32x140xbf16>, vector<32x140xbf16>, vector<32x140xbf16>, vector<32x140xbf16> -> vector<128x140xbf16>
    %cst_21 = arith.constant dense<0.000000e+00> : vector<128x256xf32>
    %39 = tpu.matmul %38, %0, %cst_21 {dimension_numbers = #tpu.dot_dimension_numbers<[1], [0], [0], [1], [0, 0, 1, 1], [], []>} : vector<128x140xbf16>, vector<140x256xbf16>, vector<128x256xf32> -> vector<128x256xf32>
    %40 = vector.extract_strided_slice %39 {offsets = [0, 0], sizes = [32, 256], strides = [1, 1]} : vector<128x256xf32> to vector<32x256xf32>
    %41 = vector.extract_strided_slice %39 {offsets = [32, 0], sizes = [32, 256], strides = [1, 1]} : vector<128x256xf32> to vector<32x256xf32>
    %42 = arith.maximumf %40, %41 : vector<32x256xf32>
    %43 = vector.extract_strided_slice %42 {offsets = [0, 0], sizes = [32, 128], strides = [1, 1]} : vector<32x256xf32> to vector<32x128xf32>
    %44 = vector.extract_strided_slice %42 {offsets = [0, 128], sizes = [32, 128], strides = [1, 1]} : vector<32x256xf32> to vector<32x128xf32>
    %45 = arith.maximumf %43, %44 : vector<32x128xf32>
    %46 = vector.broadcast %1 : vector<1x128xf32> to vector<32x128xf32>
    %47 = arith.addf %45, %46 : vector<32x128xf32>
    %cst_22 = arith.constant 0.000000e+00 : f32
    %48 = vector.broadcast %cst_22 : f32 to vector<32x128xf32>
    %49 = arith.maximumf %47, %48 : vector<32x128xf32>
    %50 = arith.truncf %49 : vector<32x128xf32> to vector<32x128xbf16>
    %c0_23 = arith.constant 0 : index
    %c256 = arith.constant 256 : index
    %51 = vector.load %arg7[%c0_23, %c256] : memref<32x1536xbf16, #tpu.memory_space<vmem>>, vector<32x128xbf16>
    tpu.vector_store %arg7[%c0_23, %c256], %50 {strides = array<i32>} : memref<32x1536xbf16, #tpu.memory_space<vmem>>, vector<32x128xbf16>,
    %52 = vector.extract_strided_slice %39 {offsets = [64, 0], sizes = [32, 256], strides = [1, 1]} : vector<128x256xf32> to vector<32x256xf32>
    %53 = vector.extract_strided_slice %39 {offsets = [96, 0], sizes = [32, 256], strides = [1, 1]} : vector<128x256xf32> to vector<32x256xf32>
    %54 = arith.maximumf %52, %53 : vector<32x256xf32>
    %55 = vector.extract_strided_slice %54 {offsets = [0, 0], sizes = [32, 128], strides = [1, 1]} : vector<32x256xf32> to vector<32x128xf32>
    %56 = vector.extract_strided_slice %54 {offsets = [0, 128], sizes = [32, 128], strides = [1, 1]} : vector<32x256xf32> to vector<32x128xf32>
    %57 = arith.maximumf %55, %56 : vector<32x128xf32>
    %58 = vector.broadcast %1 : vector<1x128xf32> to vector<32x128xf32>
    %59 = arith.addf %57, %58 : vector<32x128xf32>
    %cst_24 = arith.constant 0.000000e+00 : f32
    %60 = vector.broadcast %cst_24 : f32 to vector<32x128xf32>
    %61 = arith.maximumf %59, %60 : vector<32x128xf32>
    %62 = arith.truncf %61 : vector<32x128xf32> to vector<32x128xbf16>
    %c0_25 = arith.constant 0 : index
    %c384 = arith.constant 384 : index
    %63 = vector.load %arg7[%c0_25, %c384] : memref<32x1536xbf16, #tpu.memory_space<vmem>>, vector<32x128xbf16>
    tpu.vector_store %arg7[%c0_25, %c384], %62 {strides = array<i32>} : memref<32x1536xbf16, #tpu.memory_space<vmem>>, vector<32x128xbf16>,
    %c0_26 = arith.constant 0 : index
    %c224 = arith.constant 224 : index
    %64 = vector.load %arg1[%c0_26, %c224] : memref<32x784xbf16, #tpu.memory_space<vmem>>, vector<32x140xbf16>
    %c0_27 = arith.constant 0 : index
    %c252 = arith.constant 252 : index
    %65 = vector.load %arg1[%c0_27, %c252] : memref<32x784xbf16, #tpu.memory_space<vmem>>, vector<32x140xbf16>
    %c0_28 = arith.constant 0 : index
    %c280 = arith.constant 280 : index
    %66 = vector.load %arg1[%c0_28, %c280] : memref<32x784xbf16, #tpu.memory_space<vmem>>, vector<32x140xbf16>
    %c0_29 = arith.constant 0 : index
    %c308 = arith.constant 308 : index
    %67 = vector.load %arg1[%c0_29, %c308] : memref<32x784xbf16, #tpu.memory_space<vmem>>, vector<32x140xbf16>
    %68 = tpu.concatenate %64, %65, %66, %67 in 0 : vector<32x140xbf16>, vector<32x140xbf16>, vector<32x140xbf16>, vector<32x140xbf16> -> vector<128x140xbf16>
    %cst_30 = arith.constant dense<0.000000e+00> : vector<128x256xf32>
    %69 = tpu.matmul %68, %0, %cst_30 {dimension_numbers = #tpu.dot_dimension_numbers<[1], [0], [0], [1], [0, 0, 1, 1], [], []>} : vector<128x140xbf16>, vector<140x256xbf16>, vector<128x256xf32> -> vector<128x256xf32>
    %70 = vector.extract_strided_slice %69 {offsets = [0, 0], sizes = [32, 256], strides = [1, 1]} : vector<128x256xf32> to vector<32x256xf32>
    %71 = vector.extract_strided_slice %69 {offsets = [32, 0], sizes = [32, 256], strides = [1, 1]} : vector<128x256xf32> to vector<32x256xf32>
    %72 = arith.maximumf %70, %71 : vector<32x256xf32>
    %73 = vector.extract_strided_slice %72 {offsets = [0, 0], sizes = [32, 128], strides = [1, 1]} : vector<32x256xf32> to vector<32x128xf32>
    %74 = vector.extract_strided_slice %72 {offsets = [0, 128], sizes = [32, 128], strides = [1, 1]} : vector<32x256xf32> to vector<32x128xf32>
    %75 = arith.maximumf %73, %74 : vector<32x128xf32>
    %76 = vector.broadcast %1 : vector<1x128xf32> to vector<32x128xf32>
    %77 = arith.addf %75, %76 : vector<32x128xf32>
    %cst_31 = arith.constant 0.000000e+00 : f32
    %78 = vector.broadcast %cst_31 : f32 to vector<32x128xf32>
    %79 = arith.maximumf %77, %78 : vector<32x128xf32>
    %80 = arith.truncf %79 : vector<32x128xf32> to vector<32x128xbf16>
    %c0_32 = arith.constant 0 : index
    %c512 = arith.constant 512 : index
    %81 = vector.load %arg7[%c0_32, %c512] : memref<32x1536xbf16, #tpu.memory_space<vmem>>, vector<32x128xbf16>
    tpu.vector_store %arg7[%c0_32, %c512], %80 {strides = array<i32>} : memref<32x1536xbf16, #tpu.memory_space<vmem>>, vector<32x128xbf16>,
    %82 = vector.extract_strided_slice %69 {offsets = [64, 0], sizes = [32, 256], strides = [1, 1]} : vector<128x256xf32> to vector<32x256xf32>
    %83 = vector.extract_strided_slice %69 {offsets = [96, 0], sizes = [32, 256], strides = [1, 1]} : vector<128x256xf32> to vector<32x256xf32>
    %84 = arith.maximumf %82, %83 : vector<32x256xf32>
    %85 = vector.extract_strided_slice %84 {offsets = [0, 0], sizes = [32, 128], strides = [1, 1]} : vector<32x256xf32> to vector<32x128xf32>
    %86 = vector.extract_strided_slice %84 {offsets = [0, 128], sizes = [32, 128], strides = [1, 1]} : vector<32x256xf32> to vector<32x128xf32>
    %87 = arith.maximumf %85, %86 : vector<32x128xf32>
    %88 = vector.broadcast %1 : vector<1x128xf32> to vector<32x128xf32>
    %89 = arith.addf %87, %88 : vector<32x128xf32>
    %cst_33 = arith.constant 0.000000e+00 : f32
    %90 = vector.broadcast %cst_33 : f32 to vector<32x128xf32>
    %91 = arith.maximumf %89, %90 : vector<32x128xf32>
    %92 = arith.truncf %91 : vector<32x128xf32> to vector<32x128xbf16>
    %c0_34 = arith.constant 0 : index
    %c640 = arith.constant 640 : index
    %93 = vector.load %arg7[%c0_34, %c640] : memref<32x1536xbf16, #tpu.memory_space<vmem>>, vector<32x128xbf16>
    tpu.vector_store %arg7[%c0_34, %c640], %92 {strides = array<i32>} : memref<32x1536xbf16, #tpu.memory_space<vmem>>, vector<32x128xbf16>,
    %c0_35 = arith.constant 0 : index
    %c336 = arith.constant 336 : index
    %94 = vector.load %arg1[%c0_35, %c336] : memref<32x784xbf16, #tpu.memory_space<vmem>>, vector<32x140xbf16>
    %c0_36 = arith.constant 0 : index
    %c364 = arith.constant 364 : index
    %95 = vector.load %arg1[%c0_36, %c364] : memref<32x784xbf16, #tpu.memory_space<vmem>>, vector<32x140xbf16>
    %c0_37 = arith.constant 0 : index
    %c392 = arith.constant 392 : index
    %96 = vector.load %arg1[%c0_37, %c392] : memref<32x784xbf16, #tpu.memory_space<vmem>>, vector<32x140xbf16>
    %c0_38 = arith.constant 0 : index
    %c420 = arith.constant 420 : index
    %97 = vector.load %arg1[%c0_38, %c420] : memref<32x784xbf16, #tpu.memory_space<vmem>>, vector<32x140xbf16>
    %98 = tpu.concatenate %94, %95, %96, %97 in 0 : vector<32x140xbf16>, vector<32x140xbf16>, vector<32x140xbf16>, vector<32x140xbf16> -> vector<128x140xbf16>
    %cst_39 = arith.constant dense<0.000000e+00> : vector<128x256xf32>
    %99 = tpu.matmul %98, %0, %cst_39 {dimension_numbers = #tpu.dot_dimension_numbers<[1], [0], [0], [1], [0, 0, 1, 1], [], []>} : vector<128x140xbf16>, vector<140x256xbf16>, vector<128x256xf32> -> vector<128x256xf32>
    %100 = vector.extract_strided_slice %99 {offsets = [0, 0], sizes = [32, 256], strides = [1, 1]} : vector<128x256xf32> to vector<32x256xf32>
    %101 = vector.extract_strided_slice %99 {offsets = [32, 0], sizes = [32, 256], strides = [1, 1]} : vector<128x256xf32> to vector<32x256xf32>
    %102 = arith.maximumf %100, %101 : vector<32x256xf32>
    %103 = vector.extract_strided_slice %102 {offsets = [0, 0], sizes = [32, 128], strides = [1, 1]} : vector<32x256xf32> to vector<32x128xf32>
    %104 = vector.extract_strided_slice %102 {offsets = [0, 128], sizes = [32, 128], strides = [1, 1]} : vector<32x256xf32> to vector<32x128xf32>
    %105 = arith.maximumf %103, %104 : vector<32x128xf32>
    %106 = vector.broadcast %1 : vector<1x128xf32> to vector<32x128xf32>
    %107 = arith.addf %105, %106 : vector<32x128xf32>
    %cst_40 = arith.constant 0.000000e+00 : f32
    %108 = vector.broadcast %cst_40 : f32 to vector<32x128xf32>
    %109 = arith.maximumf %107, %108 : vector<32x128xf32>
    %110 = arith.truncf %109 : vector<32x128xf32> to vector<32x128xbf16>
    %c0_41 = arith.constant 0 : index
    %c768 = arith.constant 768 : index
    %111 = vector.load %arg7[%c0_41, %c768] : memref<32x1536xbf16, #tpu.memory_space<vmem>>, vector<32x128xbf16>
    tpu.vector_store %arg7[%c0_41, %c768], %110 {strides = array<i32>} : memref<32x1536xbf16, #tpu.memory_space<vmem>>, vector<32x128xbf16>,
    %112 = vector.extract_strided_slice %99 {offsets = [64, 0], sizes = [32, 256], strides = [1, 1]} : vector<128x256xf32> to vector<32x256xf32>
    %113 = vector.extract_strided_slice %99 {offsets = [96, 0], sizes = [32, 256], strides = [1, 1]} : vector<128x256xf32> to vector<32x256xf32>
    %114 = arith.maximumf %112, %113 : vector<32x256xf32>
    %115 = vector.extract_strided_slice %114 {offsets = [0, 0], sizes = [32, 128], strides = [1, 1]} : vector<32x256xf32> to vector<32x128xf32>
    %116 = vector.extract_strided_slice %114 {offsets = [0, 128], sizes = [32, 128], strides = [1, 1]} : vector<32x256xf32> to vector<32x128xf32>
    %117 = arith.maximumf %115, %116 : vector<32x128xf32>
    %118 = vector.broadcast %1 : vector<1x128xf32> to vector<32x128xf32>
    %119 = arith.addf %117, %118 : vector<32x128xf32>
    %cst_42 = arith.constant 0.000000e+00 : f32
    %120 = vector.broadcast %cst_42 : f32 to vector<32x128xf32>
    %121 = arith.maximumf %119, %120 : vector<32x128xf32>
    %122 = arith.truncf %121 : vector<32x128xf32> to vector<32x128xbf16>
    %c0_43 = arith.constant 0 : index
    %c896 = arith.constant 896 : index
    %123 = vector.load %arg7[%c0_43, %c896] : memref<32x1536xbf16, #tpu.memory_space<vmem>>, vector<32x128xbf16>
    tpu.vector_store %arg7[%c0_43, %c896], %122 {strides = array<i32>} : memref<32x1536xbf16, #tpu.memory_space<vmem>>, vector<32x128xbf16>,
    %c0_44 = arith.constant 0 : index
    %c448 = arith.constant 448 : index
    %124 = vector.load %arg1[%c0_44, %c448] : memref<32x784xbf16, #tpu.memory_space<vmem>>, vector<32x140xbf16>
    %c0_45 = arith.constant 0 : index
    %c476 = arith.constant 476 : index
    %125 = vector.load %arg1[%c0_45, %c476] : memref<32x784xbf16, #tpu.memory_space<vmem>>, vector<32x140xbf16>
    %c0_46 = arith.constant 0 : index
    %c504 = arith.constant 504 : index
    %126 = vector.load %arg1[%c0_46, %c504] : memref<32x784xbf16, #tpu.memory_space<vmem>>, vector<32x140xbf16>
    %c0_47 = arith.constant 0 : index
    %c532 = arith.constant 532 : index
    %127 = vector.load %arg1[%c0_47, %c532] : memref<32x784xbf16, #tpu.memory_space<vmem>>, vector<32x140xbf16>
    %128 = tpu.concatenate %124, %125, %126, %127 in 0 : vector<32x140xbf16>, vector<32x140xbf16>, vector<32x140xbf16>, vector<32x140xbf16> -> vector<128x140xbf16>
    %cst_48 = arith.constant dense<0.000000e+00> : vector<128x256xf32>
    %129 = tpu.matmul %128, %0, %cst_48 {dimension_numbers = #tpu.dot_dimension_numbers<[1], [0], [0], [1], [0, 0, 1, 1], [], []>} : vector<128x140xbf16>, vector<140x256xbf16>, vector<128x256xf32> -> vector<128x256xf32>
    %130 = vector.extract_strided_slice %129 {offsets = [0, 0], sizes = [32, 256], strides = [1, 1]} : vector<128x256xf32> to vector<32x256xf32>
    %131 = vector.extract_strided_slice %129 {offsets = [32, 0], sizes = [32, 256], strides = [1, 1]} : vector<128x256xf32> to vector<32x256xf32>
    %132 = arith.maximumf %130, %131 : vector<32x256xf32>
    %133 = vector.extract_strided_slice %132 {offsets = [0, 0], sizes = [32, 128], strides = [1, 1]} : vector<32x256xf32> to vector<32x128xf32>
    %134 = vector.extract_strided_slice %132 {offsets = [0, 128], sizes = [32, 128], strides = [1, 1]} : vector<32x256xf32> to vector<32x128xf32>
    %135 = arith.maximumf %133, %134 : vector<32x128xf32>
    %136 = vector.broadcast %1 : vector<1x128xf32> to vector<32x128xf32>
    %137 = arith.addf %135, %136 : vector<32x128xf32>
    %cst_49 = arith.constant 0.000000e+00 : f32
    %138 = vector.broadcast %cst_49 : f32 to vector<32x128xf32>
    %139 = arith.maximumf %137, %138 : vector<32x128xf32>
    %140 = arith.truncf %139 : vector<32x128xf32> to vector<32x128xbf16>
    %c0_50 = arith.constant 0 : index
    %c1024 = arith.constant 1024 : index
    %141 = vector.load %arg7[%c0_50, %c1024] : memref<32x1536xbf16, #tpu.memory_space<vmem>>, vector<32x128xbf16>
    tpu.vector_store %arg7[%c0_50, %c1024], %140 {strides = array<i32>} : memref<32x1536xbf16, #tpu.memory_space<vmem>>, vector<32x128xbf16>,
    %142 = vector.extract_strided_slice %129 {offsets = [64, 0], sizes = [32, 256], strides = [1, 1]} : vector<128x256xf32> to vector<32x256xf32>
    %143 = vector.extract_strided_slice %129 {offsets = [96, 0], sizes = [32, 256], strides = [1, 1]} : vector<128x256xf32> to vector<32x256xf32>
    %144 = arith.maximumf %142, %143 : vector<32x256xf32>
    %145 = vector.extract_strided_slice %144 {offsets = [0, 0], sizes = [32, 128], strides = [1, 1]} : vector<32x256xf32> to vector<32x128xf32>
    %146 = vector.extract_strided_slice %144 {offsets = [0, 128], sizes = [32, 128], strides = [1, 1]} : vector<32x256xf32> to vector<32x128xf32>
    %147 = arith.maximumf %145, %146 : vector<32x128xf32>
    %148 = vector.broadcast %1 : vector<1x128xf32> to vector<32x128xf32>
    %149 = arith.addf %147, %148 : vector<32x128xf32>
    %cst_51 = arith.constant 0.000000e+00 : f32
    %150 = vector.broadcast %cst_51 : f32 to vector<32x128xf32>
    %151 = arith.maximumf %149, %150 : vector<32x128xf32>
    %152 = arith.truncf %151 : vector<32x128xf32> to vector<32x128xbf16>
    %c0_52 = arith.constant 0 : index
    %c1152 = arith.constant 1152 : index
    %153 = vector.load %arg7[%c0_52, %c1152] : memref<32x1536xbf16, #tpu.memory_space<vmem>>, vector<32x128xbf16>
    tpu.vector_store %arg7[%c0_52, %c1152], %152 {strides = array<i32>} : memref<32x1536xbf16, #tpu.memory_space<vmem>>, vector<32x128xbf16>,
    %c0_53 = arith.constant 0 : index
    %c560 = arith.constant 560 : index
    %154 = vector.load %arg1[%c0_53, %c560] : memref<32x784xbf16, #tpu.memory_space<vmem>>, vector<32x140xbf16>
    %c0_54 = arith.constant 0 : index
    %c588 = arith.constant 588 : index
    %155 = vector.load %arg1[%c0_54, %c588] : memref<32x784xbf16, #tpu.memory_space<vmem>>, vector<32x140xbf16>
    %c0_55 = arith.constant 0 : index
    %c616 = arith.constant 616 : index
    %156 = vector.load %arg1[%c0_55, %c616] : memref<32x784xbf16, #tpu.memory_space<vmem>>, vector<32x140xbf16>
    %c0_56 = arith.constant 0 : index
    %c644 = arith.constant 644 : index
    %157 = vector.load %arg1[%c0_56, %c644] : memref<32x784xbf16, #tpu.memory_space<vmem>>, vector<32x140xbf16>
    %158 = tpu.concatenate %154, %155, %156, %157 in 0 : vector<32x140xbf16>, vector<32x140xbf16>, vector<32x140xbf16>, vector<32x140xbf16> -> vector<128x140xbf16>
    %cst_57 = arith.constant dense<0.000000e+00> : vector<128x256xf32>
    %159 = tpu.matmul %158, %0, %cst_57 {dimension_numbers = #tpu.dot_dimension_numbers<[1], [0], [0], [1], [0, 0, 1, 1], [], []>} : vector<128x140xbf16>, vector<140x256xbf16>, vector<128x256xf32> -> vector<128x256xf32>
    %160 = vector.extract_strided_slice %159 {offsets = [0, 0], sizes = [32, 256], strides = [1, 1]} : vector<128x256xf32> to vector<32x256xf32>
    %161 = vector.extract_strided_slice %159 {offsets = [32, 0], sizes = [32, 256], strides = [1, 1]} : vector<128x256xf32> to vector<32x256xf32>
    %162 = arith.maximumf %160, %161 : vector<32x256xf32>
    %163 = vector.extract_strided_slice %162 {offsets = [0, 0], sizes = [32, 128], strides = [1, 1]} : vector<32x256xf32> to vector<32x128xf32>
    %164 = vector.extract_strided_slice %162 {offsets = [0, 128], sizes = [32, 128], strides = [1, 1]} : vector<32x256xf32> to vector<32x128xf32>
    %165 = arith.maximumf %163, %164 : vector<32x128xf32>
    %166 = vector.broadcast %1 : vector<1x128xf32> to vector<32x128xf32>
    %167 = arith.addf %165, %166 : vector<32x128xf32>
    %cst_58 = arith.constant 0.000000e+00 : f32
    %168 = vector.broadcast %cst_58 : f32 to vector<32x128xf32>
    %169 = arith.maximumf %167, %168 : vector<32x128xf32>
    %170 = arith.truncf %169 : vector<32x128xf32> to vector<32x128xbf16>
    %c0_59 = arith.constant 0 : index
    %c1280 = arith.constant 1280 : index
    %171 = vector.load %arg7[%c0_59, %c1280] : memref<32x1536xbf16, #tpu.memory_space<vmem>>, vector<32x128xbf16>
    tpu.vector_store %arg7[%c0_59, %c1280], %170 {strides = array<i32>} : memref<32x1536xbf16, #tpu.memory_space<vmem>>, vector<32x128xbf16>,
    %172 = vector.extract_strided_slice %159 {offsets = [64, 0], sizes = [32, 256], strides = [1, 1]} : vector<128x256xf32> to vector<32x256xf32>
    %173 = vector.extract_strided_slice %159 {offsets = [96, 0], sizes = [32, 256], strides = [1, 1]} : vector<128x256xf32> to vector<32x256xf32>
    %174 = arith.maximumf %172, %173 : vector<32x256xf32>
    %175 = vector.extract_strided_slice %174 {offsets = [0, 0], sizes = [32, 128], strides = [1, 1]} : vector<32x256xf32> to vector<32x128xf32>
    %176 = vector.extract_strided_slice %174 {offsets = [0, 128], sizes = [32, 128], strides = [1, 1]} : vector<32x256xf32> to vector<32x128xf32>
    %177 = arith.maximumf %175, %176 : vector<32x128xf32>
    %178 = vector.broadcast %1 : vector<1x128xf32> to vector<32x128xf32>
    %179 = arith.addf %177, %178 : vector<32x128xf32>
    %cst_60 = arith.constant 0.000000e+00 : f32
    %180 = vector.broadcast %cst_60 : f32 to vector<32x128xf32>
    %181 = arith.maximumf %179, %180 : vector<32x128xf32>
    %182 = arith.truncf %181 : vector<32x128xf32> to vector<32x128xbf16>
    %c0_61 = arith.constant 0 : index
    %c1408 = arith.constant 1408 : index
    %183 = vector.load %arg7[%c0_61, %c1408] : memref<32x1536xbf16, #tpu.memory_space<vmem>>, vector<32x128xbf16>
    tpu.vector_store %arg7[%c0_61, %c1408], %182 {strides = array<i32>} : memref<32x1536xbf16, #tpu.memory_space<vmem>>, vector<32x128xbf16>,
    %c0_62 = arith.constant 0 : index
    %c0_63 = arith.constant 0 : index
    %184 = vector.load %arg7[%c0_62, %c0_63] : memref<32x1536xbf16, #tpu.memory_space<vmem>>, vector<32x640xbf16>
    %c0_64 = arith.constant 0 : index
    %c128_65 = arith.constant 128 : index
    %185 = vector.load %arg7[%c0_64, %c128_65] : memref<32x1536xbf16, #tpu.memory_space<vmem>>, vector<32x640xbf16>
    %c0_66 = arith.constant 0 : index
    %c256_67 = arith.constant 256 : index
    %186 = vector.load %arg7[%c0_66, %c256_67] : memref<32x1536xbf16, #tpu.memory_space<vmem>>, vector<32x640xbf16>
    %c0_68 = arith.constant 0 : index
    %c384_69 = arith.constant 384 : index
    %187 = vector.load %arg7[%c0_68, %c384_69] : memref<32x1536xbf16, #tpu.memory_space<vmem>>, vector<32x640xbf16>
    %188 = tpu.concatenate %184, %185, %186, %187 in 0 : vector<32x640xbf16>, vector<32x640xbf16>, vector<32x640xbf16>, vector<32x640xbf16> -> vector<128x640xbf16>
    %cst_70 = arith.constant dense<0.000000e+00> : vector<128x256xf32>
    %189 = tpu.matmul %188, %2, %cst_70 {dimension_numbers = #tpu.dot_dimension_numbers<[1], [0], [0], [1], [0, 0, 1, 1], [], []>} : vector<128x640xbf16>, vector<640x256xbf16>, vector<128x256xf32> -> vector<128x256xf32>
    %190 = vector.extract_strided_slice %189 {offsets = [0, 0], sizes = [32, 256], strides = [1, 1]} : vector<128x256xf32> to vector<32x256xf32>
    %191 = vector.extract_strided_slice %189 {offsets = [32, 0], sizes = [32, 256], strides = [1, 1]} : vector<128x256xf32> to vector<32x256xf32>
    %192 = arith.maximumf %190, %191 : vector<32x256xf32>
    %193 = vector.extract_strided_slice %192 {offsets = [0, 0], sizes = [32, 128], strides = [1, 1]} : vector<32x256xf32> to vector<32x128xf32>
    %194 = vector.extract_strided_slice %192 {offsets = [0, 128], sizes = [32, 128], strides = [1, 1]} : vector<32x256xf32> to vector<32x128xf32>
    %195 = arith.maximumf %193, %194 : vector<32x128xf32>
    %196 = vector.broadcast %3 : vector<1x128xf32> to vector<32x128xf32>
    %197 = arith.addf %195, %196 : vector<32x128xf32>
    %cst_71 = arith.constant 0.000000e+00 : f32
    %198 = vector.broadcast %cst_71 : f32 to vector<32x128xf32>
    %199 = arith.maximumf %197, %198 : vector<32x128xf32>
    %c0_72 = arith.constant 0 : index
    %c0_73 = arith.constant 0 : index
    %200 = vector.load %arg6[%c0_72, %c0_73] : memref<32x512xf32, #tpu.memory_space<vmem>>, vector<32x128xf32>
    tpu.vector_store %arg6[%c0_72, %c0_73], %199 {strides = array<i32>} : memref<32x512xf32, #tpu.memory_space<vmem>>, vector<32x128xf32>,
    %201 = vector.extract_strided_slice %189 {offsets = [64, 0], sizes = [32, 256], strides = [1, 1]} : vector<128x256xf32> to vector<32x256xf32>
    %202 = vector.extract_strided_slice %189 {offsets = [96, 0], sizes = [32, 256], strides = [1, 1]} : vector<128x256xf32> to vector<32x256xf32>
    %203 = arith.maximumf %201, %202 : vector<32x256xf32>
    %204 = vector.extract_strided_slice %203 {offsets = [0, 0], sizes = [32, 128], strides = [1, 1]} : vector<32x256xf32> to vector<32x128xf32>
    %205 = vector.extract_strided_slice %203 {offsets = [0, 128], sizes = [32, 128], strides = [1, 1]} : vector<32x256xf32> to vector<32x128xf32>
    %206 = arith.maximumf %204, %205 : vector<32x128xf32>
    %207 = vector.broadcast %3 : vector<1x128xf32> to vector<32x128xf32>
    %208 = arith.addf %206, %207 : vector<32x128xf32>
    %cst_74 = arith.constant 0.000000e+00 : f32
    %209 = vector.broadcast %cst_74 : f32 to vector<32x128xf32>
    %210 = arith.maximumf %208, %209 : vector<32x128xf32>
    %c0_75 = arith.constant 0 : index
    %c128_76 = arith.constant 128 : index
    %211 = vector.load %arg6[%c0_75, %c128_76] : memref<32x512xf32, #tpu.memory_space<vmem>>, vector<32x128xf32>
    tpu.vector_store %arg6[%c0_75, %c128_76], %210 {strides = array<i32>} : memref<32x512xf32, #tpu.memory_space<vmem>>, vector<32x128xf32>,
    %c0_77 = arith.constant 0 : index
    %c512_78 = arith.constant 512 : index
    %212 = vector.load %arg7[%c0_77, %c512_78] : memref<32x1536xbf16, #tpu.memory_space<vmem>>, vector<32x640xbf16>
    %c0_79 = arith.constant 0 : index
    %c640_80 = arith.constant 640 : index
    %213 = vector.load %arg7[%c0_79, %c640_80] : memref<32x1536xbf16, #tpu.memory_space<vmem>>, vector<32x640xbf16>
    %c0_81 = arith.constant 0 : index
    %c768_82 = arith.constant 768 : index
    %214 = vector.load %arg7[%c0_81, %c768_82] : memref<32x1536xbf16, #tpu.memory_space<vmem>>, vector<32x640xbf16>
    %c0_83 = arith.constant 0 : index
    %c896_84 = arith.constant 896 : index
    %215 = vector.load %arg7[%c0_83, %c896_84] : memref<32x1536xbf16, #tpu.memory_space<vmem>>, vector<32x640xbf16>
    %216 = tpu.concatenate %212, %213, %214, %215 in 0 : vector<32x640xbf16>, vector<32x640xbf16>, vector<32x640xbf16>, vector<32x640xbf16> -> vector<128x640xbf16>
    %cst_85 = arith.constant dense<0.000000e+00> : vector<128x256xf32>
    %217 = tpu.matmul %216, %2, %cst_85 {dimension_numbers = #tpu.dot_dimension_numbers<[1], [0], [0], [1], [0, 0, 1, 1], [], []>} : vector<128x640xbf16>, vector<640x256xbf16>, vector<128x256xf32> -> vector<128x256xf32>
    %218 = vector.extract_strided_slice %217 {offsets = [0, 0], sizes = [32, 256], strides = [1, 1]} : vector<128x256xf32> to vector<32x256xf32>
    %219 = vector.extract_strided_slice %217 {offsets = [32, 0], sizes = [32, 256], strides = [1, 1]} : vector<128x256xf32> to vector<32x256xf32>
    %220 = arith.maximumf %218, %219 : vector<32x256xf32>
    %221 = vector.extract_strided_slice %220 {offsets = [0, 0], sizes = [32, 128], strides = [1, 1]} : vector<32x256xf32> to vector<32x128xf32>
    %222 = vector.extract_strided_slice %220 {offsets = [0, 128], sizes = [32, 128], strides = [1, 1]} : vector<32x256xf32> to vector<32x128xf32>
    %223 = arith.maximumf %221, %222 : vector<32x128xf32>
    %224 = vector.broadcast %3 : vector<1x128xf32> to vector<32x128xf32>
    %225 = arith.addf %223, %224 : vector<32x128xf32>
    %cst_86 = arith.constant 0.000000e+00 : f32
    %226 = vector.broadcast %cst_86 : f32 to vector<32x128xf32>
    %227 = arith.maximumf %225, %226 : vector<32x128xf32>
    %c0_87 = arith.constant 0 : index
    %c256_88 = arith.constant 256 : index
    %228 = vector.load %arg6[%c0_87, %c256_88] : memref<32x512xf32, #tpu.memory_space<vmem>>, vector<32x128xf32>
    tpu.vector_store %arg6[%c0_87, %c256_88], %227 {strides = array<i32>} : memref<32x512xf32, #tpu.memory_space<vmem>>, vector<32x128xf32>,
    %229 = vector.extract_strided_slice %217 {offsets = [64, 0], sizes = [32, 256], strides = [1, 1]} : vector<128x256xf32> to vector<32x256xf32>
    %230 = vector.extract_strided_slice %217 {offsets = [96, 0], sizes = [32, 256], strides = [1, 1]} : vector<128x256xf32> to vector<32x256xf32>
    %231 = arith.maximumf %229, %230 : vector<32x256xf32>
    %232 = vector.extract_strided_slice %231 {offsets = [0, 0], sizes = [32, 128], strides = [1, 1]} : vector<32x256xf32> to vector<32x128xf32>
    %233 = vector.extract_strided_slice %231 {offsets = [0, 128], sizes = [32, 128], strides = [1, 1]} : vector<32x256xf32> to vector<32x128xf32>
    %234 = arith.maximumf %232, %233 : vector<32x128xf32>
    %235 = vector.broadcast %3 : vector<1x128xf32> to vector<32x128xf32>
    %236 = arith.addf %234, %235 : vector<32x128xf32>
    %cst_89 = arith.constant 0.000000e+00 : f32
    %237 = vector.broadcast %cst_89 : f32 to vector<32x128xf32>
    %238 = arith.maximumf %236, %237 : vector<32x128xf32>
    %c0_90 = arith.constant 0 : index
    %c384_91 = arith.constant 384 : index
    %239 = vector.load %arg6[%c0_90, %c384_91] : memref<32x512xf32, #tpu.memory_space<vmem>>, vector<32x128xf32>
    tpu.vector_store %arg6[%c0_90, %c384_91], %238 {strides = array<i32>} : memref<32x512xf32, #tpu.memory_space<vmem>>, vector<32x128xf32>,
    return
  }
  func.func @transform_0(%arg0: i32) -> (i32, i32) {
    %c0_i32 = arith.constant 0 : i32
    %c0_i32_0 = arith.constant 0 : i32
    return %arg0, %c0_i32 : i32, i32
  }
  func.func @transform_1(%arg0: i32) -> (i32, i32) {
    %c0_i32 = arith.constant 0 : i32
    %c0_i32_0 = arith.constant 0 : i32
    %c0_i32_1 = arith.constant 0 : i32
    return %c0_i32, %c0_i32_0 : i32, i32
  }
  func.func @transform_2(%arg0: i32) -> (i32, i32) {
    %c0_i32 = arith.constant 0 : i32
    %c0_i32_0 = arith.constant 0 : i32
    %c0_i32_1 = arith.constant 0 : i32
    return %c0_i32, %c0_i32_0 : i32, i32
  }
  func.func @transform_3(%arg0: i32) -> (i32, i32) {
    %c0_i32 = arith.constant 0 : i32
    %c0_i32_0 = arith.constant 0 : i32
    %c0_i32_1 = arith.constant 0 : i32
    return %c0_i32, %c0_i32_0 : i32, i32
  }
  func.func @transform_4(%arg0: i32) -> (i32, i32) {
    %c0_i32 = arith.constant 0 : i32
    %c0_i32_0 = arith.constant 0 : i32
    %c0_i32_1 = arith.constant 0 : i32
    return %c0_i32, %c0_i32_0 : i32, i32
  }
  func.func @transform_5(%arg0: i32) -> (i32, i32) {
    %c0_i32 = arith.constant 0 : i32
    %c0_i32_0 = arith.constant 0 : i32
    return %arg0, %c0_i32 : i32, i32
  }
}

</mosaic_0001>

<bundles_post_ra>
// kernel: tile.13
= control target key start
LH: loop header
LB: loop body
LE: loop exit
PB: predicated region body
PF: predicated region fallthrough
CT: control target
= control target key end

     0   :  { %s28_s0 = inlined_call_operand.vmem [shape: f32[10], index: 0, kind: input, shape index: {}]   ;;  %s29_s1 = inlined_call_operand.vmem [shape: f32[12,10], index: 1, kind: output, shape index: {}]  }
   0x1   :  { %v4_v0 = vld [vmem:[%s28_s0] ss:$0 sm:$0xff] }
   0x2   :  { %5 = vst [vmem:[%s29_s1] sm:$0xff] %v4_v0  ;;  %8 = vst [vmem:[%s29_s1 + $0x8] sm:$0xff] %v4_v0 }

// kernel: tile.14
= control target key start
LH: loop header
LB: loop body
LE: loop exit
PB: predicated region body
PF: predicated region fallthrough
CT: control target
= control target key end

     0   :  { %s99_s10 = smov 110   ;;  %s100_s11 = smov 90   ;;  %vm3_vm0 = vcmask 80896   ;;  %vm9_vm1 = vcmask 982896   ;;  %vm15_vm2 = vcmask 900896   ;;  %vm21_vm3 = vcmask 818896   ;;  %s159_s0 = inlined_call_operand.vmem [shape: f32[12,10], index: 0, kind: input, shape index: {}]   ;;  %s160_s1 = inlined_call_operand.vmem [shape: f32[120], index: 1, kind: output, shape index: {}]  }
   0x1   :  { %v77_v0 = vld [vmem:[%s159_s0 + $0xb] sm:$0x1]   ;;  %v79_v1 = vld [vmem:[%s159_s0 + $0x9] sm:$0x1]   ;;  %v78_v2 = vld [vmem:[%s159_s0 + $0xa] sm:$0x1]  }
   0x2   :  { %7 = vrot.lane.b32.xlu0 %v77_v0, %s99_s10  ;;  %19 = vrot.lane.b32.xlu1 %v79_v1, %s100_s11  ;;  %v80_v3 = vld [vmem:[%s159_s0 + $0x8] sm:$0x1]   ;;  %s101_s16 = smov 100   ;;  %s102_s17 = smov 80   ;;  %v81_v4 = vld [vmem:[%s159_s0 + $0x7] sm:$0x1]  }
   0x3   :  { %v2_v5 = vld [vmem:[%s159_s0] sm:$0x1]   ;;  %v82_v6 = vld [vmem:[%s159_s0 + $0x6] sm:$0x1]   ;;  %s103_s24 = smov 70   ;;  %s104_s25 = smov 60  }
   0x4   :  { %4 = vst.msk [vmem:[#allocation0] sm:$0x1] %vm3_vm0, %v2_v5   ;;  %v83_v7 = vld [vmem:[%s159_s0 + $0x5] sm:$0x1]   ;;  %v84_v8 = vld [vmem:[%s159_s0 + $0x4] sm:$0x1]  }
   0x5   :  { %s105_s30 = smov 50   ;;  %s106_s2 = smov 40   ;;  %v85_v9 = vld [vmem:[%s159_s0 + $0x3] sm:$0x1]   ;;  %v86_v10 = vld [vmem:[%s159_s0 + $0x2] sm:$0x1]  }
   0x6   :  { %13 = vrot.lane.b32.xlu0 %v78_v2, %s101_s16  ;;  %25 = vrot.lane.b32.xlu1 %v80_v3, %s102_s17  ;;  %s107_s7 = smov 30   ;;  %s108_s8 = smov 20   ;;  %v87_v11 = vld [vmem:[%s159_s0 + $0x1] sm:$0x1]   ;;  %vm27_vm4 = vcmask 736896   ;;  %vm33_vm5 = vcmask 654896  }
   0x7   :  { %s109_s0 = smov 10   ;;  %vm39_vm6 = vcmask 572896   ;;  %vm45_vm7 = vcmask 490896   ;;  %vm51_vm8 = vcmask 408896   ;;  %vm57_vm9 = vcmask 326896  }
   0x8   :  { %vm63_vm10 = vcmask 244896   ;;  %vm69_vm11 = vcmask 162896  }
   0xa   :  { %31 = vrot.lane.b32.xlu0 %v81_v4, %s103_s24  ;;  %37 = vrot.lane.b32.xlu1 %v82_v6, %s104_s25 }
   0xe   :  { %43 = vrot.lane.b32.xlu0 %v83_v7, %s105_s30  ;;  %49 = vrot.lane.b32.xlu1 %v84_v8, %s106_s2 }
  0x12   :  { %55 = vrot.lane.b32.xlu0 %v85_v9, %s107_s7  ;;  %61 = vrot.lane.b32.xlu1 %v86_v10, %s108_s8 }
  0x16   :  { %67 = vrot.lane.b32.xlu0 %v87_v11, %s109_s0 }
  0x74   :  { %v8_v12 = vpop.permute.xlu0 %7   ;;  %v20_v13 = vpop.permute.xlu1 %19  }
  0x75   :  { %10 = vst.msk [vmem:[#allocation0] sm:$0x1] %vm9_vm1, %v8_v12  }
  0x78   :  { %v14_v14 = vpop.permute.xlu0 %13   ;;  %v26_v15 = vpop.permute.xlu1 %25  }
  0x79   :  { %16 = vst.msk [vmem:[#allocation0] sm:$0x1] %vm15_vm2, %v14_v14  }
  0x7a   :  { %22 = vst.msk [vmem:[#allocation0] sm:$0x1] %vm21_vm3, %v20_v13  }
  0x7b   :  { %28 = vst.msk [vmem:[#allocation0] sm:$0x1] %vm27_vm4, %v26_v15  }
  0x7c   :  { %v32_v16 = vpop.permute.xlu0 %31   ;;  %v38_v17 = vpop.permute.xlu1 %37  }
  0x7d   :  { %34 = vst.msk [vmem:[#allocation0] sm:$0x1] %vm33_vm5, %v32_v16  }
  0x7e   :  { %40 = vst.msk [vmem:[#allocation0] sm:$0x1] %vm39_vm6, %v38_v17  }
  0x80   :  { %v44_v18 = vpop.permute.xlu0 %43   ;;  %v50_v19 = vpop.permute.xlu1 %49  }
  0x81   :  { %46 = vst.msk [vmem:[#allocation0] sm:$0x1] %vm45_vm7, %v44_v18  }
  0x82   :  { %52 = vst.msk [vmem:[#allocation0] sm:$0x1] %vm51_vm8, %v50_v19  }
  0x84   :  { %v56_v20 = vpop.permute.xlu0 %55   ;;  %v62_v21 = vpop.permute.xlu1 %61  }
  0x85   :  { %58 = vst.msk [vmem:[#allocation0] sm:$0x1] %vm57_vm9, %v56_v20  }
  0x86   :  { %64 = vst.msk [vmem:[#allocation0] sm:$0x1] %vm63_vm10, %v62_v21  }
  0x88   :  { %v68_v22 = vpop.permute.xlu0 %67  }
  0x89   :  { %70 = vst.msk [vmem:[#allocation0] sm:$0x1] %vm69_vm11, %v68_v22  }
  0x90   :  { %v74_v23 = vld [vmem:[#allocation0] sm:$0x1] }
  0x91   :  { %76 = vst [vmem:[%s160_s1] sm:$0x1] %v74_v23 }

// kernel: tile.18
= control target key start
LH: loop header
LB: loop body
LE: loop exit
PB: predicated region body
PF: predicated region fallthrough
CT: control target
= control target key end

     0   :  { %s22_s0 = inlined_call_operand.vmem [shape: f32[20], index: 0, kind: input, shape index: {}]   ;;  %s23_s1 = inlined_call_operand.vmem [shape: f32[4,20], index: 1, kind: output, shape index: {}]  }
   0x1   :  { %v4_v0 = vld [vmem:[%s22_s0] ss:$0 sm:$0xff] }
   0x2   :  { %5 = vst [vmem:[%s23_s1] sm:$0xf] %v4_v0 }

// kernel: tile.19
= control target key start
LH: loop header
LB: loop body
LE: loop exit
PB: predicated region body
PF: predicated region fallthrough
CT: control target
= control target key end

     0   :  { %vm7_vm0 = vcmask 162816   ;;  %s37_s8 = smov 20   ;;  %s38_s9 = smov 40   ;;  %vm13_vm1 = vcmask 654816   ;;  %vm19_vm2 = vcmask 490816   ;;  %vm25_vm3 = vcmask 326816   ;;  %s55_s0 = inlined_call_operand.vmem [shape: f32[4,20], index: 0, kind: input, shape index: {}]   ;;  %s56_s1 = inlined_call_operand.vmem [shape: f32[80], index: 1, kind: output, shape index: {}]  }
   0x1   :  { %v4_v0 = vld [vmem:[%s55_s0] sm:$0xf]  ;;  %s36_s0 = smov 60  }
   0x2   :  { %5 = vst [vmem:[#allocation1] sm:$0xf] %v4_v0 }
   0x9   :  { %v10_v1 = vld [vmem:[#allocation1 + $0x3] sm:$0x1]   ;;  %v22_v2 = vld [vmem:[#allocation1 + $0x1] sm:$0x1]   ;;  %v6_v3 = vld [vmem:[#allocation1] sm:$0x1]  }
   0xa   :  { %11 = vrot.lane.b32.xlu0 %v10_v1, %s36_s0  ;;  %23 = vrot.lane.b32.xlu1 %v22_v2, %s37_s8  ;;  %v16_v4 = vld [vmem:[#allocation1 + $0x2] sm:$0x1]   ;;  %8 = vst.msk [vmem:[#allocation0] sm:$0x1] %vm7_vm0, %v6_v3  }
   0xe   :  { %17 = vrot.lane.b32.xlu0 %v16_v4, %s38_s9 }
  0x7c   :  { %v12_v5 = vpop.permute.xlu0 %11   ;;  %v24_v6 = vpop.permute.xlu1 %23  }
  0x7d   :  { %14 = vst.msk [vmem:[#allocation0] sm:$0x1] %vm13_vm1, %v12_v5  }
  0x80   :  { %v18_v7 = vpop.permute.xlu0 %17  }
  0x81   :  { %20 = vst.msk [vmem:[#allocation0] sm:$0x1] %vm19_vm2, %v18_v7  }
  0x82   :  { %26 = vst.msk [vmem:[#allocation0] sm:$0x1] %vm25_vm3, %v24_v6  }
  0x89   :  { %v30_v8 = vld [vmem:[#allocation0] sm:$0x1] }
  0x8a   :  { %32 = vst [vmem:[%s56_s1] sm:$0x1] %v30_v8 }

// kernel: lenet_client_forward.1
= control target key start
LH: loop header
LB: loop body
LE: loop exit
PB: predicated region body
PF: predicated region fallthrough
CT: control target
= control target key end

     0   :  { %s4132_s18 = smov 0   ;;  %s5808_s0 = inlined_call_operand.vmem [shape: bf16[64,784], index: 0, kind: input, shape index: {}]   ;;  %s5809_s1 = inlined_call_operand.vmem [shape: bf16[140,256], index: 1, kind: input, shape index: {}]   ;;  %s5810_s2 = inlined_call_operand.vmem [shape: f32[1,128], index: 2, kind: input, shape index: {}]   ;;  %s5811_s3 = inlined_call_operand.vmem [shape: bf16[640,256], index: 3, kind: input, shape index: {}]   ;;  %s5812_s4 = inlined_call_operand.vmem [shape: f32[1,128], index: 4, kind: input, shape index: {}]   ;;  %s5813_s5 = inlined_call_operand.vmem [shape: f32[64,512], index: 5, kind: output, shape index: {}]  }
   0x1 LB: > { %s3520_s19 = sadd.s32 4294967295, %s4091_s18   ;;  %p3524_p0 = scmp.ge.s32.totalorder %s4091_s18, 1  ;;  %s4091_s18 = sphi %s4132_s18, %s15_s18  }
   0x2   : > { %p189_p1 = scmp.lt.s32.totalorder %s4091_s18, 3 }
   0x4   : > { %p190_p2 = pnand %p3524_p0, %p189_p1 }
   0x6   : > { %193 = sbr.rel (%p190_p2) target bundleno = 1131 (0x46b), region = 40 }
   0xd   : > { %s3525_s20 = sshll.u32 %s3520_s19, 2  ;;  %v4143_v0 = vld [vmem:[%s5809_s1 + $0x4] ss:$8 sps:$4 sm:$0xff]   ;;  %v4148_v1 = vld [vmem:[%s5809_s1] ss:$8 sps:$4 sm:$0xff]   ;;  %s4093_s14 = smov 100  }
   0xe   : > { %p220_p3 = scmp.lt.s32.totalorder %s3525_s20, 7  ;;  %515 = vmatprep.subr.bf16.mxu0 %v4143_v0  ;;  %v4154_v2 = vld [vmem:[%s5809_s1 + $0x14] ss:$8 sps:$4 sm:$0xff]   ;;  %825 = vmatprep.subr.bf16.mxu1 %v4143_v0  ;;  %v4163_v3 = vld [vmem:[%s5809_s1 + $0x10] ss:$8 sps:$4 sm:$0xff]   ;;  %vm483_vm0 = vcmask 97280  }
   0xf   : > { %516 = vmatpush1.bf16.msra.mxu0 %v4148_v1  ;;  %826 = vmatpush1.bf16.msra.mxu1 %v4148_v1  ;;  %v4170_v4 = vld [vmem:[%s5809_s1 + $0x24] ss:$8 sps:$4 sm:$0xff]   ;;  %v4177_v5 = vld [vmem:[%s5809_s1 + $0x20] ss:$8 sps:$4 sm:$0xff]   ;;  %v4188_v6 = vld [vmem:[%s5809_s1 + $0x34] ss:$8 sps:$4 sm:$0xff]  }
  0x10   : > { %s5878_s20 = smov (!%p220_p3, %s3525_s20), 7  ;;  %517 = vmatprep.subr.bf16.mxu0 %v4154_v2  ;;  %827 = vmatprep.subr.bf16.mxu1 %v4154_v2  ;;  %v4207_v10 = vld [vmem:[%s5809_s1 + $0x30] ss:$8 sps:$4 sm:$0xff]   ;;  %v4222_v13 = vld [vmem:[%s5809_s1 + $0x44] ss:$8 sps:$4 sm:$0xff]   ;;  %s4094_s25 = smov 72  }
  0x11   : > { %s3863_s6 = smul.u32 28, %s5878_s20  ;;  %v4236_v14 = vld [vmem:[%s5809_s1 + $0x40] ss:$8 sps:$4 sm:$0xff]   ;;  %v4242_v15 = vld [vmem:[%s5809_s1 + $0x54] ss:$8 sps:$4 sm:$0xff]   ;;  %vm508_vm1 = vcmask 1045504  }
  0x12   : > { %v4254_v16 = vld [vmem:[%s5809_s1 + $0x50] ss:$8 sps:$4 sm:$0xff]   ;;  %v4260_v17 = vld [vmem:[%s5809_s1 + $0x64] ss:$8 sps:$4 sm:$0xff]   ;;  %v4275_v19 = vld [vmem:[%s5809_s1 + $0x60] ss:$8 sps:$4 sm:$0xff]  }
  0x13   : > { %s4182_s11 = scalar_lea.vmem %s5808_s0, %s3863_s6  ;;  %518 = vmatpush1.bf16.msra.mxu0 %v4163_v3  ;;  %828 = vmatpush1.bf16.msra.mxu1 %v4163_v3  ;;  %v4281_v20 = vld [vmem:[%s5809_s1 + $0x74] ss:$8 sps:$4 sm:$0xff]   ;;  %v4287_v21 = vld [vmem:[%s5809_s1 + $0x70] ss:$8 sps:$4 sm:$0xff]   ;;  %s4095_s17 = smov 44   ;;  %vm364_vm2 = vcmask 818176  }
  0x14   : > { %v4192_v7 = vld [vmem:[%s4182_s11 + $0x3c] ss:$28 sps:$4 sm:$0xff]   ;;  %519 = vmatprep.subr.bf16.mxu0 %v4170_v4  ;;  %829 = vmatprep.subr.bf16.mxu1 %v4170_v4  ;;  %v4197_v8 = vld [vmem:[%s4182_s11 + $0x4] ss:$28 sps:$4 sm:$0xff]   ;;  %v3892_v26 = vld [vmem:[%s4182_s11 + $0xc] ss:$28 sps:$4 sm:$0xff]  }
  0x15   : > { %726 = vrot.lane.b32.xlu1 %v4192_v7, %s4093_s14  ;;  %v4202_v9 = vld [vmem:[%s4182_s11 + $0x40] ss:$28 sps:$4 sm:$0xff]   ;;  %722 = vrot.lane.b32.xlu0 %v4197_v8, %s4093_s14  ;;  %v4212_v11 = vld [vmem:[%s4182_s11 + $0x8] ss:$28 sps:$4 sm:$0xff]   ;;  %s4096_s19 = smov 16   ;;  %s4097_s21 = smov 32  }
  0x16   : > { %v4215_v12 = vld [vmem:[%s4182_s11 + $0x4] ss:$28 sps:$4 sm:$0xff]   ;;  %v4312_v24 = vld [vmem:[%s4182_s11 + $0x38] ss:$28 sps:$4 sm:$0xff]   ;;  %v4366_v29 = vld [vmem:[%s4182_s11 + $0xc] ss:$28 sps:$4 sm:$0xff]  }
  0x17   : > { %520 = vmatpush1.bf16.msra.mxu0 %v4177_v5  ;;  %830 = vmatpush1.bf16.msra.mxu1 %v4177_v5  ;;  %v4267_v18 = vld [vmem:[%s4182_s11] ss:$28 sps:$4 sm:$0xff]   ;;  %v4295_v22 = vld [vmem:[%s5809_s1 + $0x84] ss:$8 sps:$4 sm:$0x3f]   ;;  %vm377_vm3 = vcmask 588800  }
  0x18   : > { %521 = vmatprep.subr.bf16.mxu0 %v4188_v6  ;;  %3553 = vmatprep.mubr.msk.bf16.mxu0 %vm483_vm0, %v4215_v12  ;;  %v3932_v23 = vld [vmem:[%s5809_s1 + $0x80] ss:$8 sps:$4 sm:$0x3f]   ;;  %v3893_v27 = vld [vmem:[%s4182_s11 + $0x3c] ss:$28 sps:$4 sm:$0xff]   ;;  %vm390_vm4 = vcmask 359424  }
  0x19   : > { %831 = vmatprep.subr.bf16.mxu1 %v4188_v6  ;;  %728 = vrot.lane.b32.xlu1 %v4202_v9, %s4093_s14  ;;  %v4317_v25 = vsel %vm508_vm1, %v3932_v23, 0  ;;  %v3894_v28 = vld [vmem:[%s4182_s11 + $0x44] ss:$28 sps:$4 sm:$0xff]   ;;  %v4428_v33 = vld [vmem:[%s4182_s11 + $0x10] ss:$28 sps:$4 sm:$0xff]   ;;  %vm784_vm5 = vcmask 130048  }
  0x1a   : > { %724 = vrot.lane.b32.xlu0 %v4212_v11, %s4093_s14  ;;  %v4371_v30 = vld [vmem:[%s4182_s11 + $0x8] ss:$28 sps:$4 sm:$0xff]   ;;  %v4394_v32 = vld [vmem:[%s4182_s11 + $0x40] ss:$28 sps:$4 sm:$0xff]   ;;  %s4098_s22 = smov 48   ;;  %vm1108_vm6 = vcmask 261120  }
  0x1b   : > { %522 = vmatpush1.bf16.msra.mxu0 %v4207_v10  ;;  %832 = vmatpush1.bf16.msra.mxu1 %v4207_v10  ;;  %v4389_v31 = vld [vmem:[%s4182_s11 + $0x44] ss:$28 sps:$4 sm:$0xff]   ;;  %v4433_v34 = vld [vmem:[%s4182_s11 + $0xc] ss:$28 sps:$4 sm:$0xff]   ;;  %s4099_s23 = smov 64   ;;  %vm1412_vm7 = vcmask 392192  }
  0x1c   : > { %523 = vmatprep.subr.bf16.mxu0 %v4222_v13  ;;  %833 = vmatprep.subr.bf16.mxu1 %v4222_v13  ;;  %v4442_v35 = vld [vmem:[%s4182_s11 + $0x48] ss:$28 sps:$4 sm:$0xff]   ;;  %vm1736_vm8 = vcmask 523264   ;;  %s4100_s30 = smov 80   ;;  %vm2040_vm9 = vcmask 654336  }
  0x1d   : > { %734 = vrot.lane.b32.xlu1 %v4212_v11, %s4094_s25  ;;  %v4447_v36 = vld [vmem:[%s4182_s11 + $0x44] ss:$28 sps:$4 sm:$0xff]  }
  0x1e   : > { %732 = vrot.lane.b32.xlu0 %v4197_v8, %s4094_s25 }
  0x1f   : > { %524 = vmatpush1.bf16.msra.mxu0 %v4236_v14  ;;  %834 = vmatpush1.bf16.msra.mxu1 %v4236_v14 }
  0x20   : > { %525 = vmatprep.subr.bf16.mxu0 %v4242_v15  ;;  %835 = vmatprep.subr.bf16.mxu1 %v4242_v15 }
  0x21   : > { %738 = vrot.lane.b32.xlu1 %v4202_v9, %s4094_s25 }
  0x22   : > { %736 = vrot.lane.b32.xlu0 %v4192_v7, %s4094_s25 }
  0x23   : > { %526 = vmatpush1.bf16.msra.mxu0 %v4254_v16  ;;  %836 = vmatpush1.bf16.msra.mxu1 %v4254_v16 }
  0x24   : > { %527 = vmatprep.subr.bf16.mxu0 %v4260_v17  ;;  %837 = vmatprep.subr.bf16.mxu1 %v4260_v17 }
  0x25   : > { %358 = vrot.lane.b32.xlu1 %v4215_v12, %s4093_s14 }
  0x26   : > { %356 = vrot.lane.b32.xlu0 %v4267_v18, %s4093_s14 }
  0x27   : > { %528 = vmatpush1.bf16.msra.mxu0 %v4275_v19  ;;  %838 = vmatpush1.bf16.msra.mxu1 %v4275_v19 }
  0x28   : > { %529 = vmatprep.subr.bf16.mxu0 %v4281_v20  ;;  %839 = vmatprep.subr.bf16.mxu1 %v4281_v20 }
  0x29   : > { %744 = vrot.lane.b32.xlu1 %v4212_v11, %s4095_s17 }
  0x2a   : > { %742 = vrot.lane.b32.xlu0 %v4197_v8, %s4095_s17 }
  0x2b   : > { %530 = vmatpush1.bf16.msra.mxu0 %v4287_v21  ;;  %840 = vmatpush1.bf16.msra.mxu1 %v4287_v21 }
  0x2c   : > { %3552 = vmatprep.subr.msk.bf16.mxu0 %vm508_vm1, %v4295_v22  ;;  %3570 = vmatprep.subr.msk.bf16.mxu1 %vm508_vm1, %v4295_v22 }
  0x2d   : > { %1026 = vrot.lane.b32.xlu1 %v4212_v11, %s4093_s14 }
  0x2e   : > { %1024 = vrot.lane.b32.xlu0 %v4197_v8, %s4093_s14 }
  0x2f   : > { %532 = vmatpush1.bf16.msra.mxu0 %v4317_v25  ;;  %842 = vmatpush1.bf16.msra.mxu1 %v4317_v25 }
  0x30   : > { %1149 = vmatprep.subr.bf16.mxu0 %v4143_v0  ;;  %1453 = vmatprep.subr.bf16.mxu1 %v4143_v0 }
  0x31   : > { %360 = vrot.lane.b32.xlu1 %v4312_v24, %s4093_s14 }
  0x32   : > { %548 = vmatmul.mubr.bf16.vlgmr.msra.gmra.mrb[0].mxu0 %v4267_v18  ;;  %1028 = vrot.lane.b32.xlu0 %v3892_v26, %s4093_s14 }
  0x33   : > { %3554 = vmatprep.mubr.msk.bf16.mxu0 %vm483_vm0, %v3893_v27  ;;  %1150 = vmatpush1.bf16.msra.mxu0 %v4148_v1 }
  0x34   : > { %1151 = vmatprep.subr.bf16.mxu0 %v4154_v2 }
  0x35   : > { %746 = vrot.lane.b32.xlu1 %v4192_v7, %s4095_s17 }
  0x36   : > { %362 = vrot.lane.b32.xlu0 %v3893_v27, %s4093_s14 }
  0x37   : > { %1152 = vmatpush1.bf16.msra.mxu0 %v4163_v3 }
  0x38   : > { %1153 = vmatprep.subr.bf16.mxu0 %v4170_v4 }
  0x39   : > { %1030 = vrot.lane.b32.xlu1 %v4192_v7, %s4093_s14 }
  0x3a   : > { %558 = vmatmul.mubr.bf16.gmra.mrb[4].mxu0 %v4312_v24  ;;  %748 = vrot.lane.b32.xlu0 %v4202_v9, %s4095_s17 }
  0x3b   : > { %1154 = vmatpush1.bf16.msra.mxu0 %v4177_v5 }
  0x3c   : > { %1155 = vmatprep.subr.bf16.mxu0 %v4188_v6 }
  0x3d   : > { %1034 = vrot.lane.b32.xlu1 %v3894_v28, %s4093_s14 }
  0x3e   : > { %1032 = vrot.lane.b32.xlu0 %v4202_v9, %s4093_s14 }
  0x3f   : > { %1156 = vmatpush1.bf16.msra.mxu0 %v4207_v10 }
  0x40   : > { %1157 = vmatprep.subr.bf16.mxu0 %v4222_v13 }
  0x41   : > { %371 = vrot.lane.b32.xlu1 %v4215_v12, %s4094_s25 }
  0x42   : > { %369 = vrot.lane.b32.xlu0 %v4267_v18, %s4094_s25 }
  0x43   : > { %1158 = vmatpush1.bf16.msra.mxu0 %v4236_v14 }
  0x44   : > { %1159 = vmatprep.subr.bf16.mxu0 %v4242_v15 }
  0x45   : > { %754 = vrot.lane.b32.xlu1 %v4215_v12, %s4096_s19 }
  0x46   : > { %752 = vrot.lane.b32.xlu0 %v4267_v18, %s4096_s19 }
  0x47   : > { %1160 = vmatpush1.bf16.msra.mxu0 %v4254_v16 }
  0x48   : > { %1161 = vmatprep.subr.bf16.mxu0 %v4260_v17 }
  0x49   : > { %1058 = vrot.lane.b32.xlu1 %v4366_v29, %s4094_s25 }
  0x4a   : > { %1056 = vrot.lane.b32.xlu0 %v4371_v30, %s4094_s25 }
  0x4b   : > { %1162 = vmatpush1.bf16.msra.mxu0 %v4275_v19 }
  0x4c   : > { %1163 = vmatprep.subr.bf16.mxu0 %v4281_v20 }
  0x4d   : > { %375 = vrot.lane.b32.xlu1 %v3893_v27, %s4094_s25 }
  0x4e   : > { %373 = vrot.lane.b32.xlu0 %v4312_v24, %s4094_s25 }
  0x4f   : > { %1164 = vmatpush1.bf16.msra.mxu0 %v4287_v21 }
  0x50   : > { %3589 = vmatprep.subr.msk.bf16.mxu0 %vm508_vm1, %v4295_v22 }
  0x51   : > { %758 = vrot.lane.b32.xlu1 %v3893_v27, %s4096_s19 }
  0x52   : > { %756 = vrot.lane.b32.xlu0 %v4312_v24, %s4096_s19 }
  0x53   : > { %1166 = vmatpush1.bf16.msra.mxu0 %v4317_v25 }
  0x54   : > { %1777 = vmatprep.subr.bf16.mxu0 %v4143_v0 }
  0x55   : > { %1062 = vrot.lane.b32.xlu1 %v4389_v31, %s4094_s25 }
  0x56   : > { %1060 = vrot.lane.b32.xlu0 %v4394_v32, %s4094_s25 }
  0x59   : > { %384 = vrot.lane.b32.xlu1 %v4215_v12, %s4095_s17 }
  0x5a   : > { %382 = vrot.lane.b32.xlu0 %v4267_v18, %s4095_s17 }
  0x5d   : > { %1068 = vrot.lane.b32.xlu1 %v4366_v29, %s4095_s17 }
  0x5e   : > { %1066 = vrot.lane.b32.xlu0 %v4371_v30, %s4095_s17 }
  0x61   : > { %1336 = vrot.lane.b32.xlu1 %v4366_v29, %s4093_s14 }
  0x62   : > { %1334 = vrot.lane.b32.xlu0 %v4371_v30, %s4093_s14 }
  0x65   : > { %388 = vrot.lane.b32.xlu1 %v3893_v27, %s4095_s17 }
  0x66   : > { %386 = vrot.lane.b32.xlu0 %v4312_v24, %s4095_s17 }
  0x69   : > { %1072 = vrot.lane.b32.xlu1 %v4389_v31, %s4095_s17 }
  0x6a   : > { %1070 = vrot.lane.b32.xlu0 %v4394_v32, %s4095_s17 }
  0x6d   : > { %1340 = vrot.lane.b32.xlu1 %v4389_v31, %s4093_s14 }
  0x6e   : > { %1338 = vrot.lane.b32.xlu0 %v4394_v32, %s4093_s14 }
  0x71   : > { %1078 = vrot.lane.b32.xlu1 %v4212_v11, %s4097_s21 }
  0x72   : > { %1076 = vrot.lane.b32.xlu0 %v4197_v8, %s4097_s21 }
  0x75   : > { %1362 = vrot.lane.b32.xlu1 %v4428_v33, %s4094_s25 }
  0x76   : > { %1360 = vrot.lane.b32.xlu0 %v4433_v34, %s4094_s25 }
  0x79   : > { %1082 = vrot.lane.b32.xlu1 %v4202_v9, %s4097_s21 }
  0x7a   : > { %1080 = vrot.lane.b32.xlu0 %v4192_v7, %s4097_s21 }
  0x7d   : > { %1366 = vrot.lane.b32.xlu1 %v4442_v35, %s4094_s25 }
  0x7e   : > { %1364 = vrot.lane.b32.xlu0 %v4447_v36, %s4094_s25 }
  0x87   : > { %v727_v37 = vpop.permute.xlu1 %726  ;;  %v723_v38 = vpop.permute.xlu0 %722 }
  0x88   : > { %760 = vrot.lane.b32.xlu0 %v723_v38, %s4096_s19 }
  0x8b   : > { %v729_v39 = vpop.permute.xlu1 %728 }
  0x8c   : > { %v725_v40 = vpop.permute.xlu0 %724  ;;  %764 = vrot.lane.b32.xlu0 %v727_v37, %s4096_s19  ;;  %v731_v44 = vsel %vm364_vm2, %v727_v37, %v729_v39 }
  0x8d   : > { %v730_v41 = vsel %vm364_vm2, %v723_v38, %v725_v40 }
  0x8e   : > { %762 = vrot.lane.b32.xlu1 %v730_v41, %s4096_s19 }
  0x8f   : > { %v735_v42 = vpop.permute.xlu1 %734 }
  0x90   : > { %v733_v43 = vpop.permute.xlu0 %732 }
  0x91   : > { %768 = vrot.lane.b32.xlu0 %v733_v43, %s4096_s19  ;;  %v740_v47 = vsel %vm377_vm3, %v733_v43, %v735_v42 }
  0x92   : > { %766 = vrot.lane.b32.xlu1 %v731_v44, %s4096_s19 }
  0x93   : > { %v739_v45 = vpop.permute.xlu1 %738 }
  0x94   : > { %v737_v46 = vpop.permute.xlu0 %736 }
  0x95   : > { %772 = vrot.lane.b32.xlu0 %v737_v46, %s4096_s19  ;;  %v741_v50 = vsel %vm377_vm3, %v737_v46, %v739_v45 }
  0x96   : > { %770 = vrot.lane.b32.xlu1 %v740_v47, %s4096_s19 }
  0x97   : > { %v359_v48 = vpop.permute.xlu1 %358 }
  0x98   : > { %v357_v49 = vpop.permute.xlu0 %356  ;;  %3555 = vmatprep.mubr.msk.bf16.mxu0 %vm483_vm0, %v359_v48 }
  0x99   : > { %v365_v51 = vsel %vm364_vm2, %v357_v49, %v359_v48 }
  0x9a   : > { %774 = vrot.lane.b32.xlu1 %v741_v50, %s4096_s19  ;;  %568 = vmatmul.mubr.bf16.gmra.mrb[8].mxu0 %v365_v51 }
  0x9b   : > { %v745_v52 = vpop.permute.xlu1 %744 }
  0x9c   : > { %v743_v53 = vpop.permute.xlu0 %742 }
  0x9d   : > { %776 = vrot.lane.b32.xlu0 %v743_v53, %s4096_s19  ;;  %v750_v54 = vsel %vm390_vm4, %v743_v53, %v745_v52 }
  0x9e   : > { %778 = vrot.lane.b32.xlu1 %v750_v54, %s4096_s19 }
  0x9f   : > { %v1027_v55 = vpop.permute.xlu1 %1026 }
  0xa0   : > { %v1025_v56 = vpop.permute.xlu0 %1024 }
  0xa1   : > { %v1036_v57 = vsel %vm364_vm2, %v1025_v56, %v1027_v55 }
  0xa2   : > { %1084 = vrot.lane.b32.xlu0 %v1036_v57, %s4097_s21 }
  0xa3   : > { %v361_v58 = vpop.permute.xlu1 %360 }
  0xa4   : > { %v1029_v59 = vpop.permute.xlu0 %1028 }
  0xa5   : > { %v1037_v60 = vsel %vm364_vm2, %v1027_v55, %v1029_v59 }
  0xa6   : > { %1370 = vrot.lane.b32.xlu0 %v4433_v34, %s4095_s17  ;;  %1086 = vrot.lane.b32.xlu1 %v1037_v60, %s4097_s21 }
  0xa7   : > { %v747_v61 = vpop.permute.xlu1 %746 }
  0xa8   : > { %v363_v62 = vpop.permute.xlu0 %362 }
  0xa9   : > { %3556 = vmatprep.mubr.msk.bf16.mxu0 %vm483_vm0, %v363_v62  ;;  %v366_v63 = vsel %vm364_vm2, %v361_v58, %v363_v62 }
  0xaa   : > { %780 = vrot.lane.b32.xlu0 %v747_v61, %s4096_s19  ;;  %1372 = vrot.lane.b32.xlu1 %v4428_v33, %s4095_s17 }
  0xab   : > { %578 = vmatmul.mubr.bf16.gmra.mrb[12].mxu0 %v366_v63  ;;  %v1031_v7 = vpop.permute.xlu1 %1030 }
  0xac   : > { %v749_v8 = vpop.permute.xlu0 %748 }
  0xad   : > { %v751_v9 = vsel %vm390_vm4, %v747_v61, %v749_v8 }
  0xae   : > { %782 = vrot.lane.b32.xlu1 %v751_v9, %s4096_s19 }
  0xaf   : > { %v1035_v11 = vpop.permute.xlu1 %1034 }
  0xb0   : > { %v1033_v12 = vpop.permute.xlu0 %1032 }
  0xb1   : > { %v1039_v18 = vsel %vm364_vm2, %v1033_v12, %v1035_v11  ;;  %v1038_v23 = vsel %vm364_vm2, %v1031_v7, %v1033_v12 }
  0xb2   : > { %1090 = vrot.lane.b32.xlu1 %v1039_v18, %s4097_s21  ;;  %1088 = vrot.lane.b32.xlu0 %v1038_v23, %s4097_s21 }
  0xb3   : > { %v372_v24 = vpop.permute.xlu1 %371 }
  0xb4   : > { %v370_v26 = vpop.permute.xlu0 %369  ;;  %3557 = vmatprep.mubr.msk.bf16.mxu0 %vm483_vm0, %v372_v24 }
  0xb5   : > { %v378_v27 = vsel %vm377_vm3, %v370_v26, %v372_v24 }
  0xb6   : > { %1376 = vrot.lane.b32.xlu1 %v4442_v35, %s4095_s17  ;;  %1374 = vrot.lane.b32.xlu0 %v4447_v36, %s4095_s17 }
  0xb7   : > { %588 = vmatmul.mubr.bf16.gmra.mrb[16].mxu0 %v378_v27  ;;  %v755_v28 = vpop.permute.xlu1 %754 }
  0xb8   : > { %v753_v37 = vpop.permute.xlu0 %752  ;;  %3571 = vmatprep.mubr.msk.bf16.mxu1 %vm483_vm0, %v755_v28 }
  0xb9   : > { %v785_v38 = vsel %vm784_vm5, %v753_v37, %v755_v28 }
  0xba   : > { %858 = vmatmul.mubr.bf16.vlgmr.msra.gmra.mrb[0].mxu1 %v785_v38 }
  0xbb   : > { %v1059_v39 = vpop.permute.xlu1 %1058  ;;  %1454 = vmatpush1.bf16.msra.mxu1 %v4148_v1 }
  0xbc   : > { %v1057_v40 = vpop.permute.xlu0 %1056  ;;  %1455 = vmatprep.subr.bf16.mxu1 %v4154_v2 }
  0xbd   : > { %1092 = vrot.lane.b32.xlu0 %v1057_v40, %s4097_s21  ;;  %v1064_v41 = vsel %vm377_vm3, %v1057_v40, %v1059_v39 }
  0xbe   : > { %1094 = vrot.lane.b32.xlu1 %v1064_v41, %s4097_s21 }
  0xbf   : > { %v376_v42 = vpop.permute.xlu1 %375  ;;  %1456 = vmatpush1.bf16.msra.mxu1 %v4163_v3 }
  0xc0   : > { %v374_v43 = vpop.permute.xlu0 %373  ;;  %3558 = vmatprep.mubr.msk.bf16.mxu0 %vm483_vm0, %v376_v42  ;;  %1457 = vmatprep.subr.bf16.mxu1 %v4170_v4 }
  0xc1   : > { %1380 = vrot.lane.b32.xlu0 %v4371_v30, %s4098_s22  ;;  %v379_v44 = vsel %vm377_vm3, %v374_v43, %v376_v42 }
  0xc2   : > { %1382 = vrot.lane.b32.xlu1 %v4366_v29, %s4098_s22  ;;  %598 = vmatmul.mubr.bf16.gmra.mrb[20].mxu0 %v379_v44 }
  0xc3   : > { %v759_v45 = vpop.permute.xlu1 %758  ;;  %1458 = vmatpush1.bf16.msra.mxu1 %v4177_v5 }
  0xc4   : > { %v757_v46 = vpop.permute.xlu0 %756  ;;  %3572 = vmatprep.mubr.msk.bf16.mxu1 %vm483_vm0, %v759_v45  ;;  %1459 = vmatprep.subr.bf16.mxu1 %v4188_v6 }
  0xc5   : > { %1642 = vrot.lane.b32.xlu0 %v4433_v34, %s4093_s14  ;;  %v786_v47 = vsel %vm784_vm5, %v757_v46, %v759_v45 }
  0xc6   : > { %1644 = vrot.lane.b32.xlu1 %v4428_v33, %s4093_s14  ;;  %868 = vmatmul.mubr.bf16.gmra.mrb[4].mxu1 %v786_v47 }
  0xc7   : > { %v1063_v30 = vpop.permute.xlu1 %1062  ;;  %1460 = vmatpush1.bf16.msra.mxu1 %v4207_v10 }
  0xc8   : > { %v1061_v29 = vpop.permute.xlu0 %1060  ;;  %1461 = vmatprep.subr.bf16.mxu1 %v4222_v13 }
  0xc9   : > { %1096 = vrot.lane.b32.xlu0 %v1061_v29, %s4097_s21  ;;  %v1065_v48 = vsel %vm377_vm3, %v1061_v29, %v1063_v30 }
  0xca   : > { %1098 = vrot.lane.b32.xlu1 %v1065_v48, %s4097_s21 }
  0xcb   : > { %v385_v49 = vpop.permute.xlu1 %384  ;;  %1462 = vmatpush1.bf16.msra.mxu1 %v4236_v14 }
  0xcc   : > { %v383_v50 = vpop.permute.xlu0 %382  ;;  %3559 = vmatprep.mubr.msk.bf16.mxu0 %vm483_vm0, %v385_v49  ;;  %1463 = vmatprep.subr.bf16.mxu1 %v4242_v15 }
  0xcd   : > { %1384 = vrot.lane.b32.xlu0 %v4394_v32, %s4098_s22  ;;  %v391_v51 = vsel %vm390_vm4, %v383_v50, %v385_v49  ;;  %v4628_v50 = vld [vmem:[%s4182_s11 + $0x10] ss:$28 sps:$4 sm:$0xff]  }
  0xce   : > { %1386 = vrot.lane.b32.xlu1 %v4389_v31, %s4098_s22  ;;  %608 = vmatmul.mubr.bf16.gmra.mrb[24].mxu0 %v391_v51 }
  0xcf   : > { %v1069_v52 = vpop.permute.xlu1 %1068  ;;  %1464 = vmatpush1.bf16.msra.mxu1 %v4254_v16 }
  0xd0   : > { %v1067_v53 = vpop.permute.xlu0 %1066  ;;  %1465 = vmatprep.subr.bf16.mxu1 %v4260_v17 }
  0xd1   : > { %1646 = vrot.lane.b32.xlu0 %v4447_v36, %s4093_s14  ;;  %v1074_v32 = vsel %vm390_vm4, %v1067_v53, %v1069_v52 }
  0xd2   : > { %1648 = vrot.lane.b32.xlu1 %v4442_v35, %s4093_s14 }
  0xd3   : > { %v1337_v54 = vpop.permute.xlu1 %1336  ;;  %1466 = vmatpush1.bf16.msra.mxu1 %v4275_v19 }
  0xd4   : > { %v1335_v55 = vpop.permute.xlu0 %1334  ;;  %1467 = vmatprep.subr.bf16.mxu1 %v4281_v20 }
  0xd5   : > { %1100 = vrot.lane.b32.xlu0 %v1067_v53, %s4097_s21  ;;  %v1342_v31 = vsel %vm364_vm2, %v1335_v55, %v1337_v54 }
  0xd6   : > { %1102 = vrot.lane.b32.xlu1 %v1074_v32, %s4097_s21 }
  0xd7   : > { %v389_v56 = vpop.permute.xlu1 %388  ;;  %1468 = vmatpush1.bf16.msra.mxu1 %v4287_v21 }
  0xd8   : > { %v387_v57 = vpop.permute.xlu0 %386  ;;  %3560 = vmatprep.mubr.msk.bf16.mxu0 %vm483_vm0, %v389_v56  ;;  %3606 = vmatprep.subr.msk.bf16.mxu1 %vm508_vm1, %v4295_v22 }
  0xd9   : > { %1388 = vrot.lane.b32.xlu0 %v1342_v31, %s4098_s22  ;;  %v392_v58 = vsel %vm390_vm4, %v387_v57, %v389_v56 }
  0xda   : > { %1390 = vrot.lane.b32.xlu1 %v1337_v54, %s4098_s22  ;;  %618 = vmatmul.mubr.bf16.gmra.mrb[28].mxu0 %v392_v58  ;;  %v4637_v54 = vld [vmem:[%s4182_s11 + $0x14] ss:$28 sps:$4 sm:$0xff]   ;;  %v4651_v58 = vld [vmem:[%s4182_s11 + $0x48] ss:$28 sps:$4 sm:$0xff]  }
  0xdb   : > { %v1073_v59 = vpop.permute.xlu1 %1072  ;;  %1470 = vmatpush1.bf16.msra.mxu1 %v4317_v25 }
  0xdc   : > { %v1071_v60 = vpop.permute.xlu0 %1070  ;;  %2081 = vmatprep.subr.bf16.mxu1 %v4143_v0 }
  0xdd   : > { %v1075_v61 = vsel %vm390_vm4, %v1071_v60, %v1073_v59  ;;  %1104 = vrot.lane.b32.xlu0 %v1071_v60, %s4097_s21  ;;  %v4656_v59 = vld [vmem:[%s4182_s11 + $0x4c] ss:$28 sps:$4 sm:$0xff]  }
  0xde   : > { %1106 = vrot.lane.b32.xlu1 %v1075_v61, %s4097_s21 }
  0xdf   : > { %v1341_v62 = vpop.permute.xlu1 %1340 }
  0xe0   : > { %v1339_v63 = vpop.permute.xlu0 %1338 }
  0xe1   : > { %v1343_v7 = vsel %vm364_vm2, %v1339_v63, %v1341_v62 }
  0xe2   : > { %1394 = vrot.lane.b32.xlu1 %v1341_v62, %s4098_s22  ;;  %1392 = vrot.lane.b32.xlu0 %v1343_v7, %s4098_s22 }
  0xe3   : > { %v1079_v8 = vpop.permute.xlu1 %1078 }
  0xe4   : > { %v1077_v9 = vpop.permute.xlu0 %1076  ;;  %3590 = vmatprep.mubr.msk.bf16.mxu0 %vm483_vm0, %v1079_v8 }
  0xe5   : > { %v1109_v0 = vsel %vm1108_vm6, %v1077_v9, %v1079_v8  ;;  %v4068_v8 = vld [vmem:[%s5809_s1] ss:$8 sps:$4 sm:$0xff]  }
  0xe6   : > { %1182 = vmatmul.mubr.bf16.vlgmr.msra.gmra.mrb[32].mxu0 %v1109_v0  ;;  %v4069_v0 = vld [vmem:[%s5809_s1 + $0x14] ss:$8 sps:$4 sm:$0xff]  }
  0xe7   : > { %v1363_v11 = vpop.permute.xlu1 %1362  ;;  %1778 = vmatpush1.bf16.msra.mxu0 %v4148_v1  ;;  %v3934_v1 = vld [vmem:[%s4182_s11 + $0x14] ss:$28 sps:$4 sm:$0xff]  }
  0xe8   : > { %v1361_v12 = vpop.permute.xlu0 %1360  ;;  %1779 = vmatprep.subr.bf16.mxu0 %v4154_v2 }
  0xe9   : > { %1396 = vrot.lane.b32.xlu0 %v1361_v12, %s4098_s22  ;;  %v1368_v18 = vsel %vm377_vm3, %v1361_v12, %v1363_v11 }
  0xea   : > { %1398 = vrot.lane.b32.xlu1 %v1368_v18, %s4098_s22  ;;  %v4070_v18 = vld [vmem:[%s5809_s1 + $0x10] ss:$8 sps:$4 sm:$0xff]  }
  0xeb   : > { %v1083_v23 = vpop.permute.xlu1 %1082  ;;  %1780 = vmatpush1.bf16.msra.mxu0 %v4163_v3 }
  0xec   : > { %v1081_v24 = vpop.permute.xlu0 %1080  ;;  %3591 = vmatprep.mubr.msk.bf16.mxu0 %vm483_vm0, %v1083_v23  ;;  %1781 = vmatprep.subr.bf16.mxu0 %v4170_v4 }
  0xed   : > { %1662 = vrot.lane.b32.xlu0 %v4433_v34, %s4094_s25  ;;  %v1110_v2 = vsel %vm1108_vm6, %v1081_v24, %v1083_v23  ;;  %v4071_v24 = vld [vmem:[%s5809_s1 + $0x24] ss:$8 sps:$4 sm:$0xff]  }
  0xee   : > { %1664 = vrot.lane.b32.xlu1 %v4428_v33, %s4094_s25  ;;  %1192 = vmatmul.mubr.bf16.gmra.mrb[36].mxu0 %v1110_v2 }
  0xef   : > { %1782 = vmatpush1.bf16.msra.mxu0 %v4177_v5  ;;  %v1367_v26 = vpop.permute.xlu1 %1366  ;;  %v3935_v5 = vld [vmem:[%s4182_s11 + $0x4c] ss:$28 sps:$4 sm:$0xff]  }
  0xf0   : > { %1783 = vmatprep.subr.bf16.mxu0 %v4188_v6  ;;  %v1365_v3 = vpop.permute.xlu0 %1364 }
  0xf1   : > { %1666 = vrot.lane.b32.xlu0 %v3934_v1, %s4094_s25  ;;  %v1369_v4 = vsel %vm377_vm3, %v1365_v3, %v1367_v26 }
  0xf2   : > { %1400 = vrot.lane.b32.xlu1 %v1365_v3, %s4098_s22  ;;  %v4072_v3 = vld [vmem:[%s5809_s1 + $0x20] ss:$8 sps:$4 sm:$0xff]  }
  0xf3   : > { %1784 = vmatpush1.bf16.msra.mxu0 %v4207_v10 }
  0xf4   : > { %1785 = vmatprep.subr.bf16.mxu0 %v4222_v13 }
  0xf5   : > { %1402 = vrot.lane.b32.xlu0 %v1369_v4, %s4098_s22  ;;  %v4073_v4 = vld [vmem:[%s5809_s1 + $0x34] ss:$8 sps:$4 sm:$0xff]  }
  0xf6   : > { %1668 = vrot.lane.b32.xlu1 %v4447_v36, %s4094_s25 }
  0xf7   : > { %1786 = vmatpush1.bf16.msra.mxu0 %v4236_v14 }
  0xf8   : > { %1787 = vmatprep.subr.bf16.mxu0 %v4242_v15 }
  0xf9   : > { %1670 = vrot.lane.b32.xlu0 %v4442_v35, %s4094_s25 }
  0xfa   : > { %1672 = vrot.lane.b32.xlu1 %v3935_v5, %s4094_s25  ;;  %v761_v6 = vpop.permute.xlu0 %760 }
  0xfb   : > { %1788 = vmatpush1.bf16.msra.mxu0 %v4254_v16 }
  0xfc   : > { %1789 = vmatprep.subr.bf16.mxu0 %v4260_v17 }
  0xfe   : > { %v765_v10 = vpop.permute.xlu0 %764 }
  0xff   : > { %1790 = vmatpush1.bf16.msra.mxu0 %v4275_v19 }
 0x100   : > { %v763_v13 = vpop.permute.xlu1 %762  ;;  %1791 = vmatprep.subr.bf16.mxu0 %v4281_v20 }
 0x101   : > { %3573 = vmatprep.mubr.msk.bf16.mxu1 %vm483_vm0, %v763_v13  ;;  %v787_v14 = vsel %vm784_vm5, %v761_v6, %v763_v13 }
 0x102   : > { %878 = vmatmul.mubr.bf16.gmra.mrb[8].mxu1 %v787_v14  ;;  %v4075_v14 = vld [vmem:[%s5809_s1 + $0x44] ss:$8 sps:$4 sm:$0xff]  }
 0x103   : > { %1792 = vmatpush1.bf16.msra.mxu0 %v4287_v21  ;;  %v769_v16 = vpop.permute.xlu0 %768 }
 0x104   : > { %v767_v15 = vpop.permute.xlu1 %766  ;;  %3625 = vmatprep.subr.msk.bf16.mxu0 %vm508_vm1, %v4295_v22 }
 0x105   : > { %v4595_v27 = vpop.f32.mrb[0].mxu0  ;;  %3574 = vmatprep.mubr.msk.bf16.mxu1 %vm483_vm0, %v767_v15  ;;  %v788_v21 = vsel %vm784_vm5, %v765_v10, %v767_v15  ;;  %v4074_v10 = vld [vmem:[%s5809_s1 + $0x30] ss:$8 sps:$4 sm:$0xff]  }
 0x106   : > { %v4600_v17 = vpop.f32.mrb[1].mxu0 }
 0x107   : > { %v4602_v19 = vpop.f32.mrb[2].mxu0  ;;  %1794 = vmatpush1.bf16.msra.mxu0 %v4317_v25  ;;  %v773_v37 = vpop.permute.xlu0 %772 }
 0x108   : > { %v4604_v20 = vpop.f32.mrb[3].mxu0  ;;  %v771_v28 = vpop.permute.xlu1 %770 }
 0x109   : > { %v789_v43 = vsel %vm784_vm5, %v769_v16, %v771_v28 }
 0x10a   : > { %888 = vmatmul.mubr.bf16.gmra.mrb[12].mxu1 %v788_v21 }
 0x10b   : > { %3575 = vmatprep.mubr.msk.bf16.mxu1 %vm483_vm0, %v771_v28  ;;  %v4076_v28 = vld [vmem:[%s5809_s1 + $0x40] ss:$8 sps:$4 sm:$0xff]  }
 0x10c   : > { %v775_v39 = vpop.permute.xlu1 %774 }
 0x10d   : > { %v4609_v38 = vpop.f32.mrb[4].mxu0  ;;  %v790_v30 = vsel %vm784_vm5, %v773_v37, %v775_v39  ;;  %v4077_v37 = vld [vmem:[%s5809_s1 + $0x54] ss:$8 sps:$4 sm:$0xff]  }
 0x10e   : > { %v4611_v22 = vpop.f32.mrb[5].mxu0 }
 0x10f   : > { %v4613_v40 = vpop.f32.mrb[6].mxu0  ;;  %v777_v41 = vpop.permute.xlu0 %776 }
 0x110   : > { %v4615_v42 = vpop.f32.mrb[7].mxu0  ;;  %v779_v44 = vpop.permute.xlu1 %778 }
 0x111   : > { %v791_v53 = vsel %vm784_vm5, %v777_v41, %v779_v44 }
 0x112   : > { %898 = vmatmul.mubr.bf16.gmra.mrb[16].mxu1 %v789_v43  ;;  %v4078_v43 = vld [vmem:[%s5809_s1 + $0x50] ss:$8 sps:$4 sm:$0xff]  }
 0x113   : > { %3576 = vmatprep.mubr.msk.bf16.mxu1 %vm483_vm0, %v775_v39 }
 0x114   : > { %v1085_v45 = vpop.permute.xlu0 %1084 }
 0x118   : > { %v1087_v46 = vpop.permute.xlu1 %1086  ;;  %v1371_v47 = vpop.permute.xlu0 %1370 }
 0x119   : > { %3592 = vmatprep.mubr.msk.bf16.mxu0 %vm483_vm0, %v1087_v46  ;;  %v1111_v29 = vsel %vm1108_vm6, %v1085_v45, %v1087_v46  ;;  %1404 = vrot.lane.b32.xlu0 %v1371_v47, %s4098_s22  ;;  %v4079_v45 = vld [vmem:[%s5809_s1 + $0x64] ss:$8 sps:$4 sm:$0xff]  }
 0x11a   : > { %908 = vmatmul.mubr.bf16.gmra.mrb[20].mxu1 %v790_v30  ;;  %1202 = vmatmul.mubr.bf16.gmra.mrb[40].mxu0 %v1111_v29  ;;  %v4080_v30 = vld [vmem:[%s5809_s1 + $0x60] ss:$8 sps:$4 sm:$0xff]  }
 0x11b   : > { %3577 = vmatprep.mubr.msk.bf16.mxu1 %vm483_vm0, %v779_v44 }
 0x11c   : > { %v1373_v48 = vpop.permute.xlu1 %1372  ;;  %v781_v51 = vpop.permute.xlu0 %780 }
 0x11d   : > { %v1378_v49 = vsel %vm390_vm4, %v1371_v47, %v1373_v48  ;;  %1704 = vrot.lane.b32.xlu0 %v4433_v34, %s4099_s23  ;;  %v4081_v48 = vld [vmem:[%s5809_s1 + $0x74] ss:$8 sps:$4 sm:$0xff]  }
 0x11e   : > { %1406 = vrot.lane.b32.xlu1 %v1378_v49, %s4098_s22 }
 0x120   : > { %v783_v52 = vpop.permute.xlu1 %782 }
 0x121   : > { %1694 = vrot.lane.b32.xlu0 %v4628_v50, %s4095_s17  ;;  %v792_v57 = vsel %vm784_vm5, %v781_v51, %v783_v52  ;;  %v4082_v51 = vld [vmem:[%s5809_s1 + $0x70] ss:$8 sps:$4 sm:$0xff]  }
 0x122   : > { %918 = vmatmul.mubr.bf16.gmra.mrb[24].mxu1 %v791_v53  ;;  %1706 = vrot.lane.b32.xlu1 %v4428_v33, %s4099_s23 }
 0x123   : > { %3578 = vmatprep.mubr.msk.bf16.mxu1 %vm483_vm0, %v783_v52 }
 0x124   : > { %v1091_v34 = vpop.permute.xlu1 %1090  ;;  %v1089_v32 = vpop.permute.xlu0 %1088 }
 0x125   : > { %3593 = vmatprep.mubr.msk.bf16.mxu0 %vm483_vm0, %v1091_v34  ;;  %v1112_v55 = vsel %vm1108_vm6, %v1089_v32, %v1091_v34  ;;  %v4083_v34 = vld [vmem:[%s5809_s1 + $0x84] ss:$8 sps:$4 sm:$0x3f]  }
 0x126   : > { %1696 = vrot.lane.b32.xlu1 %v4637_v54, %s4095_s17  ;;  %1212 = vmatmul.mubr.bf16.gmra.mrb[44].mxu0 %v1112_v55 }
 0x128   : > { %v1377_v31 = vpop.permute.xlu1 %1376  ;;  %v1375_v56 = vpop.permute.xlu0 %1374 }
 0x129   : > { %v1379_v33 = vsel %vm390_vm4, %v1375_v56, %v1377_v31  ;;  %1408 = vrot.lane.b32.xlu0 %v1375_v56, %s4098_s22 }
 0x12a   : > { %928 = vmatmul.mubr.bf16.gmra.mrb[28].mxu1 %v792_v57  ;;  %1410 = vrot.lane.b32.xlu1 %v1379_v33, %s4098_s22 }
 0x12d   : > { %1708 = vrot.lane.b32.xlu0 %v4447_v36, %s4099_s23 }
 0x12e   : > { %1710 = vrot.lane.b32.xlu1 %v4442_v35, %s4099_s23 }
 0x12f   : > { %v1093_v60 = vpop.permute.xlu0 %1092 }
 0x130   : > { %v1095_v61 = vpop.permute.xlu1 %1094 }
 0x131   : > { %3594 = vmatprep.mubr.msk.bf16.mxu0 %vm483_vm0, %v1095_v61  ;;  %1698 = vrot.lane.b32.xlu0 %v4651_v58, %s4095_s17  ;;  %v1113_v62 = vsel %vm1108_vm6, %v1093_v60, %v1095_v61  ;;  %v3950_v61 = vld [vmem:[%s5811_s3 + $0x4] ss:$8 sps:$4 sm:$0xff]  }
 0x132   : > { %1700 = vrot.lane.b32.xlu1 %v4656_v59, %s4095_s17  ;;  %1222 = vmatmul.mubr.bf16.gmra.mrb[48].mxu0 %v1113_v62 }
 0x133   : > { %v1381_v36 = vpop.permute.xlu0 %1380  ;;  %2658 = vmatprep.subr.bf16.mxu0 %v3950_v61 }
 0x134   : > { %v1383_v63 = vpop.permute.xlu1 %1382 }
 0x135   : > { %v1413_v35 = vsel %vm1412_vm7, %v1381_v36, %v1383_v63  ;;  %3607 = vmatprep.mubr.msk.bf16.mxu1 %vm483_vm0, %v1383_v63 }
 0x136   : > { %1486 = vmatmul.mubr.bf16.vlgmr.msra.gmra.mrb[32].mxu1 %v1413_v35 }
 0x137   : > { %v1643_v7 = vpop.permute.xlu0 %1642  ;;  %2082 = vmatpush1.bf16.msra.mxu1 %v4068_v8 }
 0x138   : > { %v1645_v9 = vpop.permute.xlu1 %1644  ;;  %2083 = vmatprep.subr.bf16.mxu1 %v4069_v0 }
 0x139   : > { %v1650_v11 = vsel %vm364_vm2, %v1643_v7, %v1645_v9  ;;  %1714 = vrot.lane.b32.xlu1 %v1645_v9, %s4099_s23 }
 0x13a   : > { %1712 = vrot.lane.b32.xlu0 %v1650_v11, %s4099_s23 }
 0x13b   : > { %v1097_v12 = vpop.permute.xlu0 %1096  ;;  %2084 = vmatpush1.bf16.msra.mxu1 %v4070_v18 }
 0x13c   : > { %v1099_v23 = vpop.permute.xlu1 %1098  ;;  %2085 = vmatprep.subr.bf16.mxu1 %v4071_v24 }
 0x13d   : > { %3595 = vmatprep.mubr.msk.bf16.mxu0 %vm483_vm0, %v1099_v23  ;;  %1964 = vrot.lane.b32.xlu1 %v4637_v54, %s4093_s14  ;;  %v1114_v1 = vsel %vm1108_vm6, %v1097_v12, %v1099_v23 }
 0x13e   : > { %1962 = vrot.lane.b32.xlu0 %v4628_v50, %s4093_s14  ;;  %1232 = vmatmul.mubr.bf16.gmra.mrb[52].mxu0 %v1114_v1 }
 0x13f   : > { %v1385_v2 = vpop.permute.xlu0 %1384  ;;  %2086 = vmatpush1.bf16.msra.mxu1 %v4072_v3 }
 0x140   : > { %v1387_v26 = vpop.permute.xlu1 %1386  ;;  %2087 = vmatprep.subr.bf16.mxu1 %v4073_v4 }
 0x141   : > { %3608 = vmatprep.mubr.msk.bf16.mxu1 %vm483_vm0, %v1387_v26  ;;  %v1414_v5 = vsel %vm1412_vm7, %v1385_v2, %v1387_v26  ;;  %v4762_v2 = vld [vmem:[%s5810_s2] ss:$0 sm:$0xff] }
 0x142   : > { %1496 = vmatmul.mubr.bf16.gmra.mrb[36].mxu1 %v1414_v5 }
 0x143   : > { %v1647_v6 = vpop.permute.xlu0 %1646  ;;  %2088 = vmatpush1.bf16.msra.mxu1 %v4074_v10 }
 0x144   : > { %v1649_v13 = vpop.permute.xlu1 %1648  ;;  %2089 = vmatprep.subr.bf16.mxu1 %v4075_v14 }
 0x145   : > { %v1651_v15 = vsel %vm364_vm2, %v1647_v6, %v1649_v13  ;;  %1718 = vrot.lane.b32.xlu1 %v1649_v13, %s4099_s23 }
 0x146   : > { %1716 = vrot.lane.b32.xlu0 %v1651_v15, %s4099_s23 }
 0x147   : > { %v1101_v16 = vpop.permute.xlu0 %1100  ;;  %2090 = vmatpush1.bf16.msra.mxu1 %v4076_v28 }
 0x148   : > { %v1103_v21 = vpop.permute.xlu1 %1102  ;;  %2091 = vmatprep.subr.bf16.mxu1 %v4077_v37 }
 0x149   : > { %3596 = vmatprep.mubr.msk.bf16.mxu0 %vm483_vm0, %v1103_v21  ;;  %1968 = vrot.lane.b32.xlu1 %v4656_v59, %s4093_s14  ;;  %v1115_v39 = vsel %vm1108_vm6, %v1101_v16, %v1103_v21 }
 0x14a   : > { %1966 = vrot.lane.b32.xlu0 %v4651_v58, %s4093_s14  ;;  %1242 = vmatmul.mubr.bf16.gmra.mrb[56].mxu0 %v1115_v39 }
 0x14b   : > { %v1389_v41 = vpop.permute.xlu0 %1388  ;;  %2092 = vmatpush1.bf16.msra.mxu1 %v4078_v43 }
 0x14c   : > { %v1391_v44 = vpop.permute.xlu1 %1390  ;;  %2093 = vmatprep.subr.bf16.mxu1 %v4079_v45 }
 0x14d   : > { %3609 = vmatprep.mubr.msk.bf16.mxu1 %vm483_vm0, %v1391_v44  ;;  %v1415_v46 = vsel %vm1412_vm7, %v1389_v41, %v1391_v44 }
 0x14e   : > { %1506 = vmatmul.mubr.bf16.gmra.mrb[40].mxu1 %v1415_v46 }
 0x14f   : > { %v1105_v47 = vpop.permute.xlu0 %1104  ;;  %2094 = vmatpush1.bf16.msra.mxu1 %v4080_v30 }
 0x150   : > { %v1107_v29 = vpop.permute.xlu1 %1106  ;;  %2095 = vmatprep.subr.bf16.mxu1 %v4081_v48 }
 0x151   : > { %3597 = vmatprep.mubr.msk.bf16.mxu0 %vm483_vm0, %v1107_v29  ;;  %v1116_v49 = vsel %vm1108_vm6, %v1105_v47, %v1107_v29 }
 0x152   : > { %1252 = vmatmul.mubr.bf16.gmra.mrb[60].mxu0 %v1116_v49 }
 0x153   : > { %2096 = vmatpush1.bf16.msra.mxu1 %v4082_v51 }
 0x154   : > { %v1395_v52 = vpop.permute.xlu1 %1394  ;;  %v1393_v53 = vpop.permute.xlu0 %1392  ;;  %3642 = vmatprep.subr.msk.bf16.mxu1 %vm508_vm1, %v4083_v34 }
 0x155   : > { %3610 = vmatprep.mubr.msk.bf16.mxu1 %vm483_vm0, %v1395_v52  ;;  %v1416_v32 = vsel %vm1412_vm7, %v1393_v53, %v1395_v52 }
 0x156   : > { %1516 = vmatmul.mubr.bf16.gmra.mrb[44].mxu1 %v1416_v32 }
 0x157   : > { %2098 = vmatpush1.bf16.msra.mxu1 %v4317_v25 }
 0x158   : > { %3075 = vmatprep.subr.bf16.mxu1 %v3950_v61 }
 0x15b   : > { %v1397_v55 = vpop.permute.xlu0 %1396 }
 0x15c   : > { %v1399_v31 = vpop.permute.xlu1 %1398 }
 0x15d   : > { %3611 = vmatprep.mubr.msk.bf16.mxu1 %vm483_vm0, %v1399_v31  ;;  %v1417_v56 = vsel %vm1412_vm7, %v1397_v55, %v1399_v31  ;;  %v4799_v31 = vld [vmem:[%s5811_s3] ss:$8 sps:$4 sm:$0xff]  }
 0x15e   : > { %1526 = vmatmul.mubr.bf16.gmra.mrb[48].mxu1 %v1417_v56 }
 0x15f   : > { %v1663_v33 = vpop.permute.xlu0 %1662 }
 0x160   : > { %v1665_v57 = vpop.permute.xlu1 %1664 }
 0x161   : > { %v1674_v60 = vsel %vm377_vm3, %v1663_v33, %v1665_v57  ;;  %v4805_v33 = vld [vmem:[%s5811_s3 + $0x14] ss:$8 sps:$4 sm:$0xff]  }
 0x162   : > { %1720 = vrot.lane.b32.xlu0 %v1674_v60, %s4099_s23 }
 0x163   : > { %v1667_v62 = vpop.permute.xlu0 %1666 }
 0x164   : > { %v1675_v25 = vsel %vm377_vm3, %v1665_v57, %v1667_v62  ;;  %v1401_v36 = vpop.permute.xlu1 %1400 }
 0x165   : > { %1722 = vrot.lane.b32.xlu1 %v1675_v25, %s4099_s23  ;;  %v4819_v25 = vld [vmem:[%s5811_s3 + $0x10] ss:$8 sps:$4 sm:$0xff]  }
 0x167   : > { %v1403_v63 = vpop.permute.xlu0 %1402 }
 0x168   : > { %3612 = vmatprep.mubr.msk.bf16.mxu1 %vm483_vm0, %v1403_v63  ;;  %v1418_v35 = vsel %vm1412_vm7, %v1401_v36, %v1403_v63  ;;  %v1669_v7 = vpop.permute.xlu1 %1668 }
 0x169   : > { %1536 = vmatmul.mubr.bf16.gmra.mrb[52].mxu1 %v1418_v35  ;;  %v4829_v35 = vld [vmem:[%s5811_s3 + $0x24] ss:$8 sps:$4 sm:$0xff]  }
 0x16b   : > { %v1671_v8 = vpop.permute.xlu0 %1670 }
 0x16c   : > { %v1673_v9 = vpop.permute.xlu1 %1672  ;;  %v1676_v0 = vsel %vm377_vm3, %v1669_v7, %v1671_v8 }
 0x16d   : > { %v569_v11 = vpop.f32.mrb[8].mxu0  ;;  %v1677_v12 = vsel %vm377_vm3, %v1671_v8, %v1673_v9  ;;  %1724 = vrot.lane.b32.xlu0 %v1676_v0, %s4099_s23 }
 0x16e   : > { %v628_v18 = vmax.f32 %v4595_v27, %v569_v11  ;;  %v571_v23 = vpop.f32.mrb[9].mxu0  ;;  %1726 = vrot.lane.b32.xlu1 %v1677_v12, %s4099_s23  ;;  %v4843_v12 = vld [vmem:[%s5811_s3 + $0x20] ss:$8 sps:$4 sm:$0xff]  }
 0x16f   : > { %v629_v24 = vmax.f32 %v4600_v17, %v571_v23  ;;  %v573_v1 = vpop.f32.mrb[10].mxu0 }
 0x170   : > { %v630_v3 = vmax.f32 %v4602_v19, %v573_v1  ;;  %v575_v26 = vpop.f32.mrb[11].mxu0 }
 0x171   : > { %v636_v4 = vmax.f32 %v628_v18, %v629_v24  ;;  %v631_v5 = vmax.f32 %v4604_v20, %v575_v26  ;;  %v4853_v24 = vld [vmem:[%s5811_s3 + $0x34] ss:$8 sps:$4 sm:$0xff]  }
 0x173   : > { %v646_v6 = vadd.f32 %v4762_v2, %v636_v4  ;;  %v637_v27 = vmax.f32 %v630_v3, %v631_v5  ;;  %v4869_v4 = vld [vmem:[%s5811_s3 + $0x44] ss:$8 sps:$4 sm:$0xff]  }
 0x175   : > { %v647_v10 = vadd.f32 %v4762_v2, %v637_v27  ;;  %v650_v13 = vmax.f32 %v646_v6, 0.0 }
 0x177   : > { %v651_v14 = vmax.f32 %v647_v10, 0.0 }
 0x179   : > { %v4768_v17 = vpack.c.bf16 %v651_v14, %v650_v13 }
 0x17e   : > { %v579_v15 = vpop.f32.mrb[12].mxu0 }
 0x17f   : > { %v632_v16 = vmax.f32 %v4609_v38, %v579_v15  ;;  %v581_v28 = vpop.f32.mrb[13].mxu0 }
 0x180   : > { %v633_v21 = vmax.f32 %v4611_v22, %v581_v28  ;;  %v583_v19 = vpop.f32.mrb[14].mxu0 }
 0x181   : > { %v634_v37 = vmax.f32 %v4613_v40, %v583_v19  ;;  %v585_v39 = vpop.f32.mrb[15].mxu0 }
 0x182   : > { %v638_v20 = vmax.f32 %v632_v16, %v633_v21  ;;  %v635_v41 = vmax.f32 %v4615_v42, %v585_v39  ;;  %v4881_v16 = vld [vmem:[%s5811_s3 + $0x40] ss:$8 sps:$4 sm:$0xff]  }
 0x184   : > { %v648_v43 = vadd.f32 %v4762_v2, %v638_v20  ;;  %v639_v44 = vmax.f32 %v634_v37, %v635_v41 }
 0x186   : > { %v649_v45 = vadd.f32 %v4762_v2, %v639_v44  ;;  %v652_v46 = vmax.f32 %v648_v43, 0.0  ;;  %v4899_v44 = vld [vmem:[%s5811_s3 + $0x50] ss:$8 sps:$4 sm:$0xff]  }
 0x188   : > { %v653_v47 = vmax.f32 %v649_v45, 0.0 }
 0x18a   : > { %v4776_v30 = vpop.f32.mrb[16].mxu0  ;;  %v4778_v38 = vpack.c.bf16 %v653_v47, %v652_v46  ;;  %v4908_v46 = vld [vmem:[%s5811_s3 + $0x64] ss:$8 sps:$4 sm:$0xff]  }
 0x18b   : > { %v4780_v29 = vpop.f32.mrb[17].mxu0  ;;  %v1405_v22 = vpop.permute.xlu0 %1404 }
 0x18c   : > { %v4782_v48 = vpop.f32.mrb[18].mxu0 }
 0x18d   : > { %v4784_v40 = vpop.f32.mrb[19].mxu0  ;;  %v4786_v49 = vpop.f32.mrb[0].mxu1 }
 0x18e   : > { %v4788_v42 = vpop.f32.mrb[1].mxu1 }
 0x18f   : > { %v4790_v51 = vpop.f32.mrb[2].mxu1  ;;  %v1705_v52 = vpop.permute.xlu0 %1704 }
 0x190   : > { %v4792_v53 = vpop.f32.mrb[3].mxu1  ;;  %v1407_v34 = vpop.permute.xlu1 %1406 }
 0x191   : > { %3613 = vmatprep.mubr.msk.bf16.mxu1 %vm483_vm0, %v1407_v34  ;;  %v1419_v32 = vsel %vm1412_vm7, %v1405_v22, %v1407_v34  ;;  %v4916_v22 = vld [vmem:[%s5811_s3 + $0x60] ss:$8 sps:$4 sm:$0xff]  }
 0x192   : > { %1546 = vmatmul.mubr.bf16.gmra.mrb[56].mxu1 %v1419_v32 }
 0x193   : > { %v1695_v55 = vpop.permute.xlu0 %1694 }
 0x194   : > { %v1707_v56 = vpop.permute.xlu1 %1706  ;;  %1728 = vrot.lane.b32.xlu0 %v1695_v55, %s4099_s23 }
 0x195   : > { %v1737_v57 = vsel %vm1736_vm8, %v1705_v52, %v1707_v56  ;;  %v4808_v60 = vpop.f32.mrb[20].mxu0  ;;  %3626 = vmatprep.mubr.msk.bf16.mxu0 %vm483_vm0, %v1707_v56 }
 0x196   : > { %v4811_v61 = vpop.f32.mrb[21].mxu0  ;;  %1810 = vmatmul.mubr.bf16.vlgmr.msra.gmra.mrb[64].mxu0 %v1737_v57 }
 0x197   : > { %v4813_v62 = vpop.f32.mrb[22].mxu0  ;;  %2659 = vmatpush1.bf16.msra.mxu0 %v4799_v31 }
 0x198   : > { %v1697_v36 = vpop.permute.xlu1 %1696  ;;  %v4821_v63 = vpop.f32.mrb[23].mxu0  ;;  %2008 = vrot.lane.b32.xlu0 %v4628_v50, %s4100_s30  ;;  %2660 = vmatprep.subr.bf16.mxu0 %v4805_v33 }
 0x199   : > { %v1702_v7 = vsel %vm390_vm4, %v1695_v55, %v1697_v36  ;;  %v4832_v8 = vpop.f32.mrb[4].mxu1 }
 0x19a   : > { %v4834_v9 = vpop.f32.mrb[5].mxu1  ;;  %1730 = vrot.lane.b32.xlu1 %v1702_v7, %s4099_s23  ;;  %v4938_v7 = vld [vmem:[%s5811_s3 + $0x70] ss:$8 sps:$4 sm:$0xff]  }
 0x19b   : > { %v4837_v0 = vpop.f32.mrb[6].mxu1  ;;  %v1409_v11 = vpop.permute.xlu0 %1408  ;;  %2661 = vmatpush1.bf16.msra.mxu0 %v4819_v25 }
 0x19c   : > { %v4845_v18 = vpop.f32.mrb[7].mxu1  ;;  %v1411_v23 = vpop.permute.xlu1 %1410  ;;  %1972 = vrot.lane.b32.xlu0 %v4628_v50, %s4094_s25  ;;  %2662 = vmatprep.subr.bf16.mxu0 %v4829_v35  ;;  %v4863_v50 = vld [vmem:[%s5811_s3 + $0x30] ss:$8 sps:$4 sm:$0xff]  }
 0x19d   : > { %3614 = vmatprep.mubr.msk.bf16.mxu1 %vm483_vm0, %v1411_v23  ;;  %v1420_v1 = vsel %vm1412_vm7, %v1409_v11, %v1411_v23 }
 0x19e   : > { %2010 = vrot.lane.b32.xlu1 %v4637_v54, %s4100_s30  ;;  %1556 = vmatmul.mubr.bf16.gmra.mrb[60].mxu1 %v1420_v1 }
 0x19f   : > { %v1709_v3 = vpop.permute.xlu0 %1708  ;;  %2663 = vmatpush1.bf16.msra.mxu0 %v4843_v12 }
 0x1a0   : > { %v1711_v26 = vpop.permute.xlu1 %1710  ;;  %2664 = vmatprep.subr.bf16.mxu0 %v4853_v24 }
 0x1a1   : > { %v609_v5 = vpop.f32.mrb[24].mxu0  ;;  %3627 = vmatprep.mubr.msk.bf16.mxu0 %vm483_vm0, %v1711_v26  ;;  %v1738_v6 = vsel %vm1736_vm8, %v1709_v3, %v1711_v26  ;;  %v3942_v26 = vld [vmem:[%s4182_s11 + $0x18] ss:$28 sps:$4 sm:$0xff]  }
 0x1a2   : > { %v658_v27 = vmax.f32 %v4776_v30, %v609_v5  ;;  %1974 = vrot.lane.b32.xlu1 %v4637_v54, %s4094_s25  ;;  %v611_v10 = vpop.f32.mrb[25].mxu0  ;;  %1820 = vmatmul.mubr.bf16.gmra.mrb[68].mxu0 %v1738_v6  ;;  %v4889_v54 = vld [vmem:[%s5811_s3 + $0x54] ss:$8 sps:$4 sm:$0xff]  }
 0x1a3   : > { %v659_v13 = vmax.f32 %v4780_v29, %v611_v10  ;;  %v613_v14 = vpop.f32.mrb[26].mxu0  ;;  %v1699_v15 = vpop.permute.xlu0 %1698  ;;  %2665 = vmatpush1.bf16.msra.mxu0 %v4863_v50 }
 0x1a4   : > { %v660_v28 = vmax.f32 %v4782_v48, %v613_v14  ;;  %v1701_v21 = vpop.permute.xlu1 %1700  ;;  %v615_v19 = vpop.f32.mrb[27].mxu0  ;;  %1732 = vrot.lane.b32.xlu0 %v1699_v15, %s4099_s23  ;;  %2666 = vmatprep.subr.bf16.mxu0 %v4869_v4 }
 0x1a5   : > { %v666_v37 = vmax.f32 %v658_v27, %v659_v13  ;;  %v1703_v39 = vsel %vm390_vm4, %v1699_v15, %v1701_v21  ;;  %v661_v20 = vmax.f32 %v4784_v40, %v615_v19  ;;  %v4924_v40 = vld [vmem:[%s5811_s3 + $0x74] ss:$8 sps:$4 sm:$0xff]   ;;  %v4958_v27 = vld [vmem:[%s5811_s3 + $0x80] ss:$8 sps:$4 sm:$0xff]   ;;  %v4980_v19 = vld [vmem:[%s5811_s3 + $0xa4] ss:$8 sps:$4 sm:$0xff]  }
 0x1a6   : > { %1734 = vrot.lane.b32.xlu1 %v1703_v39, %s4099_s23 }
 0x1a7   : > { %v670_v41 = vadd.f32 %v4762_v2, %v666_v37  ;;  %v667_v43 = vmax.f32 %v660_v28, %v661_v20  ;;  %2667 = vmatpush1.bf16.msra.mxu0 %v4881_v16  ;;  %v4973_v28 = vld [vmem:[%s5811_s3 + $0x90] ss:$8 sps:$4 sm:$0xff]  }
 0x1a8   : > { %2012 = vrot.lane.b32.xlu0 %v4651_v58, %s4100_s30  ;;  %2668 = vmatprep.subr.bf16.mxu0 %v4889_v54 }
 0x1a9   : > { %v671_v45 = vadd.f32 %v4762_v2, %v667_v43  ;;  %v674_v47 = vmax.f32 %v670_v41, 0.0 }
 0x1aa   : > { %2014 = vrot.lane.b32.xlu1 %v4656_v59, %s4100_s30 }
 0x1ab   : > { %v675_v30 = vmax.f32 %v671_v45, 0.0  ;;  %v1715_v29 = vpop.permute.xlu1 %1714  ;;  %2669 = vmatpush1.bf16.msra.mxu0 %v4899_v44 }
 0x1ac   : > { %v1713_v48 = vpop.permute.xlu0 %1712  ;;  %3628 = vmatprep.mubr.msk.bf16.mxu0 %vm483_vm0, %v1715_v29  ;;  %1976 = vrot.lane.b32.xlu0 %v4651_v58, %s4094_s25 }
 0x1ad   : > { %v619_v52 = vpop.f32.mrb[28].mxu0  ;;  %v1739_v34 = vsel %vm1736_vm8, %v1713_v48, %v1715_v29  ;;  %2670 = vmatprep.subr.bf16.mxu0 %v4908_v46  ;;  %v4928_v32 = vpack.c.bf16 %v675_v30, %v674_v47  ;;  %v4995_v47 = vld [vmem:[%s5811_s3 + $0xa0] ss:$8 sps:$4 sm:$0xff]   ;;  %v3945_v29 = vld [vmem:[%s4182_s11 + $0x50] ss:$28 sps:$4 sm:$0xff]  }
 0x1ae   : > { %v662_v55 = vmax.f32 %v4808_v60, %v619_v52  ;;  %1978 = vrot.lane.b32.xlu1 %v4656_v59, %s4094_s25  ;;  %v621_v56 = vpop.f32.mrb[29].mxu0  ;;  %1830 = vmatmul.mubr.bf16.gmra.mrb[72].mxu0 %v1739_v34  ;;  %v4945_v59 = vld [vmem:[%s5811_s3 + $0x84] ss:$8 sps:$4 sm:$0xff]   ;;  %v5005_v52 = vld [vmem:[%s5811_s3 + $0xb4] ss:$8 sps:$4 sm:$0xff]  }
 0x1af   : > { %v663_v58 = vmax.f32 %v4811_v61, %v621_v56  ;;  %v623_v57 = vpop.f32.mrb[30].mxu0  ;;  %v1965_v36 = vpop.permute.xlu1 %1964  ;;  %2671 = vmatpush1.bf16.msra.mxu0 %v4916_v22  ;;  %v5014_v56 = vld [vmem:[%s5811_s3 + $0xb0] ss:$8 sps:$4 sm:$0xff]  }
 0x1b0   : > { %v664_v60 = vmax.f32 %v4813_v62, %v623_v57  ;;  %v1963_v11 = vpop.permute.xlu0 %1962  ;;  %v625_v23 = vpop.f32.mrb[31].mxu0  ;;  %2672 = vmatprep.subr.bf16.mxu0 %v4924_v40  ;;  %v3944_v62 = vld [vmem:[%s4182_s11 + $0x14] ss:$28 sps:$4 sm:$0xff]  }
 0x1b1   : > { %v668_v61 = vmax.f32 %v662_v55, %v663_v58  ;;  %v1970_v1 = vsel %vm364_vm2, %v1963_v11, %v1965_v36  ;;  %v665_v3 = vmax.f32 %v4821_v63, %v625_v23  ;;  %v4964_v63 = vld [vmem:[%s5811_s3 + $0x94] ss:$8 sps:$4 sm:$0xff]   ;;  %v3947_v55 = vld [vmem:[%s4182_s11 + $0x4c] ss:$28 sps:$4 sm:$0xff]   ;;  %s3734_s11 = sshll.u32 %s5878_s20, 5 }
 0x1b2   : > { %2018 = vrot.lane.b32.xlu1 %v1965_v36, %s4100_s30  ;;  %2016 = vrot.lane.b32.xlu0 %v1970_v1, %s4100_s30  ;;  %v5021_v58 = vld [vmem:[%s5811_s3 + $0xc4] ss:$8 sps:$4 sm:$0xff]   ;;  %v5034_v11 = vld [vmem:[%s5811_s3 + $0xc0] ss:$8 sps:$4 sm:$0xff]   ;;  %s5772_s25 = scalar_lea.vmem %s5813_s5, %s3734_s11 }
 0x1b3   : > { %v672_v5 = vadd.f32 %v4762_v2, %v668_v61  ;;  %v669_v6 = vmax.f32 %v664_v60, %v665_v3  ;;  %2673 = vmatpush1.bf16.msra.mxu0 %v4938_v7  ;;  %5835 = vst [vmem:[#allocation3_spill] sm:$0xff] %v5034_v11  ;;  %v5042_v61 = vld [vmem:[%s5811_s3 + $0xd4] ss:$8 sps:$4 sm:$0xff]   ;;  %v5048_v1 = vld [vmem:[%s5811_s3 + $0xd0] ss:$8 sps:$4 sm:$0xff]  }
 0x1b4   : > { %2674 = vmatprep.subr.bf16.mxu0 %v4945_v59  ;;  %5836 = vst [vmem:[#allocation4_spill] sm:$0xff] %v5042_v61  ;;  %5837 = vst [vmem:[#allocation5_spill] sm:$0xff] %v5048_v1  ;;  %v5054_v3 = vld [vmem:[%s5811_s3 + $0xe4] ss:$8 sps:$4 sm:$0xff]  }
 0x1b5   : > { %v673_v10 = vadd.f32 %v4762_v2, %v669_v6  ;;  %v676_v13 = vmax.f32 %v672_v5, 0.0  ;;  %5838 = vst [vmem:[#allocation6_spill] sm:$0xff] %v5054_v3  ;;  %v5072_v5 = vld [vmem:[%s5811_s3 + $0xf0] ss:$8 sps:$4 sm:$0xff]   ;;  %v5078_v6 = vld [vmem:[%s5811_s3 + $0x104] ss:$8 sps:$4 sm:$0xff]  }
 0x1b6   : > { %2000 = vrot.lane.b32.xlu1 %v3942_v26, %s4095_s17  ;;  %1998 = vrot.lane.b32.xlu0 %v3944_v62, %s4095_s17  ;;  %v5060_v26 = vld [vmem:[%s5811_s3 + $0xe0] ss:$8 sps:$4 sm:$0xff]   ;;  %v5066_v62 = vld [vmem:[%s5811_s3 + $0xf4] ss:$8 sps:$4 sm:$0xff]   ;;  %5841 = vst [vmem:[#allocation9_spill] sm:$0xff] %v5072_v5  ;;  %5842 = vst [vmem:[#allocation10_spill] sm:$0xff] %v5078_v6 }
 0x1b7   : > { %v677_v14 = vmax.f32 %v673_v10, 0.0  ;;  %v1719_v15 = vpop.permute.xlu1 %1718  ;;  %2675 = vmatpush1.bf16.msra.mxu0 %v4958_v27  ;;  %5839 = vst [vmem:[#allocation7_spill] sm:$0xff] %v5060_v26  ;;  %5840 = vst [vmem:[#allocation8_spill] sm:$0xff] %v5066_v62 }
 0x1b8   : > { %v1717_v21 = vpop.permute.xlu0 %1716  ;;  %3629 = vmatprep.mubr.msk.bf16.mxu0 %vm483_vm0, %v1719_v15  ;;  %2676 = vmatprep.subr.bf16.mxu0 %v4964_v63 }
 0x1b9   : > { %v1740_v37 = vsel %vm1736_vm8, %v1717_v21, %v1719_v15  ;;  %v4983_v39 = vpop.f32.mrb[32].mxu0  ;;  %v4985_v20 = vpack.c.bf16 %v677_v14, %v676_v13 }
 0x1ba   : > { %1840 = vmatmul.mubr.bf16.gmra.mrb[76].mxu0 %v1740_v37  ;;  %v4987_v41 = vpop.f32.mrb[33].mxu0 }
 0x1bb   : > { %v1969_v43 = vpop.permute.xlu1 %1968  ;;  %v4989_v45 = vpop.f32.mrb[34].mxu0  ;;  %2677 = vmatpush1.bf16.msra.mxu0 %v4973_v28 }
 0x1bc   : > { %v1967_v30 = vpop.permute.xlu0 %1966  ;;  %2022 = vrot.lane.b32.xlu1 %v1969_v43, %s4100_s30  ;;  %v4999_v48 = vpop.f32.mrb[35].mxu0  ;;  %2678 = vmatprep.subr.bf16.mxu0 %v4980_v19 }
 0x1bd   : > { %v1971_v34 = vsel %vm364_vm2, %v1967_v30, %v1969_v43 }
 0x1be   : > { %2020 = vrot.lane.b32.xlu0 %v1971_v34, %s4100_s30 }
 0x1bf   : > { %2679 = vmatpush1.bf16.msra.mxu0 %v4995_v47 }
 0x1c0   : > { %2004 = vrot.lane.b32.xlu1 %v3945_v29, %s4095_s17  ;;  %2680 = vmatprep.subr.bf16.mxu0 %v5005_v52 }
 0x1c1   : > { %v5023_v57 = vpop.f32.mrb[36].mxu0 }
 0x1c2   : > { %2002 = vrot.lane.b32.xlu0 %v3947_v55, %s4095_s17  ;;  %v5026_v36 = vpop.f32.mrb[37].mxu0 }
 0x1c3   : > { %v5028_v60 = vpop.f32.mrb[38].mxu0  ;;  %2681 = vmatpush1.bf16.msra.mxu0 %v5014_v56 }
 0x1c4   : > { %v5036_v23 = vpop.f32.mrb[39].mxu0  ;;  %2682 = vmatprep.subr.bf16.mxu0 %v5021_v58 }
 0x1c7   : > { %2683 = vmatpush1.bf16.msra.mxu0 %v5034_v11 }
 0x1c8   : > { %2684 = vmatprep.subr.bf16.mxu0 %v5042_v61 }
 0x1cb   : > { %2685 = vmatpush1.bf16.msra.mxu0 %v5048_v1 }
 0x1cc   : > { %2686 = vmatprep.subr.bf16.mxu0 %v5054_v3 }
 0x1cf   : > { %2687 = vmatpush1.bf16.msra.mxu0 %v5060_v26 }
 0x1d0   : > { %2688 = vmatprep.subr.bf16.mxu0 %v5066_v62 }
 0x1d3   : > { %2689 = vmatpush1.bf16.msra.mxu0 %v5072_v5 }
 0x1d4   : > { %2771 = vmatprep.subr.bf16.mxu0 %v5078_v6  ;;  %v1721_v13 = vpop.permute.xlu0 %1720 }
 0x1d5   : > { %v879_v10 = vpop.f32.mrb[8].mxu1 }
 0x1d6   : > { %v938_v14 = vmax.f32 %v4786_v49, %v879_v10  ;;  %v881_v15 = vpop.f32.mrb[9].mxu1 }
 0x1d7   : > { %v939_v21 = vmax.f32 %v4788_v42, %v881_v15  ;;  %v883_v37 = vpop.f32.mrb[10].mxu1  ;;  %v1723_v43 = vpop.permute.xlu1 %1722 }
 0x1d8   : > { %v940_v30 = vmax.f32 %v4790_v51, %v883_v37  ;;  %v885_v29 = vpop.f32.mrb[11].mxu1  ;;  %3630 = vmatprep.mubr.msk.bf16.mxu0 %vm483_vm0, %v1723_v43  ;;  %v1741_v34 = vsel %vm1736_vm8, %v1721_v13, %v1723_v43 }
 0x1d9   : > { %v946_v55 = vmax.f32 %v938_v14, %v939_v21  ;;  %v941_v5 = vmax.f32 %v4792_v53, %v885_v29  ;;  %1850 = vmatmul.mubr.bf16.gmra.mrb[80].mxu0 %v1741_v34 }
 0x1db   : > { %v950_v6 = vadd.f32 %v4762_v2, %v946_v55  ;;  %v947_v62 = vmax.f32 %v940_v30, %v941_v5 }
 0x1dd   : > { %v951_v49 = vadd.f32 %v4762_v2, %v947_v62  ;;  %v889_v10 = vpop.f32.mrb[12].mxu1  ;;  %v954_v26 = vmax.f32 %v950_v6, 0.0 }
 0x1de   : > { %v942_v42 = vmax.f32 %v4832_v8, %v889_v10  ;;  %v891_v15 = vpop.f32.mrb[13].mxu1 }
 0x1df   : > { %v955_v51 = vmax.f32 %v951_v49, 0.0  ;;  %v943_v37 = vmax.f32 %v4834_v9, %v891_v15  ;;  %v893_v3 = vpop.f32.mrb[14].mxu1  ;;  %v1725_v1 = vpop.permute.xlu0 %1724 }
 0x1e0   : > { %v944_v13 = vmax.f32 %v4837_v0, %v893_v3  ;;  %v895_v14 = vpop.f32.mrb[15].mxu1  ;;  %v1727_v53 = vpop.permute.xlu1 %1726 }
 0x1e1   : > { %v948_v21 = vmax.f32 %v942_v42, %v943_v37  ;;  %v945_v43 = vmax.f32 %v4845_v18, %v895_v14  ;;  %3631 = vmatprep.mubr.msk.bf16.mxu0 %vm483_vm0, %v1727_v53  ;;  %v1742_v62 = vsel %vm1736_vm8, %v1725_v1, %v1727_v53  ;;  %v5096_v5 = vpack.c.bf16 %v955_v51, %v954_v26 }
 0x1e2   : > { %1860 = vmatmul.mubr.bf16.gmra.mrb[84].mxu0 %v1742_v62 }
 0x1e3   : > { %v952_v8 = vadd.f32 %v4762_v2, %v948_v21  ;;  %v949_v6 = vmax.f32 %v944_v13, %v945_v43 }
 0x1e5   : > { %v953_v9 = vadd.f32 %v4762_v2, %v949_v6  ;;  %v899_v30 = vpop.f32.mrb[16].mxu1  ;;  %v956_v0 = vmax.f32 %v952_v8, 0.0 }
 0x1e6   : > { %v901_v29 = vpop.f32.mrb[17].mxu1 }
 0x1e7   : > { %v957_v3 = vmax.f32 %v953_v9, 0.0  ;;  %v903_v34 = vpop.f32.mrb[18].mxu1 }
 0x1e8   : > { %v905_v55 = vpop.f32.mrb[19].mxu1 }
 0x1e9   : > { %v5100_v49 = vpack.c.bf16 %v957_v3, %v956_v0 }
 0x1ed   : > { %v909_v18 = vpop.f32.mrb[20].mxu1  ;;  %v1203_v10 = vpop.f32.mrb[40].mxu0 }
 0x1ee   : > { %v1262_v1 = vmax.f32 %v4983_v39, %v1203_v10  ;;  %v911_v26 = vpop.f32.mrb[21].mxu1  ;;  %v1205_v42 = vpop.f32.mrb[41].mxu0 }
 0x1ef   : > { %v1263_v15 = vmax.f32 %v4987_v41, %v1205_v42  ;;  %v913_v51 = vpop.f32.mrb[22].mxu1  ;;  %v1207_v37 = vpop.f32.mrb[42].mxu0 }
 0x1f0   : > { %v1264_v13 = vmax.f32 %v4989_v45, %v1207_v37  ;;  %v915_v14 = vpop.f32.mrb[23].mxu1  ;;  %v1209_v53 = vpop.f32.mrb[43].mxu0 }
 0x1f1   : > { %v1270_v21 = vmax.f32 %v1262_v1, %v1263_v15  ;;  %v1265_v43 = vmax.f32 %v4999_v48, %v1209_v53 }
 0x1f3   : > { %v1274_v62 = vadd.f32 %v4762_v2, %v1270_v21  ;;  %v1271_v8 = vmax.f32 %v1264_v13, %v1265_v43 }
 0x1f5   : > { %v1275_v6 = vadd.f32 %v4762_v2, %v1271_v8  ;;  %v919_v9 = vpop.f32.mrb[24].mxu1  ;;  %v1278_v3 = vmax.f32 %v1274_v62, 0.0 }
 0x1f6   : > { %v962_v39 = vmax.f32 %v899_v30, %v919_v9  ;;  %v921_v0 = vpop.f32.mrb[25].mxu1 }
 0x1f7   : > { %v1279_v10 = vmax.f32 %v1275_v6, 0.0  ;;  %v963_v41 = vmax.f32 %v901_v29, %v921_v0  ;;  %v923_v42 = vpop.f32.mrb[26].mxu1 }
 0x1f8   : > { %v964_v61 = vmax.f32 %v903_v34, %v923_v42  ;;  %v925_v11 = vpop.f32.mrb[27].mxu1 }
 0x1f9   : > { %v5108_v45 = vpack.c.bf16 %v1279_v10, %v1278_v3  ;;  %v970_v37 = vmax.f32 %v962_v39, %v963_v41  ;;  %v965_v1 = vmax.f32 %v905_v55, %v925_v11  ;;  %v1213_v15 = vpop.f32.mrb[44].mxu0 }
 0x1fa   : > { %v1266_v48 = vmax.f32 %v5023_v57, %v1213_v15  ;;  %v1215_v53 = vpop.f32.mrb[45].mxu0 }
 0x1fb   : > { %v974_v13 = vadd.f32 %v4762_v2, %v970_v37  ;;  %v971_v21 = vmax.f32 %v964_v61, %v965_v1  ;;  %v1267_v30 = vmax.f32 %v5026_v36, %v1215_v53  ;;  %v1217_v43 = vpop.f32.mrb[46].mxu0 }
 0x1fc   : > { %v1268_v62 = vmax.f32 %v5028_v60, %v1217_v43  ;;  %v1219_v29 = vpop.f32.mrb[47].mxu0 }
 0x1fd   : > { %v975_v34 = vadd.f32 %v4762_v2, %v971_v21  ;;  %v1272_v8 = vmax.f32 %v1266_v48, %v1267_v30  ;;  %v1269_v6 = vmax.f32 %v5036_v23, %v1219_v29  ;;  %v929_v9 = vpop.f32.mrb[28].mxu1  ;;  %v978_v11 = vmax.f32 %v974_v13, 0.0 }
 0x1fe   : > { %v966_v55 = vmax.f32 %v909_v18, %v929_v9  ;;  %v931_v39 = vpop.f32.mrb[29].mxu1 }
 0x1ff   : > { %v979_v57 = vmax.f32 %v975_v34, 0.0  ;;  %v1276_v0 = vadd.f32 %v4762_v2, %v1272_v8  ;;  %v1273_v3 = vmax.f32 %v1268_v62, %v1269_v6  ;;  %v967_v61 = vmax.f32 %v911_v26, %v931_v39  ;;  %v933_v10 = vpop.f32.mrb[30].mxu1 }
 0x200   : > { %v968_v36 = vmax.f32 %v913_v51, %v933_v10  ;;  %v935_v41 = vpop.f32.mrb[31].mxu1 }
 0x201   : > { %v5117_v42 = vpack.c.bf16 %v979_v57, %v978_v11  ;;  %v1277_v60 = vadd.f32 %v4762_v2, %v1273_v3  ;;  %v972_v37 = vmax.f32 %v966_v55, %v967_v61  ;;  %v969_v1 = vmax.f32 %v915_v14, %v935_v41 }
 0x202   : > { %v1280_v15 = vmax.f32 %v1276_v0, 0.0 }
 0x203   : > { %v1281_v23 = vmax.f32 %v1277_v60, 0.0  ;;  %v976_v48 = vadd.f32 %v4762_v2, %v972_v37  ;;  %v973_v18 = vmax.f32 %v968_v36, %v969_v1 }
 0x205   : > { %v5121_v53 = vpack.c.bf16 %v1281_v23, %v1280_v15  ;;  %v5123_v13 = vpop.f32.mrb[48].mxu0  ;;  %v977_v26 = vadd.f32 %v4762_v2, %v973_v18  ;;  %v980_v43 = vmax.f32 %v976_v48, 0.0 }
 0x206   : > { %v5126_v21 = vpop.f32.mrb[49].mxu0  ;;  %v1729_v51 = vpop.permute.xlu0 %1728 }
 0x207   : > { %v5128_v30 = vpop.f32.mrb[50].mxu0  ;;  %v981_v62 = vmax.f32 %v977_v26, 0.0 }
 0x208   : > { %v5130_v29 = vpop.f32.mrb[51].mxu0 }
 0x209   : > { %v5132_v14 = vpop.f32.mrb[32].mxu1  ;;  %v5134_v34 = vpack.c.bf16 %v981_v62, %v980_v43 }
 0x20a   : > { %v5136_v8 = vpop.f32.mrb[33].mxu1  ;;  %v2009_v6 = vpop.permute.xlu0 %2008 }
 0x20b   : > { %v5138_v9 = vpop.f32.mrb[34].mxu1 }
 0x20c   : > { %v5140_v11 = vpop.f32.mrb[35].mxu1  ;;  %v1731_v55 = vpop.permute.xlu1 %1730 }
 0x20d   : > { %3632 = vmatprep.mubr.msk.bf16.mxu0 %vm483_vm0, %v1731_v55  ;;  %v1743_v39 = vsel %vm1736_vm8, %v1729_v51, %v1731_v55 }
 0x20e   : > { %1870 = vmatmul.mubr.bf16.gmra.mrb[88].mxu0 %v1743_v39  ;;  %v1973_v0 = vpop.permute.xlu0 %1972 }
 0x210   : > { %v2011_v57 = vpop.permute.xlu1 %2010 }
 0x211   : > { %v2041_v3 = vsel %vm2040_vm9, %v2009_v6, %v2011_v57  ;;  %v5145_v61 = vpop.f32.mrb[52].mxu0  ;;  %3643 = vmatprep.mubr.msk.bf16.mxu1 %vm483_vm0, %v2011_v57 }
 0x212   : > { %v5148_v10 = vpop.f32.mrb[53].mxu0  ;;  %2114 = vmatmul.mubr.bf16.vlgmr.msra.gmra.mrb[64].mxu1 %v2041_v3 }
 0x213   : > { %v5150_v36 = vpop.f32.mrb[54].mxu0  ;;  %3076 = vmatpush1.bf16.msra.mxu1 %v4799_v31 }
 0x214   : > { %v1975_v41 = vpop.permute.xlu1 %1974  ;;  %v5153_v60 = vpop.f32.mrb[55].mxu0  ;;  %3077 = vmatprep.subr.bf16.mxu1 %v4805_v33 }
 0x215   : > { %v1980_v37 = vsel %vm377_vm3, %v1973_v0, %v1975_v41  ;;  %v5157_v1 = vpop.f32.mrb[36].mxu1  ;;  %2026 = vrot.lane.b32.xlu1 %v1975_v41, %s4100_s30 }
 0x216   : > { %v5160_v15 = vpop.f32.mrb[37].mxu1  ;;  %2024 = vrot.lane.b32.xlu0 %v1980_v37, %s4100_s30  ;;  %v1733_v23 = vpop.permute.xlu0 %1732 }
 0x217   : > { %v5163_v48 = vpop.f32.mrb[38].mxu1  ;;  %3078 = vmatpush1.bf16.msra.mxu1 %v4819_v25 }
 0x218   : > { %v5166_v31 = vpop.f32.mrb[39].mxu1  ;;  %v1735_v18 = vpop.permute.xlu1 %1734  ;;  %3079 = vmatprep.subr.bf16.mxu1 %v4829_v35 }
 0x219   : > { %3633 = vmatprep.mubr.msk.bf16.mxu0 %vm483_vm0, %v1735_v18  ;;  %v1744_v33 = vsel %vm1736_vm8, %v1733_v23, %v1735_v18 }
 0x21a   : > { %1880 = vmatmul.mubr.bf16.gmra.mrb[92].mxu0 %v1744_v33  ;;  %v2013_v26 = vpop.permute.xlu0 %2012 }
 0x21b   : > { %2690 = vmatprep.mubr.bf16.mxu0 %v4928_v32  ;;  %3080 = vmatpush1.bf16.msra.mxu1 %v4843_v12  ;;  %v5181_v12 = vld [vmem:[%s5811_s3 + $0x100] ss:$8 sps:$4 sm:$0xff]  }
 0x21c   : > { %v2015_v51 = vpop.permute.xlu1 %2014  ;;  %3081 = vmatprep.subr.bf16.mxu1 %v4853_v24 }
 0x21d   : > { %v1243_v43 = vpop.f32.mrb[56].mxu0  ;;  %3644 = vmatprep.mubr.msk.bf16.mxu1 %vm483_vm0, %v2015_v51  ;;  %v2042_v25 = vsel %vm2040_vm9, %v2013_v26, %v2015_v51 }
 0x21e   : > { %v1286_v35 = vmax.f32 %v5123_v13, %v1243_v43  ;;  %v1245_v62 = vpop.f32.mrb[57].mxu0  ;;  %2124 = vmatmul.mubr.bf16.gmra.mrb[68].mxu1 %v2042_v25  ;;  %v1977_v6 = vpop.permute.xlu0 %1976  ;;  %v5188_v13 = vld [vmem:[%s5811_s3 + $0x114] ss:$8 sps:$4 sm:$0xff]  }
 0x21f   : > { %v1287_v55 = vmax.f32 %v5126_v21, %v1245_v62  ;;  %v1247_v39 = vpop.f32.mrb[58].mxu0  ;;  %3082 = vmatpush1.bf16.msra.mxu1 %v4863_v50 }
 0x220   : > { %v1288_v24 = vmax.f32 %v5128_v30, %v1247_v39  ;;  %v1979_v57 = vpop.permute.xlu1 %1978  ;;  %v1249_v0 = vpop.f32.mrb[59].mxu0  ;;  %3083 = vmatprep.subr.bf16.mxu1 %v4869_v4 }
 0x221   : > { %v1294_v21 = vmax.f32 %v1286_v35, %v1287_v55  ;;  %v1981_v3 = vsel %vm377_vm3, %v1977_v6, %v1979_v57  ;;  %v1289_v41 = vmax.f32 %v5130_v29, %v1249_v0  ;;  %v1507_v37 = vpop.f32.mrb[40].mxu1  ;;  %2030 = vrot.lane.b32.xlu1 %v1979_v57, %s4100_s30  ;;  %v5204_v29 = vld [vmem:[%s5811_s3 + $0x110] ss:$8 sps:$4 sm:$0xff]  }
 0x222   : > { %v1566_v50 = vmax.f32 %v5132_v14, %v1507_v37  ;;  %v1509_v30 = vpop.f32.mrb[41].mxu1  ;;  %2028 = vrot.lane.b32.xlu0 %v1981_v3, %s4100_s30  ;;  %2691 = vmatmul.mubr.bf16.vlgmr.msra.gmra.mrb[96].mxu0 %v4768_v17  ;;  %v5211_v17 = vld [vmem:[%s5811_s3 + $0x124] ss:$8 sps:$4 sm:$0xff]  }
 0x223   : > { %v1298_v23 = vadd.f32 %v4762_v2, %v1294_v21  ;;  %v1295_v18 = vmax.f32 %v1288_v24, %v1289_v41  ;;  %v1567_v4 = vmax.f32 %v5136_v8, %v1509_v30  ;;  %v1511_v33 = vpop.f32.mrb[42].mxu1  ;;  %2700 = vmatprep.mubr.bf16.mxu0 %v4985_v20  ;;  %2772 = vmatpush1.bf16.msra.mxu0 %v5181_v12 }
 0x224   : > { %v1568_v14 = vmax.f32 %v5138_v9, %v1511_v33  ;;  %v1513_v26 = vpop.f32.mrb[43].mxu1  ;;  %v2019_v51 = vpop.permute.xlu1 %2018  ;;  %2773 = vmatprep.subr.bf16.mxu0 %v5188_v13  ;;  %3084 = vmatpush1.bf16.msra.mxu1 %v4881_v16 }
 0x225   : > { %v1299_v8 = vadd.f32 %v4762_v2, %v1295_v18  ;;  %v1574_v43 = vmax.f32 %v1566_v50, %v1567_v4  ;;  %v1569_v25 = vmax.f32 %v5140_v11, %v1513_v26  ;;  %v2017_v35 = vpop.permute.xlu0 %2016  ;;  %v1253_v62 = vpop.f32.mrb[60].mxu0  ;;  %3645 = vmatprep.mubr.msk.bf16.mxu1 %vm483_vm0, %v2019_v51  ;;  %3085 = vmatprep.subr.bf16.mxu1 %v4889_v54  ;;  %v1302_v9 = vmax.f32 %v1298_v23, 0.0 }
 0x226   : > { %v1290_v6 = vmax.f32 %v5145_v61, %v1253_v62  ;;  %v1255_v55 = vpop.f32.mrb[61].mxu0  ;;  %v2043_v39 = vsel %vm2040_vm9, %v2017_v35, %v2019_v51  ;;  %v5227_v61 = vld [vmem:[%s5811_s3 + $0x120] ss:$8 sps:$4 sm:$0xff]  }
 0x227   : > { %v1303_v24 = vmax.f32 %v1299_v8, 0.0  ;;  %v1578_v16 = vadd.f32 %v4762_v2, %v1574_v43  ;;  %v1575_v57 = vmax.f32 %v1568_v14, %v1569_v25  ;;  %v1291_v0 = vmax.f32 %v5148_v10, %v1255_v55  ;;  %2134 = vmatmul.mubr.bf16.gmra.mrb[72].mxu1 %v2043_v39  ;;  %v1257_v11 = vpop.f32.mrb[62].mxu0  ;;  %2774 = vmatpush1.bf16.msra.mxu0 %v5204_v29  ;;  %v5274_v39 = vld [vmem:[%s5811_s3 + $0x140] ss:$8 sps:$4 sm:$0xff]  }
 0x228   : > { %v1292_v21 = vmax.f32 %v5150_v36, %v1257_v11  ;;  %v2001_v3 = vpop.permute.xlu1 %2000  ;;  %v1259_v54 = vpop.f32.mrb[63].mxu0  ;;  %2775 = vmatprep.subr.bf16.mxu0 %v5211_v17  ;;  %3086 = vmatpush1.bf16.msra.mxu1 %v4899_v44  ;;  %v5237_v36 = vld [vmem:[%s5811_s3 + $0x134] ss:$8 sps:$4 sm:$0xff]  }
 0x229   : > { %v5231_v41 = vpack.c.bf16 %v1303_v24, %v1302_v9  ;;  %v1579_v10 = vadd.f32 %v4762_v2, %v1575_v57  ;;  %v1296_v37 = vmax.f32 %v1290_v6, %v1291_v0  ;;  %v1999_v50 = vpop.permute.xlu0 %1998  ;;  %v1517_v30 = vpop.f32.mrb[44].mxu1  ;;  %3087 = vmatprep.subr.bf16.mxu1 %v4908_v46  ;;  %v1293_v18 = vmax.f32 %v5153_v60, %v1259_v54 }
 0x22a   : > { %v2006_v23 = vsel %vm390_vm4, %v1999_v50, %v2001_v3  ;;  %v1570_v44 = vmax.f32 %v5157_v1, %v1517_v30  ;;  %v1519_v4 = vpop.f32.mrb[45].mxu1  ;;  %2032 = vrot.lane.b32.xlu0 %v1999_v50, %s4100_s30  ;;  %2701 = vmatmul.mubr.bf16.gmra.mrb[100].mxu0 %v4778_v38  ;;  %v1582_v33 = vmax.f32 %v1578_v16, 0.0  ;;  %v5254_v38 = vld [vmem:[%s5811_s3 + $0x130] ss:$8 sps:$4 sm:$0xff]   ;;  %v5283_v16 = vld [vmem:[%s5811_s3 + $0x154] ss:$8 sps:$4 sm:$0xff]  }
 0x22b   : > { %v1583_v14 = vmax.f32 %v1579_v10, 0.0  ;;  %v1571_v26 = vmax.f32 %v5160_v15, %v1519_v4  ;;  %2034 = vrot.lane.b32.xlu1 %v2006_v23, %s4100_s30  ;;  %v1521_v51 = vpop.f32.mrb[46].mxu1  ;;  %2710 = vmatprep.mubr.bf16.mxu0 %v5096_v5  ;;  %v1300_v46 = vadd.f32 %v4762_v2, %v1296_v37  ;;  %v1297_v8 = vmax.f32 %v1292_v21, %v1293_v18  ;;  %v5313_v50 = vld [vmem:[%s5811_s3 + $0x164] ss:$8 sps:$4 sm:$0xff]   ;;  %v5328_v30 = vld [vmem:[%s5811_s3 + $0x174] ss:$8 sps:$4 sm:$0xff]  }
 0x22c   : > { %v1572_v60 = vmax.f32 %v5163_v48, %v1521_v51  ;;  %2776 = vmatpush1.bf16.msra.mxu0 %v5227_v61  ;;  %v1523_v1 = vpop.f32.mrb[47].mxu1  ;;  %3088 = vmatpush1.bf16.msra.mxu1 %v4916_v22  ;;  %v5264_v48 = vld [vmem:[%s5811_s3 + $0x144] ss:$8 sps:$4 sm:$0xff]   ;;  %v5846_v51 = vld [vmem:[#allocation6_spill] sm:$0xff] }
 0x22d   : > { %v5257_v15 = vpack.c.bf16 %v1583_v14, %v1582_v33  ;;  %v1576_v43 = vmax.f32 %v1570_v44, %v1571_v26  ;;  %v1573_v25 = vmax.f32 %v5166_v31, %v1523_v1  ;;  %2777 = vmatprep.subr.bf16.mxu0 %v5237_v36  ;;  %3089 = vmatprep.subr.bf16.mxu1 %v4924_v40  ;;  %v1304_v6 = vmax.f32 %v1300_v46, 0.0  ;;  %v5366_v44 = vld [vmem:[%s5811_s3 + $0x194] ss:$8 sps:$4 sm:$0xff]   ;;  %v5382_v4 = vld [vmem:[%s5811_s3 + $0x1a4] ss:$8 sps:$4 sm:$0xff]  }
 0x22e   : > { %v1301_v35 = vadd.f32 %v4762_v2, %v1297_v8  ;;  %v2023_v62 = vpop.permute.xlu1 %2022  ;;  %v5389_v33 = vld [vmem:[%s5811_s3 + $0x1a0] ss:$8 sps:$4 sm:$0xff]   ;;  %v5845_v14 = vld [vmem:[#allocation5_spill] sm:$0xff] }
 0x22f   : > { %v1580_v9 = vadd.f32 %v4762_v2, %v1576_v43  ;;  %v1577_v22 = vmax.f32 %v1572_v60, %v1573_v25  ;;  %3646 = vmatprep.mubr.msk.bf16.mxu1 %vm483_vm0, %v2023_v62  ;;  %v5396_v26 = vld [vmem:[%s5811_s3 + $0x1b4] ss:$8 sps:$4 sm:$0xff]   ;;  %v5405_v46 = vld [vmem:[%s5811_s3 + $0x1b0] ss:$8 sps:$4 sm:$0xff]   ;;  %v5847_v8 = vld [vmem:[#allocation7_spill] sm:$0xff] }
 0x230   : > { %v1305_v55 = vmax.f32 %v1301_v35, 0.0  ;;  %2778 = vmatpush1.bf16.msra.mxu0 %v5254_v38  ;;  %v2021_v31 = vpop.permute.xlu0 %2020  ;;  %3090 = vmatpush1.bf16.msra.mxu1 %v4938_v7  ;;  %v5412_v60 = vld [vmem:[%s5811_s3 + $0x1c4] ss:$8 sps:$4 sm:$0xff]   ;;  %v5419_v43 = vld [vmem:[%s5811_s3 + $0x1c0] ss:$8 sps:$4 sm:$0xff]   ;;  %v5849_v25 = vld [vmem:[#allocation9_spill] sm:$0xff] }
 0x231   : > { %v1581_v40 = vadd.f32 %v4762_v2, %v1577_v22  ;;  %v2044_v24 = vsel %vm2040_vm9, %v2021_v31, %v2023_v62  ;;  %2779 = vmatprep.subr.bf16.mxu0 %v5264_v48  ;;  %v5285_v57 = vpop.f32.mrb[48].mxu1  ;;  %3091 = vmatprep.subr.bf16.mxu1 %v4945_v59  ;;  %v1584_v11 = vmax.f32 %v1580_v9, 0.0  ;;  %v5300_v59 = vld [vmem:[%s5811_s3 + $0x150] ss:$8 sps:$4 sm:$0xff]   ;;  %v5848_v1 = vld [vmem:[#allocation8_spill] sm:$0xff] }
 0x232   : > { %v5288_v0 = vpack.c.bf16 %v1305_v55, %v1304_v6  ;;  %2144 = vmatmul.mubr.bf16.gmra.mrb[76].mxu1 %v2044_v24  ;;  %2711 = vmatmul.mubr.bf16.gmra.mrb[104].mxu0 %v4928_v32  ;;  %v2005_v7 = vpop.permute.xlu1 %2004  ;;  %v5291_v2 = vpop.f32.mrb[49].mxu1  ;;  %v5426_v35 = vld [vmem:[%s5811_s3 + $0x1d4] ss:$8 sps:$4 sm:$0xff]   ;;  %v5435_v9 = vld [vmem:[%s5811_s3 + $0x1d0] ss:$8 sps:$4 sm:$0xff]  }
 0x233   : > { %v1585_v21 = vmax.f32 %v1581_v40, 0.0  ;;  %2720 = vmatprep.mubr.bf16.mxu0 %v5100_v49  ;;  %v5294_v3 = vpop.f32.mrb[50].mxu1  ;;  %v5850_v62 = vld [vmem:[#allocation10_spill] sm:$0xff]  ;;  %v5441_v22 = vld [vmem:[%s5811_s3 + $0x1e4] ss:$8 sps:$4 sm:$0xff]  }
 0x234   : > { %2780 = vmatpush1.bf16.msra.mxu0 %v5274_v39  ;;  %v2003_v54 = vpop.permute.xlu0 %2002  ;;  %v5302_v10 = vpop.f32.mrb[51].mxu1  ;;  %3092 = vmatpush1.bf16.msra.mxu1 %v4958_v27  ;;  %v5321_v27 = vld [vmem:[%s5811_s3 + $0x160] ss:$8 sps:$4 sm:$0xff]   ;;  %v5453_v55 = vld [vmem:[%s5811_s3 + $0x1f4] ss:$8 sps:$4 sm:$0xff]  }
 0x235   : > { %v5305_v32 = vpack.c.bf16 %v1585_v21, %v1584_v11  ;;  %v2007_v37 = vsel %vm390_vm4, %v2003_v54, %v2005_v7  ;;  %2036 = vrot.lane.b32.xlu0 %v2003_v54, %s4100_s30  ;;  %2781 = vmatprep.subr.bf16.mxu0 %v5283_v16  ;;  %v5447_v6 = vld [vmem:[%s5811_s3 + $0x1e0] ss:$8 sps:$4 sm:$0xff]   ;;  %v5461_v31 = vld [vmem:[%s5811_s3 + $0x1f0] ss:$8 sps:$4 sm:$0xff]   ;;  %v5467_v40 = vld [vmem:[%s5811_s3 + $0x204] ss:$8 sps:$4 sm:$0xff]  }
 0x236   : > { %2038 = vrot.lane.b32.xlu1 %v2007_v37, %s4100_s30  ;;  %3093 = vmatprep.subr.bf16.mxu1 %v4964_v63  ;;  %v5337_v63 = vld [vmem:[%s5811_s3 + $0x170] ss:$8 sps:$4 sm:$0xff]   ;;  %v5473_v24 = vld [vmem:[%s5811_s3 + $0x200] ss:$8 sps:$4 sm:$0xff]   ;;  %v5479_v7 = vld [vmem:[%s5811_s3 + $0x214] ss:$8 sps:$4 sm:$0xff]  }
 0x237   : > { %v5487_v11 = vld [vmem:[%s5811_s3 + $0x210] ss:$8 sps:$4 sm:$0xff]   ;;  %v5493_v54 = vld [vmem:[%s5811_s3 + $0x224] ss:$8 sps:$4 sm:$0xff]  }
 0x238   : > { %2782 = vmatpush1.bf16.msra.mxu0 %v5300_v59  ;;  %3094 = vmatpush1.bf16.msra.mxu1 %v4973_v28 }
 0x239   : > { %2783 = vmatprep.subr.bf16.mxu0 %v5313_v50  ;;  %3095 = vmatprep.subr.bf16.mxu1 %v4980_v19  ;;  %v5346_v19 = vld [vmem:[%s5811_s3 + $0x184] ss:$8 sps:$4 sm:$0xff]  }
 0x23a   : > { %2721 = vmatmul.mubr.bf16.gmra.mrb[108].mxu0 %v4985_v20 }
 0x23b   : > { %2730 = vmatprep.mubr.bf16.mxu0 %v5117_v42 }
 0x23c   : > { %2784 = vmatpush1.bf16.msra.mxu0 %v5321_v27  ;;  %v5339_v28 = vpop.f32.mrb[52].mxu1  ;;  %3096 = vmatpush1.bf16.msra.mxu1 %v4995_v47  ;;  %v5359_v47 = vld [vmem:[%s5811_s3 + $0x180] ss:$8 sps:$4 sm:$0xff]  }
 0x23d   : > { %2785 = vmatprep.subr.bf16.mxu0 %v5328_v30  ;;  %v5348_v20 = vpop.f32.mrb[53].mxu1  ;;  %3097 = vmatprep.subr.bf16.mxu1 %v5005_v52  ;;  %v5375_v52 = vld [vmem:[%s5811_s3 + $0x190] ss:$8 sps:$4 sm:$0xff]  }
 0x23e   : > { %v5351_v23 = vpop.f32.mrb[54].mxu1 }
 0x23f   : > { %v5353_v18 = vpop.f32.mrb[55].mxu1 }
 0x240   : > { %2786 = vmatpush1.bf16.msra.mxu0 %v5337_v63  ;;  %3098 = vmatpush1.bf16.msra.mxu1 %v5014_v56  ;;  %v5843_v56 = vld [vmem:[#allocation3_spill] sm:$0xff] }
 0x241   : > { %2787 = vmatprep.subr.bf16.mxu0 %v5346_v19  ;;  %3099 = vmatprep.subr.bf16.mxu1 %v5021_v58  ;;  %v5844_v58 = vld [vmem:[#allocation4_spill] sm:$0xff]  ;;  %5851 = vst [vmem:[#allocation3_spill] sm:$0xff] %v5487_v11 }
 0x242   : > { %2731 = vmatmul.mubr.bf16.gmra.mrb[112].mxu0 %v5096_v5  ;;  %5852 = vst [vmem:[#allocation4_spill] sm:$0xff] %v5493_v54 }
 0x243   : > { %2740 = vmatprep.mubr.bf16.mxu0 %v5134_v34 }
 0x244   : > { %2788 = vmatpush1.bf16.msra.mxu0 %v5359_v47  ;;  %3100 = vmatpush1.bf16.msra.mxu1 %v5843_v56 }
 0x245   : > { %2789 = vmatprep.subr.bf16.mxu0 %v5366_v44  ;;  %3101 = vmatprep.subr.bf16.mxu1 %v5844_v58 }
 0x248   : > { %2790 = vmatpush1.bf16.msra.mxu0 %v5375_v52  ;;  %3102 = vmatpush1.bf16.msra.mxu1 %v5845_v14 }
 0x249   : > { %2791 = vmatprep.subr.bf16.mxu0 %v5382_v4  ;;  %3103 = vmatprep.subr.bf16.mxu1 %v5846_v51 }
 0x24a   : > { %2741 = vmatmul.mubr.bf16.gmra.mrb[116].mxu0 %v5100_v49 }
 0x24b   : > { %2750 = vmatprep.mubr.bf16.mxu0 %v5108_v45 }
 0x24c   : > { %2792 = vmatpush1.bf16.msra.mxu0 %v5389_v33  ;;  %3104 = vmatpush1.bf16.msra.mxu1 %v5847_v8  ;;  %v5502_v8 = vld [vmem:[%s5811_s3 + $0x220] ss:$8 sps:$4 sm:$0xff]  }
 0x24d   : > { %2793 = vmatprep.subr.bf16.mxu0 %v5396_v26  ;;  %3105 = vmatprep.subr.bf16.mxu1 %v5848_v1  ;;  %5853 = vst [vmem:[#allocation5_spill] sm:$0xff] %v5502_v8 }
 0x250   : > { %2794 = vmatpush1.bf16.msra.mxu0 %v5405_v46  ;;  %3106 = vmatpush1.bf16.msra.mxu1 %v5849_v25 }
 0x251   : > { %2795 = vmatprep.subr.bf16.mxu0 %v5412_v60  ;;  %3188 = vmatprep.subr.bf16.mxu1 %v5850_v62 }
 0x252   : > { %2751 = vmatmul.mubr.bf16.gmra.mrb[120].mxu0 %v5117_v42 }
 0x253   : > { %2760 = vmatprep.mubr.bf16.mxu0 %v5121_v53 }
 0x254   : > { %2796 = vmatpush1.bf16.msra.mxu0 %v5419_v43 }
 0x255   : > { %2797 = vmatprep.subr.bf16.mxu0 %v5426_v35 }
 0x258   : > { %2798 = vmatpush1.bf16.msra.mxu0 %v5435_v9 }
 0x259   : > { %2799 = vmatprep.subr.bf16.mxu0 %v5441_v22 }
 0x25a   : > { %2761 = vmatmul.mubr.bf16.gmra.mrb[124].mxu0 %v5134_v34 }
 0x25b   : > { %2803 = vmatprep.mubr.bf16.mxu0 %v5117_v42 }
 0x25c   : > { %2800 = vmatpush1.bf16.msra.mxu0 %v5447_v6 }
 0x25d   : > { %2801 = vmatprep.subr.bf16.mxu0 %v5453_v55 }
 0x260   : > { %2802 = vmatpush1.bf16.msra.mxu0 %v5461_v31 }
 0x261   : > { %2884 = vmatprep.subr.bf16.mxu0 %v5467_v40 }
 0x263   : > { %2804 = vmatmul.mubr.bf16.vlgmr.msra.gmra.mrb[96].mxu0 %v5096_v5 }
 0x264   : > { %2813 = vmatprep.mubr.bf16.mxu0 %v5134_v34  ;;  %2885 = vmatpush1.bf16.msra.mxu0 %v5473_v24 }
 0x265   : > { %v1547_v21 = vpop.f32.mrb[56].mxu1  ;;  %2886 = vmatprep.subr.bf16.mxu0 %v5479_v7 }
 0x266   : > { %v1590_v37 = vmax.f32 %v5285_v57, %v1547_v21  ;;  %v1549_v5 = vpop.f32.mrb[57].mxu1  ;;  %v5511_v57 = vld [vmem:[%s5811_s3 + $0x234] ss:$8 sps:$4 sm:$0xff]  }
 0x267   : > { %v1591_v56 = vmax.f32 %v5291_v2, %v1549_v5  ;;  %v1551_v58 = vpop.f32.mrb[58].mxu1  ;;  %5854 = vst [vmem:[#allocation6_spill] sm:$0xff] %v5511_v57 }
 0x268   : > { %v1592_v14 = vmax.f32 %v5294_v3, %v1551_v58  ;;  %v1553_v51 = vpop.f32.mrb[59].mxu1  ;;  %2887 = vmatpush1.bf16.msra.mxu0 %v5487_v11  ;;  %v5518_v3 = vld [vmem:[%s5810_s2] ss:$0 sm:$0xff] }
 0x269   : > { %v1598_v1 = vmax.f32 %v1590_v37, %v1591_v56  ;;  %v1593_v25 = vmax.f32 %v5302_v10, %v1553_v51  ;;  %v5505_v62 = vpop.f32.mrb[64].mxu0  ;;  %2888 = vmatprep.subr.bf16.mxu0 %v5493_v54  ;;  %v5529_v56 = vld [vmem:[%s5811_s3 + $0x230] ss:$8 sps:$4 sm:$0xff]  }
 0x26a   : > { %v5513_v2 = vpop.f32.mrb[65].mxu0  ;;  %5855 = vst [vmem:[#allocation7_spill] sm:$0xff] %v5529_v56 }
 0x26b   : > { %v1602_v21 = vadd.f32 %v5518_v3, %v1598_v1  ;;  %v1599_v37 = vmax.f32 %v1592_v14, %v1593_v25  ;;  %2814 = vmatmul.mubr.bf16.gmra.mrb[100].mxu0 %v5100_v49  ;;  %v5522_v10 = vpop.f32.mrb[66].mxu0  ;;  %v5536_v49 = vld [vmem:[%s5811_s3 + $0x244] ss:$8 sps:$4 sm:$0xff]   ;;  %v5542_v1 = vld [vmem:[%s5811_s3 + $0x240] ss:$8 sps:$4 sm:$0xff]  }
 0x26c   : > { %2823 = vmatprep.mubr.bf16.mxu0 %v5108_v45  ;;  %v1817_v5 = vpop.f32.mrb[67].mxu0  ;;  %2889 = vmatpush1.bf16.msra.mxu0 %v5502_v8  ;;  %5856 = vst [vmem:[#allocation8_spill] sm:$0xff] %v5536_v49  ;;  %5857 = vst [vmem:[#allocation9_spill] sm:$0xff] %v5542_v1 }
 0x26d   : > { %v1603_v58 = vadd.f32 %v5518_v3, %v1599_v37  ;;  %2890 = vmatprep.subr.bf16.mxu0 %v5511_v57  ;;  %v1606_v14 = vmax.f32 %v1602_v21, 0.0  ;;  %v5550_v37 = vld [vmem:[%s5811_s3 + $0x254] ss:$8 sps:$4 sm:$0xff]  }
 0x26e   : > { %5858 = vst [vmem:[#allocation10_spill] sm:$0xff] %v5550_v37 }
 0x26f   : > { %v1607_v51 = vmax.f32 %v1603_v58, 0.0 }
 0x270   : > { %2891 = vmatpush1.bf16.msra.mxu0 %v5529_v56 }
 0x271   : > { %v5544_v25 = vpack.c.bf16 %v1607_v51, %v1606_v14  ;;  %v1557_v8 = vpop.f32.mrb[60].mxu1  ;;  %2892 = vmatprep.subr.bf16.mxu0 %v5536_v49  ;;  %v5561_v51 = vld [vmem:[%s5811_s3 + $0x250] ss:$8 sps:$4 sm:$0xff]  }
 0x272   : > { %v1594_v21 = vmax.f32 %v5339_v28, %v1557_v8  ;;  %v1559_v58 = vpop.f32.mrb[61].mxu1  ;;  %5859 = vst [vmem:[#allocation11_spill] sm:$0xff] %v5561_v51 }
 0x273   : > { %v1595_v56 = vmax.f32 %v5348_v20, %v1559_v58  ;;  %2824 = vmatmul.mubr.bf16.gmra.mrb[104].mxu0 %v5117_v42  ;;  %v1561_v57 = vpop.f32.mrb[62].mxu1  ;;  %v5568_v42 = vld [vmem:[%s5811_s3 + $0x264] ss:$8 sps:$4 sm:$0xff]  }
 0x274   : > { %v1596_v54 = vmax.f32 %v5351_v23, %v1561_v57  ;;  %2833 = vmatprep.mubr.bf16.mxu0 %v5121_v53  ;;  %v1563_v14 = vpop.f32.mrb[63].mxu1  ;;  %2893 = vmatpush1.bf16.msra.mxu0 %v5542_v1  ;;  %5860 = vst [vmem:[#allocation12_spill] sm:$0xff] %v5568_v42 }
 0x275   : > { %v1600_v49 = vmax.f32 %v1594_v21, %v1595_v56  ;;  %v1597_v28 = vmax.f32 %v5353_v18, %v1563_v14  ;;  %v1821_v8 = vpop.f32.mrb[68].mxu0  ;;  %2894 = vmatprep.subr.bf16.mxu0 %v5550_v37  ;;  %v5575_v18 = vld [vmem:[%s5811_s3 + $0x260] ss:$8 sps:$4 sm:$0xff]   ;;  %v5582_v21 = vld [vmem:[%s5811_s3 + $0x274] ss:$8 sps:$4 sm:$0xff]  }
 0x276   : > { %v1823_v20 = vpop.f32.mrb[69].mxu0  ;;  %5861 = vst [vmem:[#allocation13_spill] sm:$0xff] %v5575_v18  ;;  %5862 = vst [vmem:[#allocation14_spill] sm:$0xff] %v5582_v21  ;;  %v5590_v14 = vld [vmem:[%s5811_s3 + $0x270] ss:$8 sps:$4 sm:$0xff]  }
 0x277   : > { %v1604_v23 = vadd.f32 %v5518_v3, %v1600_v49  ;;  %v1601_v57 = vmax.f32 %v1596_v54, %v1597_v28  ;;  %v1825_v58 = vpop.f32.mrb[70].mxu0  ;;  %5863 = vst [vmem:[#allocation15_spill] sm:$0xff] %v5590_v14 }
 0x278   : > { %v1827_v1 = vpop.f32.mrb[71].mxu0  ;;  %2895 = vmatpush1.bf16.msra.mxu0 %v5561_v51 }
 0x279   : > { %v1605_v56 = vadd.f32 %v5518_v3, %v1601_v57  ;;  %2896 = vmatprep.subr.bf16.mxu0 %v5568_v42  ;;  %v1608_v49 = vmax.f32 %v1604_v23, 0.0 }
 0x27b   : > { %v1609_v54 = vmax.f32 %v1605_v56, 0.0  ;;  %2834 = vmatmul.mubr.bf16.gmra.mrb[108].mxu0 %v5134_v34 }
 0x27c   : > { %2843 = vmatprep.mubr.bf16.mxu0 %v5231_v41  ;;  %2897 = vmatpush1.bf16.msra.mxu0 %v5575_v18 }
 0x27d   : > { %v5592_v28 = vpack.c.bf16 %v1609_v54, %v1608_v49  ;;  %2898 = vmatprep.subr.bf16.mxu0 %v5582_v21 }
 0x280   : > { %2899 = vmatpush1.bf16.msra.mxu0 %v5590_v14 }
 0x281   : > { %v1831_v57 = vpop.f32.mrb[72].mxu0 }
 0x282   : > { %v1890_v23 = vmax.f32 %v5505_v62, %v1831_v57  ;;  %v1833_v56 = vpop.f32.mrb[73].mxu0 }
 0x283   : > { %v1891_v34 = vmax.f32 %v5513_v2, %v1833_v56  ;;  %2844 = vmatmul.mubr.bf16.gmra.mrb[112].mxu0 %v5108_v45  ;;  %v1835_v18 = vpop.f32.mrb[74].mxu0 }
 0x284   : > { %v1892_v42 = vmax.f32 %v5522_v10, %v1835_v18  ;;  %2853 = vmatprep.mubr.bf16.mxu0 %v5288_v0  ;;  %v1837_v51 = vpop.f32.mrb[75].mxu0 }
 0x285   : > { %v1898_v49 = vmax.f32 %v1890_v23, %v1891_v34  ;;  %v1893_v54 = vmax.f32 %v1817_v5, %v1837_v51 }
 0x287   : > { %v1902_v21 = vadd.f32 %v5518_v3, %v1898_v49  ;;  %v1899_v37 = vmax.f32 %v1892_v42, %v1893_v54  ;;  %v2027_v14 = vpop.permute.xlu1 %2026 }
 0x288   : > { %v2025_v11 = vpop.permute.xlu0 %2024  ;;  %3647 = vmatprep.mubr.msk.bf16.mxu1 %vm483_vm0, %v2027_v14 }
 0x289   : > { %v1903_v62 = vadd.f32 %v5518_v3, %v1899_v37  ;;  %v2045_v2 = vsel %vm2040_vm9, %v2025_v11, %v2027_v14  ;;  %v1906_v57 = vmax.f32 %v1902_v21, 0.0 }
 0x28a   : > { %2154 = vmatmul.mubr.bf16.gmra.mrb[80].mxu1 %v2045_v2 }
 0x28b   : > { %v1907_v56 = vmax.f32 %v1903_v62, 0.0  ;;  %2854 = vmatmul.mubr.bf16.gmra.mrb[116].mxu0 %v5121_v53 }
 0x28c   : > { %2863 = vmatprep.mubr.bf16.mxu0 %v5257_v15 }
 0x28d   : > { %v5607_v10 = vpack.c.bf16 %v1907_v56, %v1906_v57  ;;  %v1841_v5 = vpop.f32.mrb[76].mxu0  ;;  %v4101_v56 = vmov 0  }
 0x28e   : > { %v1894_v51 = vmax.f32 %v1821_v8, %v1841_v5  ;;  %v1843_v42 = vpop.f32.mrb[77].mxu0 }
 0x28f   : > { %v1895_v18 = vmax.f32 %v1823_v20, %v1843_v42  ;;  %v1845_v23 = vpop.f32.mrb[78].mxu0 }
 0x290   : > { %v1896_v34 = vmax.f32 %v1825_v58, %v1845_v23  ;;  %v1847_v49 = vpop.f32.mrb[79].mxu0 }
 0x291   : > { %v1900_v54 = vmax.f32 %v1894_v51, %v1895_v18  ;;  %v1897_v37 = vmax.f32 %v1827_v1, %v1847_v49 }
 0x293   : > { %v1904_v11 = vadd.f32 %v5518_v3, %v1900_v54  ;;  %v1901_v14 = vmax.f32 %v1896_v34, %v1897_v37  ;;  %2864 = vmatmul.mubr.bf16.gmra.mrb[120].mxu0 %v5231_v41  ;;  %v2031_v21 = vpop.permute.xlu1 %2030 }
 0x294   : > { %2873 = vmatprep.mubr.bf16.mxu0 %v5305_v32  ;;  %v2029_v62 = vpop.permute.xlu0 %2028  ;;  %3648 = vmatprep.mubr.msk.bf16.mxu1 %vm483_vm0, %v2031_v21 }
 0x295   : > { %v1905_v8 = vadd.f32 %v5518_v3, %v1901_v14  ;;  %v2046_v20 = vsel %vm2040_vm9, %v2029_v62, %v2031_v21  ;;  %v1908_v58 = vmax.f32 %v1904_v11, 0.0 }
 0x296   : > { %2164 = vmatmul.mubr.bf16.gmra.mrb[84].mxu1 %v2046_v20 }
 0x297   : > { %v1909_v2 = vmax.f32 %v1905_v8, 0.0 }
 0x299   : > { %v5615_v57 = vpack.c.bf16 %v1909_v2, %v1908_v58  ;;  %v5864_v58 = vld [vmem:[#allocation3_spill] sm:$0xff]  ;;  %v5865_v2 = vld [vmem:[#allocation4_spill] sm:$0xff] }
 0x29b   : > { %2874 = vmatmul.mubr.bf16.gmra.mrb[124].mxu0 %v5288_v0 }
 0x29c   : > { %v2033_v1 = vpop.permute.xlu0 %2032  ;;  %2916 = vmatprep.mubr.bf16.mxu0 %v4101_v56 }
 0x29d   : > { %v2035_v5 = vpop.permute.xlu1 %2034 }
 0x29e   : > { %3649 = vmatprep.mubr.msk.bf16.mxu1 %vm483_vm0, %v2035_v5  ;;  %v2047_v51 = vsel %vm2040_vm9, %v2033_v1, %v2035_v5 }
 0x29f   : > { %2174 = vmatmul.mubr.bf16.gmra.mrb[88].mxu1 %v2047_v51 }
 0x2a3   : > { %2917 = vmatmul.mubr.bf16.vlgmr.msra.gmra.mrb[96].mxu0 %v5108_v45 }
 0x2a4   : > { %2926 = vmatprep.mubr.bf16.mxu0 %v4101_v56 }
 0x2a7   : > { %v2037_v42 = vpop.permute.xlu0 %2036 }
 0x2a8   : > { %v2039_v18 = vpop.permute.xlu1 %2038 }
 0x2a9   : > { %3650 = vmatprep.mubr.msk.bf16.mxu1 %vm483_vm0, %v2039_v18  ;;  %v2048_v23 = vsel %vm2040_vm9, %v2037_v42, %v2039_v18 }
 0x2aa   : > { %2184 = vmatmul.mubr.bf16.gmra.mrb[92].mxu1 %v2048_v23  ;;  %v5867_v23 = vld [vmem:[#allocation6_spill] sm:$0xff] }
 0x2ab   : > { %2927 = vmatmul.mubr.bf16.gmra.mrb[100].mxu0 %v5121_v53  ;;  %3107 = vmatprep.mubr.bf16.mxu1 %v5231_v41 }
 0x2ac   : > { %2936 = vmatprep.mubr.bf16.mxu0 %v4101_v56  ;;  %v5628_v34 = vpop.f32.mrb[80].mxu0 }
 0x2ad   : > { %v5630_v49 = vpop.f32.mrb[81].mxu0 }
 0x2ae   : > { %v5632_v54 = vpop.f32.mrb[82].mxu0 }
 0x2af   : > { %v5634_v37 = vpop.f32.mrb[83].mxu0 }
 0x2b2   : > { %3108 = vmatmul.mubr.bf16.vlgmr.msra.gmra.mrb[96].mxu1 %v5108_v45 }
 0x2b3   : > { %2937 = vmatmul.mubr.bf16.gmra.mrb[104].mxu0 %v5231_v41  ;;  %3117 = vmatprep.mubr.bf16.mxu1 %v5288_v0 }
 0x2b4   : > { %3189 = vmatpush1.bf16.msra.mxu1 %v5181_v12  ;;  %2946 = vmatprep.mubr.bf16.mxu0 %v4101_v56 }
 0x2b5   : > { %3190 = vmatprep.subr.bf16.mxu1 %v5188_v13  ;;  %v5642_v11 = vpop.f32.mrb[84].mxu0 }
 0x2b6   : > { %v5644_v14 = vpop.f32.mrb[85].mxu0 }
 0x2b7   : > { %v5646_v21 = vpop.f32.mrb[86].mxu0 }
 0x2b8   : > { %3191 = vmatpush1.bf16.msra.mxu1 %v5204_v29  ;;  %v5649_v62 = vpop.f32.mrb[87].mxu0 }
 0x2b9   : > { %3192 = vmatprep.subr.bf16.mxu1 %v5211_v17 }
 0x2ba   : > { %3118 = vmatmul.mubr.bf16.gmra.mrb[100].mxu1 %v5121_v53 }
 0x2bb   : > { %2947 = vmatmul.mubr.bf16.gmra.mrb[108].mxu0 %v5288_v0  ;;  %3127 = vmatprep.mubr.bf16.mxu1 %v5257_v15 }
 0x2bc   : > { %3193 = vmatpush1.bf16.msra.mxu1 %v5227_v61  ;;  %2956 = vmatprep.mubr.bf16.mxu0 %v4101_v56 }
 0x2bd   : > { %3194 = vmatprep.subr.bf16.mxu1 %v5237_v36 }
 0x2c0   : > { %3195 = vmatpush1.bf16.msra.mxu1 %v5254_v38 }
 0x2c1   : > { %3196 = vmatprep.subr.bf16.mxu1 %v5264_v48 }
 0x2c2   : > { %3128 = vmatmul.mubr.bf16.gmra.mrb[104].mxu1 %v5231_v41 }
 0x2c3   : > { %2957 = vmatmul.mubr.bf16.gmra.mrb[112].mxu0 %v5257_v15  ;;  %3137 = vmatprep.mubr.bf16.mxu1 %v5305_v32 }
 0x2c4   : > { %3197 = vmatpush1.bf16.msra.mxu1 %v5274_v39  ;;  %2966 = vmatprep.mubr.bf16.mxu0 %v4101_v56 }
 0x2c5   : > { %3198 = vmatprep.subr.bf16.mxu1 %v5283_v16 }
 0x2c8   : > { %3199 = vmatpush1.bf16.msra.mxu1 %v5300_v59 }
 0x2c9   : > { %3200 = vmatprep.subr.bf16.mxu1 %v5313_v50 }
 0x2ca   : > { %3138 = vmatmul.mubr.bf16.gmra.mrb[108].mxu1 %v5288_v0 }
 0x2cb   : > { %2967 = vmatmul.mubr.bf16.gmra.mrb[116].mxu0 %v5305_v32  ;;  %3147 = vmatprep.mubr.bf16.mxu1 %v5544_v25 }
 0x2cc   : > { %3201 = vmatpush1.bf16.msra.mxu1 %v5321_v27  ;;  %2976 = vmatprep.mubr.bf16.mxu0 %v4101_v56 }
 0x2cd   : > { %3202 = vmatprep.subr.bf16.mxu1 %v5328_v30 }
 0x2d0   : > { %3203 = vmatpush1.bf16.msra.mxu1 %v5337_v63 }
 0x2d1   : > { %3204 = vmatprep.subr.bf16.mxu1 %v5346_v19 }
 0x2d2   : > { %3148 = vmatmul.mubr.bf16.gmra.mrb[112].mxu1 %v5257_v15 }
 0x2d3   : > { %2977 = vmatmul.mubr.bf16.gmra.mrb[120].mxu0 %v5544_v25  ;;  %3157 = vmatprep.mubr.bf16.mxu1 %v5592_v28 }
 0x2d4   : > { %3205 = vmatpush1.bf16.msra.mxu1 %v5359_v47  ;;  %2986 = vmatprep.mubr.bf16.mxu0 %v4101_v56 }
 0x2d5   : > { %3206 = vmatprep.subr.bf16.mxu1 %v5366_v44 }
 0x2d8   : > { %3207 = vmatpush1.bf16.msra.mxu1 %v5375_v52 }
 0x2d9   : > { %3208 = vmatprep.subr.bf16.mxu1 %v5382_v4 }
 0x2da   : > { %3158 = vmatmul.mubr.bf16.gmra.mrb[116].mxu1 %v5305_v32 }
 0x2db   : > { %2987 = vmatmul.mubr.bf16.gmra.mrb[124].mxu0 %v5592_v28  ;;  %3167 = vmatprep.mubr.bf16.mxu1 %v5607_v10 }
 0x2dc   : > { %3209 = vmatpush1.bf16.msra.mxu1 %v5389_v33 }
 0x2dd   : > { %3210 = vmatprep.subr.bf16.mxu1 %v5396_v26 }
 0x2e0   : > { %3211 = vmatpush1.bf16.msra.mxu1 %v5405_v46 }
 0x2e1   : > { %v1871_v45 = vpop.f32.mrb[88].mxu0  ;;  %3212 = vmatprep.subr.bf16.mxu1 %v5412_v60 }
 0x2e2   : > { %v1914_v53 = vmax.f32 %v5628_v34, %v1871_v45  ;;  %v1873_v12 = vpop.f32.mrb[89].mxu0  ;;  %3168 = vmatmul.mubr.bf16.gmra.mrb[120].mxu1 %v5544_v25  ;;  %v5870_v45 = vld [vmem:[#allocation9_spill] sm:$0xff] }
 0x2e3   : > { %v1915_v13 = vmax.f32 %v5630_v49, %v1873_v12  ;;  %v1875_v29 = vpop.f32.mrb[90].mxu0  ;;  %3177 = vmatprep.mubr.bf16.mxu1 %v5615_v57  ;;  %v5871_v12 = vld [vmem:[#allocation10_spill] sm:$0xff] }
 0x2e4   : > { %v1916_v17 = vmax.f32 %v5632_v54, %v1875_v29  ;;  %3213 = vmatpush1.bf16.msra.mxu1 %v5419_v43  ;;  %v1877_v61 = vpop.f32.mrb[91].mxu0 }
 0x2e5   : > { %v1922_v41 = vmax.f32 %v1914_v53, %v1915_v13  ;;  %v1917_v36 = vmax.f32 %v5634_v37, %v1877_v61  ;;  %v2115_v38 = vpop.f32.mrb[64].mxu1  ;;  %3214 = vmatprep.subr.bf16.mxu1 %v5426_v35 }
 0x2e6   : > { %v2117_v48 = vpop.f32.mrb[65].mxu1 }
 0x2e7   : > { %v1926_v39 = vadd.f32 %v5518_v3, %v1922_v41  ;;  %v1923_v16 = vmax.f32 %v1916_v17, %v1917_v36  ;;  %v2119_v0 = vpop.f32.mrb[66].mxu1 }
 0x2e8   : > { %3215 = vmatpush1.bf16.msra.mxu1 %v5435_v9  ;;  %v2121_v59 = vpop.f32.mrb[67].mxu1 }
 0x2e9   : > { %v1927_v50 = vadd.f32 %v5518_v3, %v1923_v16  ;;  %3216 = vmatprep.subr.bf16.mxu1 %v5441_v22  ;;  %v1930_v27 = vmax.f32 %v1926_v39, 0.0  ;;  %v5873_v16 = vld [vmem:[#allocation12_spill] sm:$0xff] }
 0x2ea   : > { %3178 = vmatmul.mubr.bf16.gmra.mrb[124].mxu1 %v5592_v28 }
 0x2eb   : > { %v1931_v30 = vmax.f32 %v1927_v50, 0.0  ;;  %3220 = vmatprep.mubr.bf16.mxu1 %v5544_v25  ;;  %v5874_v50 = vld [vmem:[#allocation13_spill] sm:$0xff] }
 0x2ec   : > { %3217 = vmatpush1.bf16.msra.mxu1 %v5447_v6 }
 0x2ed   : > { %v1881_v63 = vpop.f32.mrb[92].mxu0  ;;  %3218 = vmatprep.subr.bf16.mxu1 %v5453_v55  ;;  %v5707_v19 = vpack.c.bf16 %v1931_v30, %v1930_v27  ;;  %v5875_v30 = vld [vmem:[#allocation14_spill] sm:$0xff] }
 0x2ee   : > { %v1918_v47 = vmax.f32 %v5642_v11, %v1881_v63  ;;  %v1883_v44 = vpop.f32.mrb[93].mxu0  ;;  %v5868_v11 = vld [vmem:[#allocation7_spill] sm:$0xff] }
 0x2ef   : > { %v1919_v52 = vmax.f32 %v5644_v14, %v1883_v44  ;;  %v1885_v4 = vpop.f32.mrb[94].mxu0  ;;  %v5869_v14 = vld [vmem:[#allocation8_spill] sm:$0xff]  ;;  %v5876_v44 = vld [vmem:[#allocation15_spill] sm:$0xff] }
 0x2f0   : > { %v1920_v33 = vmax.f32 %v5646_v21, %v1885_v4  ;;  %3219 = vmatpush1.bf16.msra.mxu1 %v5461_v31  ;;  %v1887_v26 = vpop.f32.mrb[95].mxu0 }
 0x2f1   : > { %v1924_v46 = vmax.f32 %v1918_v47, %v1919_v52  ;;  %v1921_v60 = vmax.f32 %v5649_v62, %v1887_v26  ;;  %v2125_v43 = vpop.f32.mrb[68].mxu1  ;;  %3301 = vmatprep.subr.bf16.mxu1 %v5467_v40 }
 0x2f2   : > { %v2127_v35 = vpop.f32.mrb[69].mxu1 }
 0x2f3   : > { %v1928_v9 = vadd.f32 %v5518_v3, %v1924_v46  ;;  %v1925_v22 = vmax.f32 %v1920_v33, %v1921_v60  ;;  %3221 = vmatmul.mubr.bf16.vlgmr.msra.gmra.mrb[96].mxu1 %v5257_v15  ;;  %v2129_v6 = vpop.f32.mrb[70].mxu1 }
 0x2f4   : > { %3230 = vmatprep.mubr.bf16.mxu1 %v5592_v28  ;;  %v2131_v55 = vpop.f32.mrb[71].mxu1  ;;  %3302 = vmatpush1.bf16.msra.mxu1 %v5473_v24  ;;  %v5866_v24 = vld [vmem:[#allocation5_spill] sm:$0xff] }
 0x2f5   : > { %v1929_v31 = vadd.f32 %v5518_v3, %v1925_v22  ;;  %3303 = vmatprep.subr.bf16.mxu1 %v5479_v7  ;;  %v1932_v8 = vmax.f32 %v1928_v9, 0.0 }
 0x2f7   : > { %v1933_v20 = vmax.f32 %v1929_v31, 0.0 }
 0x2f8   : > { %3304 = vmatpush1.bf16.msra.mxu1 %v5864_v58 }
 0x2f9   : > { %v1935_v40 = vpack.c.bf16 %v1933_v20, %v1932_v8  ;;  %3305 = vmatprep.subr.bf16.mxu1 %v5865_v2 }
 0x2fa   : > { %v2135_v1 = vpop.f32.mrb[72].mxu1 }
 0x2fb   : > { %v2194_v5 = vmax.f32 %v2115_v38, %v2135_v1  ;;  %v2137_v15 = vpop.f32.mrb[73].mxu1  ;;  %3231 = vmatmul.mubr.bf16.gmra.mrb[100].mxu1 %v5305_v32 }
 0x2fc   : > { %v2195_v51 = vmax.f32 %v2117_v48, %v2137_v15  ;;  %v2139_v42 = vpop.f32.mrb[74].mxu1  ;;  %3240 = vmatprep.mubr.bf16.mxu1 %v5607_v10  ;;  %3306 = vmatpush1.bf16.msra.mxu1 %v5866_v24  ;;  %v5872_v48 = vld [vmem:[#allocation11_spill] sm:$0xff] }
 0x2fd   : > { %v2196_v18 = vmax.f32 %v2119_v0, %v2139_v42  ;;  %v2141_v7 = vpop.f32.mrb[75].mxu1  ;;  %3307 = vmatprep.subr.bf16.mxu1 %v5867_v23 }
 0x2fe   : > { %v2202_v34 = vmax.f32 %v2194_v5, %v2195_v51  ;;  %v2197_v49 = vmax.f32 %v2121_v59, %v2141_v7 }
 0x300   : > { %v2206_v54 = vadd.f32 %v5518_v3, %v2202_v34  ;;  %v2203_v37 = vmax.f32 %v2196_v18, %v2197_v49  ;;  %3308 = vmatpush1.bf16.msra.mxu1 %v5868_v11 }
 0x301   : > { %3309 = vmatprep.subr.bf16.mxu1 %v5869_v14 }
 0x302   : > { %v2207_v32 = vadd.f32 %v5518_v3, %v2203_v37  ;;  %v2210_v21 = vmax.f32 %v2206_v54, 0.0 }
 0x303   : > { %3241 = vmatmul.mubr.bf16.gmra.mrb[104].mxu1 %v5544_v25 }
 0x304   : > { %v2211_v62 = vmax.f32 %v2207_v32, 0.0  ;;  %3250 = vmatprep.mubr.bf16.mxu1 %v5615_v57  ;;  %3310 = vmatpush1.bf16.msra.mxu1 %v5870_v45 }
 0x305   : > { %v2145_v53 = vpop.f32.mrb[76].mxu1  ;;  %3311 = vmatprep.subr.bf16.mxu1 %v5871_v12 }
 0x306   : > { %v2198_v13 = vmax.f32 %v2125_v43, %v2145_v53  ;;  %v2147_v29 = vpop.f32.mrb[77].mxu1  ;;  %v2214_v17 = vpack.c.bf16 %v2211_v62, %v2210_v21 }
 0x307   : > { %v2199_v61 = vmax.f32 %v2127_v35, %v2147_v29  ;;  %v2149_v41 = vpop.f32.mrb[78].mxu1 }
 0x308   : > { %v2200_v36 = vmax.f32 %v2129_v6, %v2149_v41  ;;  %v2151_v38 = vpop.f32.mrb[79].mxu1  ;;  %3312 = vmatpush1.bf16.msra.mxu1 %v5872_v48 }
 0x309   : > { %v2204_v39 = vmax.f32 %v2198_v13, %v2199_v61  ;;  %v2201_v25 = vmax.f32 %v2131_v55, %v2151_v38  ;;  %3313 = vmatprep.subr.bf16.mxu1 %v5873_v16 }
 0x30b   : > { %v2208_v0 = vadd.f32 %v5518_v3, %v2204_v39  ;;  %v2205_v59 = vmax.f32 %v2200_v36, %v2201_v25  ;;  %3251 = vmatmul.mubr.bf16.gmra.mrb[108].mxu1 %v5592_v28  ;;  %v5765_v39 = vld [vmem:[%s5812_s4] ss:$0 sm:$0xff] }
 0x30c   : > { %3260 = vmatprep.mubr.bf16.mxu1 %v5707_v19  ;;  %3314 = vmatpush1.bf16.msra.mxu1 %v5874_v50 }
 0x30d   : > { %v2209_v27 = vadd.f32 %v5518_v3, %v2205_v59  ;;  %3315 = vmatprep.subr.bf16.mxu1 %v5875_v30  ;;  %v2212_v63 = vmax.f32 %v2208_v0, 0.0 }
 0x30f   : > { %v2213_v47 = vmax.f32 %v2209_v27, 0.0 }
 0x310   : > { %3316 = vmatpush1.bf16.msra.mxu1 %v5876_v44 }
 0x311   : > { %v2215_v52 = vpack.c.bf16 %v2213_v47, %v2212_v63 }
 0x313   : > { %3261 = vmatmul.mubr.bf16.gmra.mrb[112].mxu1 %v5607_v10 }
 0x314   : > { %3270 = vmatprep.mubr.bf16.mxu1 %v1935_v40 }
 0x31b   : > { %3271 = vmatmul.mubr.bf16.gmra.mrb[116].mxu1 %v5615_v57 }
 0x31c   : > { %3280 = vmatprep.mubr.bf16.mxu1 %v2214_v17 }
 0x323   : > { %3281 = vmatmul.mubr.bf16.gmra.mrb[120].mxu1 %v5707_v19 }
 0x324   : > { %3290 = vmatprep.mubr.bf16.mxu1 %v2215_v52 }
 0x32b   : > { %3291 = vmatmul.mubr.bf16.gmra.mrb[124].mxu1 %v1935_v40 }
 0x32c   : > { %3333 = vmatprep.mubr.bf16.mxu1 %v4101_v56 }
 0x333   : > { %3334 = vmatmul.mubr.bf16.vlgmr.msra.gmra.mrb[96].mxu1 %v5607_v10 }
 0x334   : > { %3343 = vmatprep.mubr.bf16.mxu1 %v4101_v56 }
 0x33b   : > { %3344 = vmatmul.mubr.bf16.gmra.mrb[100].mxu1 %v5615_v57 }
 0x33c   : > { %3353 = vmatprep.mubr.bf16.mxu1 %v4101_v56 }
 0x343   : > { %3354 = vmatmul.mubr.bf16.gmra.mrb[104].mxu1 %v5707_v19 }
 0x344   : > { %3363 = vmatprep.mubr.bf16.mxu1 %v4101_v56 }
 0x34b   : > { %3364 = vmatmul.mubr.bf16.gmra.mrb[108].mxu1 %v1935_v40 }
 0x34c   : > { %3373 = vmatprep.mubr.bf16.mxu1 %v4101_v56 }
 0x353   : > { %3374 = vmatmul.mubr.bf16.gmra.mrb[112].mxu1 %v2214_v17 }
 0x354   : > { %3383 = vmatprep.mubr.bf16.mxu1 %v4101_v56 }
 0x35b   : > { %3384 = vmatmul.mubr.bf16.gmra.mrb[116].mxu1 %v2215_v52 }
 0x35c   : > { %3393 = vmatprep.mubr.bf16.mxu1 %v4101_v56 }
 0x35d   : > { %v2155_v28 = vpop.f32.mrb[80].mxu1 }
 0x35e   : > { %v2157_v10 = vpop.f32.mrb[81].mxu1 }
 0x35f   : > { %v2159_v4 = vpop.f32.mrb[82].mxu1 }
 0x360   : > { %v2161_v33 = vpop.f32.mrb[83].mxu1 }
 0x369   : > { %v2165_v57 = vpop.f32.mrb[84].mxu1 }
 0x36a   : > { %v2167_v26 = vpop.f32.mrb[85].mxu1 }
 0x36b   : > { %v2169_v46 = vpop.f32.mrb[86].mxu1 }
 0x36c   : > { %v2171_v60 = vpop.f32.mrb[87].mxu1 }
 0x372   : > { %v2175_v19 = vpop.f32.mrb[88].mxu1 }
 0x373   : > { %v2218_v43 = vmax.f32 %v2155_v28, %v2175_v19  ;;  %v2177_v35 = vpop.f32.mrb[89].mxu1 }
 0x374   : > { %v2219_v9 = vmax.f32 %v2157_v10, %v2177_v35  ;;  %v2179_v22 = vpop.f32.mrb[90].mxu1 }
 0x375   : > { %v2220_v6 = vmax.f32 %v2159_v4, %v2179_v22  ;;  %v2181_v55 = vpop.f32.mrb[91].mxu1 }
 0x376   : > { %v2226_v31 = vmax.f32 %v2218_v43, %v2219_v9  ;;  %v2221_v8 = vmax.f32 %v2161_v33, %v2181_v55  ;;  %v2918_v20 = vpop.f32.mrb[96].mxu0 }
 0x377   : > { %v2920_v58 = vpop.f32.mrb[97].mxu0 }
 0x378   : > { %v2230_v40 = vadd.f32 %v5518_v3, %v2226_v31  ;;  %v2227_v2 = vmax.f32 %v2220_v6, %v2221_v8  ;;  %v2922_v1 = vpop.f32.mrb[98].mxu0 }
 0x379   : > { %v2924_v5 = vpop.f32.mrb[99].mxu0 }
 0x37a   : > { %v2231_v15 = vadd.f32 %v5518_v3, %v2227_v2  ;;  %v2234_v51 = vmax.f32 %v2230_v40, 0.0 }
 0x37c   : > { %v2235_v42 = vmax.f32 %v2231_v15, 0.0 }
 0x37d   : > { %v2185_v24 = vpop.f32.mrb[92].mxu1 }
 0x37e   : > { %v2222_v18 = vmax.f32 %v2165_v57, %v2185_v24  ;;  %v2928_v7 = vpop.f32.mrb[100].mxu0  ;;  %v2187_v23 = vpop.f32.mrb[93].mxu1  ;;  %v2238_v34 = vpack.c.bf16 %v2235_v42, %v2234_v51 }
 0x37f   : > { %v2223_v49 = vmax.f32 %v2167_v26, %v2187_v23  ;;  %v2930_v54 = vpop.f32.mrb[101].mxu0  ;;  %v2189_v37 = vpop.f32.mrb[94].mxu1 }
 0x380   : > { %v2224_v11 = vmax.f32 %v2169_v46, %v2189_v37  ;;  %v2932_v14 = vpop.f32.mrb[102].mxu0  ;;  %3394 = vmatmul.mubr.bf16.gmra.mrb[120].mxu1 %v2238_v34  ;;  %v2191_v32 = vpop.f32.mrb[95].mxu1 }
 0x381   : > { %v2228_v21 = vmax.f32 %v2222_v18, %v2223_v49  ;;  %v2225_v62 = vmax.f32 %v2171_v60, %v2191_v32  ;;  %v2934_v45 = vpop.f32.mrb[103].mxu0  ;;  %3403 = vmatprep.mubr.bf16.mxu1 %v4101_v56 }
 0x383   : > { %v2232_v53 = vadd.f32 %v5518_v3, %v2228_v21  ;;  %v2229_v12 = vmax.f32 %v2224_v11, %v2225_v62 }
 0x385   : > { %v2233_v13 = vadd.f32 %v5518_v3, %v2229_v12  ;;  %v2236_v17 = vmax.f32 %v2232_v53, 0.0 }
 0x386   : > { %v2938_v29 = vpop.f32.mrb[104].mxu0 }
 0x387   : > { %v2237_v61 = vmax.f32 %v2233_v13, 0.0  ;;  %v2997_v41 = vmax.f32 %v2918_v20, %v2938_v29  ;;  %v2940_v36 = vpop.f32.mrb[105].mxu0 }
 0x388   : > { %v2998_v38 = vmax.f32 %v2920_v58, %v2940_v36  ;;  %v2942_v48 = vpop.f32.mrb[106].mxu0 }
 0x389   : > { %v2999_v25 = vmax.f32 %v2922_v1, %v2942_v48  ;;  %v2944_v16 = vpop.f32.mrb[107].mxu0  ;;  %v2239_v56 = vpack.c.bf16 %v2237_v61, %v2236_v17 }
 0x38a   : > { %v3005_v0 = vmax.f32 %v2997_v41, %v2998_v38  ;;  %v3000_v59 = vmax.f32 %v2924_v5, %v2944_v16 }
 0x38b   : > { %3404 = vmatmul.mubr.bf16.gmra.mrb[124].mxu1 %v2239_v56 }
 0x38c   : > { %v3015_v3 = vadd.f32 %v5765_v39, %v3005_v0  ;;  %v3006_v50 = vmax.f32 %v2999_v25, %v3000_v59 }
 0x38e   : > { %v3019_v27 = vmax.f32 %v3015_v3, 0.0  ;;  %v3016_v30 = vadd.f32 %v5765_v39, %v3006_v50  ;;  %v2948_v63 = vpop.f32.mrb[108].mxu0 }
 0x38f   : > { %v3001_v47 = vmax.f32 %v2928_v7, %v2948_v63  ;;  %v2950_v44 = vpop.f32.mrb[109].mxu0 }
 0x390   : > { %3023 = vst [vmem:[%s5772_s25] sm:$0xff] %v3019_v27  ;;  %v3020_v52 = vmax.f32 %v3016_v30, 0.0  ;;  %v3002_v28 = vmax.f32 %v2930_v54, %v2950_v44  ;;  %v2952_v10 = vpop.f32.mrb[110].mxu0 }
 0x391   : > { %v3003_v4 = vmax.f32 %v2932_v14, %v2952_v10  ;;  %v2954_v33 = vpop.f32.mrb[111].mxu0 }
 0x392   : > { %3024 = vst [vmem:[%s5772_s25 + $0x20] sm:$0xff] %v3020_v52  ;;  %v3007_v57 = vmax.f32 %v3001_v47, %v3002_v28  ;;  %v3004_v26 = vmax.f32 %v2934_v45, %v2954_v33 }
 0x394   : > { %v3017_v46 = vadd.f32 %v5765_v39, %v3007_v57  ;;  %v3008_v60 = vmax.f32 %v3003_v4, %v3004_v26 }
 0x396   : > { %v3021_v19 = vmax.f32 %v3017_v46, 0.0  ;;  %v3018_v43 = vadd.f32 %v5765_v39, %v3008_v60  ;;  %v2958_v35 = vpop.f32.mrb[112].mxu0 }
 0x397   : > { %v2960_v9 = vpop.f32.mrb[113].mxu0 }
 0x398   : > { %3025 = vst [vmem:[%s5772_s25 + $0x40] sm:$0xff] %v3021_v19  ;;  %v3022_v22 = vmax.f32 %v3018_v43, 0.0  ;;  %v2962_v6 = vpop.f32.mrb[114].mxu0 }
 0x399   : > { %v2964_v55 = vpop.f32.mrb[115].mxu0 }
 0x39a   : > { %3026 = vst [vmem:[%s5772_s25 + $0x60] sm:$0xff] %v3022_v22 }
 0x39e   : > { %v2968_v31 = vpop.f32.mrb[116].mxu0 }
 0x39f   : > { %v2970_v8 = vpop.f32.mrb[117].mxu0 }
 0x3a0   : > { %v2972_v20 = vpop.f32.mrb[118].mxu0 }
 0x3a1   : > { %v2974_v58 = vpop.f32.mrb[119].mxu0 }
 0x3a6   : > { %v2978_v40 = vpop.f32.mrb[120].mxu0 }
 0x3a7   : > { %v3027_v2 = vmax.f32 %v2958_v35, %v2978_v40  ;;  %v2980_v1 = vpop.f32.mrb[121].mxu0 }
 0x3a8   : > { %v3028_v5 = vmax.f32 %v2960_v9, %v2980_v1  ;;  %v2982_v15 = vpop.f32.mrb[122].mxu0 }
 0x3a9   : > { %v3029_v51 = vmax.f32 %v2962_v6, %v2982_v15  ;;  %v2984_v42 = vpop.f32.mrb[123].mxu0 }
 0x3aa   : > { %v3035_v24 = vmax.f32 %v3027_v2, %v3028_v5  ;;  %v3030_v18 = vmax.f32 %v2964_v55, %v2984_v42 }
 0x3ac   : > { %v3039_v7 = vadd.f32 %v5765_v39, %v3035_v24  ;;  %v3036_v23 = vmax.f32 %v3029_v51, %v3030_v18 }
 0x3ae   : > { %v3043_v34 = vmax.f32 %v3039_v7, 0.0  ;;  %v3040_v49 = vadd.f32 %v5765_v39, %v3036_v23  ;;  %v2988_v54 = vpop.f32.mrb[124].mxu0 }
 0x3af   : > { %v3031_v37 = vmax.f32 %v2968_v31, %v2988_v54  ;;  %v2990_v11 = vpop.f32.mrb[125].mxu0 }
 0x3b0   : > { %3047 = vst [vmem:[%s5772_s25 + $0x8] sm:$0xff] %v3043_v34  ;;  %v3044_v14 = vmax.f32 %v3040_v49, 0.0  ;;  %v3032_v32 = vmax.f32 %v2970_v8, %v2990_v11  ;;  %v2992_v21 = vpop.f32.mrb[126].mxu0 }
 0x3b1   : > { %v3033_v62 = vmax.f32 %v2972_v20, %v2992_v21  ;;  %v2994_v45 = vpop.f32.mrb[127].mxu0 }
 0x3b2   : > { %3048 = vst [vmem:[%s5772_s25 + $0x28] sm:$0xff] %v3044_v14  ;;  %v3037_v53 = vmax.f32 %v3031_v37, %v3032_v32  ;;  %v3034_v12 = vmax.f32 %v2974_v58, %v2994_v45 }
 0x3b4   : > { %v3041_v13 = vadd.f32 %v5765_v39, %v3037_v53  ;;  %v3038_v29 = vmax.f32 %v3033_v62, %v3034_v12 }
 0x3b6   : > { %v3045_v17 = vmax.f32 %v3041_v13, 0.0  ;;  %v3042_v61 = vadd.f32 %v5765_v39, %v3038_v29 }
 0x3b8   : > { %3049 = vst [vmem:[%s5772_s25 + $0x48] sm:$0xff] %v3045_v17  ;;  %v3046_v41 = vmax.f32 %v3042_v61, 0.0 }
 0x3ba   : > { %3050 = vst [vmem:[%s5772_s25 + $0x68] sm:$0xff] %v3046_v41 }
 0x406   : > { %v3335_v36 = vpop.f32.mrb[96].mxu1 }
 0x407   : > { %v3337_v38 = vpop.f32.mrb[97].mxu1 }
 0x408   : > { %v3339_v48 = vpop.f32.mrb[98].mxu1 }
 0x409   : > { %v3341_v25 = vpop.f32.mrb[99].mxu1 }
 0x40e   : > { %v3345_v16 = vpop.f32.mrb[100].mxu1 }
 0x40f   : > { %v3347_v56 = vpop.f32.mrb[101].mxu1 }
 0x410   : > { %v3349_v0 = vpop.f32.mrb[102].mxu1 }
 0x411   : > { %v3351_v59 = vpop.f32.mrb[103].mxu1 }
 0x416   : > { %v3355_v3 = vpop.f32.mrb[104].mxu1 }
 0x417   : > { %v3414_v50 = vmax.f32 %v3335_v36, %v3355_v3  ;;  %v3357_v27 = vpop.f32.mrb[105].mxu1 }
 0x418   : > { %v3415_v30 = vmax.f32 %v3337_v38, %v3357_v27  ;;  %v3359_v63 = vpop.f32.mrb[106].mxu1 }
 0x419   : > { %v3416_v47 = vmax.f32 %v3339_v48, %v3359_v63  ;;  %v3361_v44 = vpop.f32.mrb[107].mxu1 }
 0x41a   : > { %v3422_v52 = vmax.f32 %v3414_v50, %v3415_v30  ;;  %v3417_v28 = vmax.f32 %v3341_v25, %v3361_v44 }
 0x41c   : > { %v3426_v10 = vadd.f32 %v5765_v39, %v3422_v52  ;;  %v3423_v4 = vmax.f32 %v3416_v47, %v3417_v28 }
 0x41e   : > { %v3430_v33 = vmax.f32 %v3426_v10, 0.0  ;;  %v3427_v57 = vadd.f32 %v5765_v39, %v3423_v4  ;;  %v3365_v26 = vpop.f32.mrb[108].mxu1 }
 0x41f   : > { %v3418_v46 = vmax.f32 %v3345_v16, %v3365_v26  ;;  %v3367_v60 = vpop.f32.mrb[109].mxu1 }
 0x420   : > { %3434 = vst [vmem:[%s5772_s25 + $0x10] sm:$0xff] %v3430_v33  ;;  %v3431_v19 = vmax.f32 %v3427_v57, 0.0  ;;  %v3419_v43 = vmax.f32 %v3347_v56, %v3367_v60  ;;  %v3369_v35 = vpop.f32.mrb[110].mxu1 }
 0x421   : > { %v3420_v9 = vmax.f32 %v3349_v0, %v3369_v35  ;;  %v3371_v22 = vpop.f32.mrb[111].mxu1 }
 0x422   : > { %3435 = vst [vmem:[%s5772_s25 + $0x30] sm:$0xff] %v3431_v19  ;;  %v3424_v6 = vmax.f32 %v3418_v46, %v3419_v43  ;;  %v3421_v55 = vmax.f32 %v3351_v59, %v3371_v22 }
 0x424   : > { %v3428_v31 = vadd.f32 %v5765_v39, %v3424_v6  ;;  %v3425_v8 = vmax.f32 %v3420_v9, %v3421_v55 }
 0x426   : > { %v3432_v20 = vmax.f32 %v3428_v31, 0.0  ;;  %v3429_v58 = vadd.f32 %v5765_v39, %v3425_v8  ;;  %v3375_v40 = vpop.f32.mrb[112].mxu1 }
 0x427   : > { %v3377_v2 = vpop.f32.mrb[113].mxu1 }
 0x428   : > { %3436 = vst [vmem:[%s5772_s25 + $0x50] sm:$0xff] %v3432_v20  ;;  %v3433_v1 = vmax.f32 %v3429_v58, 0.0  ;;  %v3379_v5 = vpop.f32.mrb[114].mxu1 }
 0x429   : > { %v3381_v15 = vpop.f32.mrb[115].mxu1 }
 0x42a   : > { %3437 = vst [vmem:[%s5772_s25 + $0x70] sm:$0xff] %v3433_v1 }
 0x42e   : > { %v3385_v51 = vpop.f32.mrb[116].mxu1 }
 0x42f   : > { %v3387_v42 = vpop.f32.mrb[117].mxu1 }
 0x430   : > { %v3389_v24 = vpop.f32.mrb[118].mxu1 }
 0x431   : > { %v3391_v18 = vpop.f32.mrb[119].mxu1 }
 0x453   : > { %v3395_v7 = vpop.f32.mrb[120].mxu1 }
 0x454   : > { %v3438_v23 = vmax.f32 %v3375_v40, %v3395_v7  ;;  %v3397_v34 = vpop.f32.mrb[121].mxu1 }
 0x455   : > { %v3439_v49 = vmax.f32 %v3377_v2, %v3397_v34  ;;  %v3399_v54 = vpop.f32.mrb[122].mxu1 }
 0x456   : > { %v3440_v37 = vmax.f32 %v3379_v5, %v3399_v54  ;;  %v3401_v11 = vpop.f32.mrb[123].mxu1 }
 0x457   : > { %v3446_v14 = vmax.f32 %v3438_v23, %v3439_v49  ;;  %v3441_v32 = vmax.f32 %v3381_v15, %v3401_v11 }
 0x459   : > { %v3450_v21 = vadd.f32 %v5765_v39, %v3446_v14  ;;  %v3447_v62 = vmax.f32 %v3440_v37, %v3441_v32 }
 0x45b   : > { %v3454_v45 = vmax.f32 %v3450_v21, 0.0  ;;  %v3451_v53 = vadd.f32 %v5765_v39, %v3447_v62 }
 0x45d   : > { %3458 = vst [vmem:[%s5772_s25 + $0x18] sm:$0xff] %v3454_v45  ;;  %v3455_v12 = vmax.f32 %v3451_v53, 0.0 }
 0x45e   : > { %v3405_v13 = vpop.f32.mrb[124].mxu1 }
 0x45f   : > { %3459 = vst [vmem:[%s5772_s25 + $0x38] sm:$0xff] %v3455_v12  ;;  %v3442_v29 = vmax.f32 %v3385_v51, %v3405_v13  ;;  %v3407_v17 = vpop.f32.mrb[125].mxu1 }
 0x460   : > { %v3443_v61 = vmax.f32 %v3387_v42, %v3407_v17  ;;  %v3409_v41 = vpop.f32.mrb[126].mxu1 }
 0x461   : > { %v3444_v36 = vmax.f32 %v3389_v24, %v3409_v41  ;;  %v3411_v38 = vpop.f32.mrb[127].mxu1 }
 0x462   : > { %v3448_v48 = vmax.f32 %v3442_v29, %v3443_v61  ;;  %v3445_v25 = vmax.f32 %v3391_v18, %v3411_v38 }
 0x464   : > { %v3452_v16 = vadd.f32 %v5765_v39, %v3448_v48  ;;  %v3449_v56 = vmax.f32 %v3444_v36, %v3445_v25 }
 0x466   : > { %v3456_v0 = vmax.f32 %v3452_v16, 0.0  ;;  %v3453_v59 = vadd.f32 %v5765_v39, %v3449_v56 }
 0x468   : > { %3460 = vst [vmem:[%s5772_s25 + $0x58] sm:$0xff] %v3456_v0  ;;  %v3457_v3 = vmax.f32 %v3453_v59, 0.0 }
 0x46a   : > { %3461 = vst [vmem:[%s5772_s25 + $0x78] sm:$0xff] %v3457_v3 }
 0x46b PF: > { %s15_s18 = sadd.s32 1, %s4091_s18  }
 0x46c   : > { %p12_p4 = scmp.ge.s32.totalorder %s15_s18, 4  }
 0x46e   :  { %14 = sbr.rel (!%p12_p4) target bundleno = 1 (0x1), region = 70 }

</bundles_post_ra>
